<compile_context>
chip_gen: v6e
topology: v6e:2x2x1
jax: 0.10.0
libtpu: 0.0.40
codegen_flags: <defaults>
</compile_context>

<pallas_src>
import functools

import jax
import jax.numpy as jnp
from jax.experimental import pallas as pl
from jax.experimental.pallas import tpu as pltpu


# ---------------------------------------------------------------------------
# Path 1: fully fused single pallas_call (whole problem resident in VMEM).
# ---------------------------------------------------------------------------
def _fused_kernel(w_ref, gamma_ref, beta_ref, x_ref, res_ref, out_ref, *, inv_m, eps):
    # w_ref: [C, C] (input scale pre-folded into columns), gamma/beta: [C, 1]
    # x_ref / res_ref / out_ref: [C, HW]  (lane-dense spatial axis)
    y = jnp.dot(w_ref[...], x_ref[...], preferred_element_type=jnp.float32)
    mean = jnp.sum(y, axis=1, keepdims=True) * inv_m
    var = jnp.sum(y * y, axis=1, keepdims=True) * inv_m - mean * mean   # biased var
    a = gamma_ref[...] * jax.lax.rsqrt(var + eps)
    b = beta_ref[...] - mean * a
    out_ref[...] = res_ref[...] + a * y + b


# ---------------------------------------------------------------------------
# Path 2: streaming two-pass fallback for problems too large to hold in VMEM.
# ---------------------------------------------------------------------------
def _stats_kernel(w_ref, gamma_ref, beta_ref, x_ref,
                  a_ref, b_ref, sum_ref, sq_ref,
                  *, hw, tile_m, inv_m, eps, need_mask):
    n_i = pl.program_id(0)
    m_i = pl.program_id(1)

    @pl.when(jnp.logical_and(n_i == 0, m_i == 0))
    def _():
        sum_ref[...] = jnp.zeros_like(sum_ref)
        sq_ref[...] = jnp.zeros_like(sq_ref)

    y = jnp.dot(w_ref[...], x_ref[...], preferred_element_type=jnp.float32)

    if need_mask:
        # Emitted only when hw % tile_m != 0 (trace-time gate): the last spatial
        # tile's out-of-bounds columns hold stale VMEM and must not enter stats.
        col = m_i * tile_m + jax.lax.broadcasted_iota(jnp.int32, y.shape, 1)
        y = jnp.where(col < hw, y, 0.0)

    sum_ref[...] += jnp.sum(y, axis=1, keepdims=True)
    sq_ref[...] += jnp.sum(y * y, axis=1, keepdims=True)

    @pl.when(jnp.logical_and(n_i == pl.num_programs(0) - 1,
                             m_i == pl.num_programs(1) - 1))
    def _():
        mean = sum_ref[...] * inv_m
        var = sq_ref[...] * inv_m - mean * mean
        a = gamma_ref[...] * jax.lax.rsqrt(var + eps)
        a_ref[...] = a
        b_ref[...] = beta_ref[...] - mean * a


def _apply_kernel(w2_ref, b_ref, x_ref, res_ref, out_ref):
    # out = res + W2 @ x + b    (BN scale already folded into W2's rows)
    y = jnp.dot(w2_ref[...], x_ref[...], preferred_element_type=jnp.float32)
    out_ref[...] = res_ref[...] + y + b_ref[...]


def _choose_tile(hw, tile_m):
    """Pick a lane-dense spatial tile, preferring one that divides hw exactly."""
    if hw <= tile_m:
        return hw
    t = max(128, (min(tile_m, hw) // 128) * 128)
    cand = t
    while cand >= max(128, t // 2):     # don't shrink below t/2 chasing a divisor
        if hw % cand == 0:
            return cand
        cand -= 128
    return t


def fused_forward(x16, x11, x5, conv_w, gamma, beta, *,
                  tile_m=8192, force_two_pass=False,
                  fused_vmem_budget=12 * 1024 * 1024):
    """x16: [1,C,1,1], x11: [N,C,H,W], x5: [N,C,H,W], conv_w: [Cout,Cin,1,1]."""
    n, c, h, w = x11.shape
    hw = h * w
    m_total = n * hw
    eps = 1e-05
    itemsize = 4  # f32

    # Zero-cost reshapes only -- no HBM transposes.
    x_flat = x11.reshape(n, c, hw)
    res_flat = x5.reshape(n, c, hw)
    # Fold the per-channel input scale into the weight columns (48x48, negligible).
    w_mat = conv_w.reshape(c, c) * x16.reshape(1, c)
    gamma2 = gamma.reshape(c, 1)
    beta2 = beta.reshape(c, 1)

    # ---- Path 1: one fused call when x/res/out/y all fit comfortably in VMEM. ----
    footprint = 4 * c * hw * itemsize          # x, res, out, y (conservative budget)
    if (not force_two_pass) and n == 1 and footprint <= fused_vmem_budget:
        full_cm = pl.BlockSpec((c, hw), lambda i: (0, 0))
        param_cc = pl.BlockSpec((c, c), lambda i: (0, 0))
        param_c1 = pl.BlockSpec((c, 1), lambda i: (0, 0))
        out2 = pl.pallas_call(
            functools.partial(_fused_kernel, inv_m=1.0 / m_total, eps=eps),
            grid=(1,),
            in_specs=[param_cc, param_c1, param_c1, full_cm, full_cm],
            out_specs=full_cm,
            out_shape=jax.ShapeDtypeStruct((c, hw), jnp.float32),
            compiler_params=pltpu.CompilerParams(
                dimension_semantics=("arbitrary",),
                vmem_limit_bytes=32 * 1024 * 1024),
        )(w_mat, gamma2, beta2, x_flat.reshape(c, hw), res_flat.reshape(c, hw))
        return out2.reshape(n, c, h, w)

    # ---- Path 2: streaming two-pass (large N*HW). ----
    tm = _choose_tile(hw, tile_m)
    num_m = pl.cdiv(hw, tm)
    need_mask = (hw % tm) != 0
    grid = (n, num_m)

    param_cc = pl.BlockSpec((c, c), lambda ni, mi: (0, 0))
    param_c1 = pl.BlockSpec((c, 1), lambda ni, mi: (0, 0))
    xtile = pl.BlockSpec((None, c, tm), lambda ni, mi: (ni, 0, mi))

    cp_reduce = pltpu.CompilerParams(
        dimension_semantics=("arbitrary", "arbitrary"),   # sequential: scratch accum
        vmem_limit_bytes=32 * 1024 * 1024,
    )
    cp_parallel = pltpu.CompilerParams(
        dimension_semantics=("parallel", "parallel"),
        vmem_limit_bytes=32 * 1024 * 1024,
    )

    # Pass 1: batch statistics -> fused BN affine (a, b), each [C, 1].
    a_vec, b_vec = pl.pallas_call(
        functools.partial(_stats_kernel, hw=hw, tile_m=tm,
                          inv_m=1.0 / m_total, eps=eps, need_mask=need_mask),
        grid=grid,
        in_specs=[param_cc, param_c1, param_c1, xtile],
        out_specs=[param_c1, param_c1],
        out_shape=[jax.ShapeDtypeStruct((c, 1), jnp.float32),
                   jax.ShapeDtypeStruct((c, 1), jnp.float32)],
        scratch_shapes=[pltpu.VMEM((c, 1), jnp.float32),
                        pltpu.VMEM((c, 1), jnp.float32)],
        compiler_params=cp_reduce,
    )(w_mat, gamma2, beta2, x_flat)

    # Fold BN scale into the weight rows: a * (W @ x) == (a * W) @ x.  (48x48, free.)
    w2_mat = a_vec * w_mat

    # Pass 2: apply + residual add, lane-dense stores.
    out_flat = pl.pallas_call(
        _apply_kernel,
        grid=grid,
        in_specs=[param_cc, param_c1, xtile, xtile],
        out_specs=xtile,
        out_shape=jax.ShapeDtypeStruct((n, c, hw), jnp.float32),
        compiler_params=cp_parallel,
    )(w2_mat, b_vec, x_flat, res_flat)

    return out_flat.reshape(n, c, h, w)


def reference_forward(x16, x11, x5, conv_w, gamma, beta):
    """Pure-JAX reference mirroring the PyTorch module (training-mode BN)."""
    x17 = x16 * x11
    w2 = conv_w.reshape(conv_w.shape[0], conv_w.shape[1])
    x18 = jnp.einsum("nchw,oc->nohw", x17, w2,
                     precision=jax.lax.Precision.HIGHEST)
    mean = jnp.mean(x18, axis=(0, 2, 3), keepdims=True)
    var = jnp.mean((x18 - mean) ** 2, axis=(0, 2, 3), keepdims=True)
    x19 = (x18 - mean) / jnp.sqrt(var + 1e-05)
    x19 = x19 * gamma.reshape(1, -1, 1, 1) + beta.reshape(1, -1, 1, 1)
    return x5 + x19


if __name__ == "__main__":
    key = jax.random.PRNGKey(0)
    k1, k2, k3, k4, k5, k6 = jax.random.split(key, 6)

    N, C, H, W = 1, 48, 56, 56   # the module's native (small) shape; C fixed at 48

    x11 = jax.random.normal(k1, (N, C, H, W), dtype=jnp.float32)
    x16 = jax.random.normal(k2, (1, C, 1, 1), dtype=jnp.float32)
    x5 = jax.random.normal(k3, (N, C, H, W), dtype=jnp.float32)

    conv_w = 0.1 * jax.random.normal(k4, (C, C, 1, 1), dtype=jnp.float32)
    gamma = 1.0 + 0.1 * jax.random.normal(k5, (C,), dtype=jnp.float32)
    beta = 0.1 * jax.random.normal(k6, (C,), dtype=jnp.float32)

    ref = reference_forward(x16, x11, x5, conv_w, gamma, beta)

    # Path 1: fully fused single-call kernel (the default for this shape).
    out_fused = jax.block_until_ready(fused_forward(x16, x11, x5, conv_w, gamma, beta))
    assert out_fused.shape == (N, C, H, W)
    assert jnp.allclose(out_fused, ref, atol=5e-4, rtol=5e-4), "fused path mismatch"

    # Path 2: streaming two-pass fallback; small tile forces multi-tile stats
    # accumulation and exercises the last-tile padding mask (3136 % 512 != 0).
    out_stream = jax.block_until_ready(
        fused_forward(x16, x11, x5, conv_w, gamma, beta,
                      tile_m=512, force_two_pass=True))
    assert jnp.allclose(out_stream, ref, atol=5e-4, rtol=5e-4), "two-pass path mismatch"

    print("KERNEL_OK")
</pallas_src>

<mosaic_0001>
module attributes {stable_mosaic.version = 11 : i64} {
  func.func @_fused_kernel(%arg0: i32, %arg1: memref<48x48xf32, #tpu.memory_space<vmem>>, %arg2: memref<48x1xf32, #tpu.memory_space<vmem>>, %arg3: memref<48x1xf32, #tpu.memory_space<vmem>>, %arg4: memref<48x3136xf32, #tpu.memory_space<vmem>>, %arg5: memref<48x3136xf32, #tpu.memory_space<vmem>>, %arg6: memref<48x3136xf32, #tpu.memory_space<vmem>>) attributes {dimension_semantics = [#tpu.dimension_semantics<arbitrary>], iteration_bounds = array<i64: 1>, scalar_prefetch = 0 : i64, scratch_operands = 0 : i64, tpu.core_type = #tpu.core_type<tc>, window_params = [{pipeline_mode = #tpu.pipeline_mode<synchronous>, transform_indices = @transform_0, window_bounds = array<i64: 48, 48>}, {pipeline_mode = #tpu.pipeline_mode<synchronous>, transform_indices = @transform_1, window_bounds = array<i64: 48, 1>}, {pipeline_mode = #tpu.pipeline_mode<synchronous>, transform_indices = @transform_2, window_bounds = array<i64: 48, 1>}, {pipeline_mode = #tpu.pipeline_mode<synchronous>, transform_indices = @transform_3, window_bounds = array<i64: 48, 3136>}, {pipeline_mode = #tpu.pipeline_mode<synchronous>, transform_indices = @transform_4, window_bounds = array<i64: 48, 3136>}, {pipeline_mode = #tpu.pipeline_mode<synchronous>, transform_indices = @transform_5, window_bounds = array<i64: 48, 3136>}]} {
    %c0 = arith.constant 0 : index
    %c0_0 = arith.constant 0 : index
    %0 = vector.load %arg1[%c0, %c0_0] : memref<48x48xf32, #tpu.memory_space<vmem>>, vector<48x48xf32>
    %c0_1 = arith.constant 0 : index
    %c0_2 = arith.constant 0 : index
    %1 = vector.load %arg4[%c0_1, %c0_2] : memref<48x3136xf32, #tpu.memory_space<vmem>>, vector<48x3136xf32>
    %cst = arith.constant dense<0.000000e+00> : vector<48x3136xf32>
    %2 = tpu.matmul %0, %1, %cst {dimension_numbers = #tpu.dot_dimension_numbers<[1], [0], [0], [1], [0, 0, 1, 1], [], []>} : vector<48x48xf32>, vector<48x3136xf32>, vector<48x3136xf32> -> vector<48x3136xf32>
    %cst_3 = arith.constant dense<0.000000e+00> : vector<48xf32>
    %3 = vector.multi_reduction <add>, %2, %cst_3 [1] : vector<48x3136xf32> to vector<48xf32>
    %4 = vector.shape_cast %3 : vector<48xf32> to vector<48x1xf32>
    %cst_4 = arith.constant 3.18877544E-4 : f32
    %5 = vector.broadcast %cst_4 : f32 to vector<48x1xf32>
    %6 = arith.mulf %4, %5 : vector<48x1xf32>
    %7 = arith.mulf %2, %2 : vector<48x3136xf32>
    %cst_5 = arith.constant dense<0.000000e+00> : vector<48xf32>
    %8 = vector.multi_reduction <add>, %7, %cst_5 [1] : vector<48x3136xf32> to vector<48xf32>
    %9 = vector.shape_cast %8 : vector<48xf32> to vector<48x1xf32>
    %cst_6 = arith.constant 3.18877544E-4 : f32
    %10 = vector.broadcast %cst_6 : f32 to vector<48x1xf32>
    %11 = arith.mulf %9, %10 : vector<48x1xf32>
    %12 = arith.mulf %6, %6 : vector<48x1xf32>
    %13 = arith.subf %11, %12 : vector<48x1xf32>
    %c0_7 = arith.constant 0 : index
    %c0_8 = arith.constant 0 : index
    %14 = vector.load %arg2[%c0_7, %c0_8] : memref<48x1xf32, #tpu.memory_space<vmem>>, vector<48x1xf32>
    %cst_9 = arith.constant 9.99999974E-6 : f32
    %15 = vector.broadcast %cst_9 : f32 to vector<48x1xf32>
    %16 = arith.addf %13, %15 : vector<48x1xf32>
    %17 = math.rsqrt %16 : vector<48x1xf32>
    %18 = arith.mulf %14, %17 : vector<48x1xf32>
    %c0_10 = arith.constant 0 : index
    %c0_11 = arith.constant 0 : index
    %19 = vector.load %arg3[%c0_10, %c0_11] : memref<48x1xf32, #tpu.memory_space<vmem>>, vector<48x1xf32>
    %20 = arith.mulf %6, %18 : vector<48x1xf32>
    %21 = arith.subf %19, %20 : vector<48x1xf32>
    %c0_12 = arith.constant 0 : index
    %c0_13 = arith.constant 0 : index
    %22 = vector.load %arg5[%c0_12, %c0_13] : memref<48x3136xf32, #tpu.memory_space<vmem>>, vector<48x3136xf32>
    %23 = vector.broadcast %18 : vector<48x1xf32> to vector<48x3136xf32>
    %24 = arith.mulf %23, %2 : vector<48x3136xf32>
    %25 = arith.addf %22, %24 : vector<48x3136xf32>
    %26 = vector.broadcast %21 : vector<48x1xf32> to vector<48x3136xf32>
    %27 = arith.addf %25, %26 : vector<48x3136xf32>
    %c0_14 = arith.constant 0 : index
    %c0_15 = arith.constant 0 : index
    %28 = vector.load %arg6[%c0_14, %c0_15] : memref<48x3136xf32, #tpu.memory_space<vmem>>, vector<48x3136xf32>
    tpu.vector_store %arg6[%c0_14, %c0_15], %27 {strides = array<i32>} : memref<48x3136xf32, #tpu.memory_space<vmem>>, vector<48x3136xf32>,
    return
  }
  func.func @transform_0(%arg0: i32) -> (i32, i32) {
    %c0_i32 = arith.constant 0 : i32
    %c0_i32_0 = arith.constant 0 : i32
    %c0_i32_1 = arith.constant 0 : i32
    return %c0_i32, %c0_i32_0 : i32, i32
  }
  func.func @transform_1(%arg0: i32) -> (i32, i32) {
    %c0_i32 = arith.constant 0 : i32
    %c0_i32_0 = arith.constant 0 : i32
    %c0_i32_1 = arith.constant 0 : i32
    return %c0_i32, %c0_i32_0 : i32, i32
  }
  func.func @transform_2(%arg0: i32) -> (i32, i32) {
    %c0_i32 = arith.constant 0 : i32
    %c0_i32_0 = arith.constant 0 : i32
    %c0_i32_1 = arith.constant 0 : i32
    return %c0_i32, %c0_i32_0 : i32, i32
  }
  func.func @transform_3(%arg0: i32) -> (i32, i32) {
    %c0_i32 = arith.constant 0 : i32
    %c0_i32_0 = arith.constant 0 : i32
    %c0_i32_1 = arith.constant 0 : i32
    return %c0_i32, %c0_i32_0 : i32, i32
  }
  func.func @transform_4(%arg0: i32) -> (i32, i32) {
    %c0_i32 = arith.constant 0 : i32
    %c0_i32_0 = arith.constant 0 : i32
    %c0_i32_1 = arith.constant 0 : i32
    return %c0_i32, %c0_i32_0 : i32, i32
  }
  func.func @transform_5(%arg0: i32) -> (i32, i32) {
    %c0_i32 = arith.constant 0 : i32
    %c0_i32_0 = arith.constant 0 : i32
    %c0_i32_1 = arith.constant 0 : i32
    return %c0_i32, %c0_i32_0 : i32, i32
  }
}

</mosaic_0001>

<bundles_post_ra>
// kernel: tpu_custom_call.1
= control target key start
LH: loop header
LB: loop body
LE: loop exit
PB: predicated region body
PF: predicated region fallthrough
CT: control target
= control target key end

     0   :  { %10 = vsyncpa [#allocation3], 0  ;;  %s4830_s0 = inlined_call_operand.vmem [shape: f32[48,48], index: 0, kind: input, shape index: {}]   ;;  %s4831_s1 = inlined_call_operand.vmem [shape: f32[48,1], index: 1, kind: input, shape index: {}]   ;;  %s4832_s2 = inlined_call_operand.vmem [shape: f32[48,1], index: 2, kind: input, shape index: {}]   ;;  %s4833_s3 = inlined_call_operand.hbm [shape: f32[48,3136], index: 3, kind: input, shape index: {}]   ;;  %s4834_s4 = inlined_call_operand.hbm [shape: f32[48,3136], index: 4, kind: input, shape index: {}]   ;;  %s4835_s5 = inlined_call_operand.hbm [shape: f32[48,3136], index: 5, kind: output, shape index: {}]  }
   0x1   :  { %11 = vsyncpa [#allocation6], 0 }
   0x2   :  { %12 = vsyncpa [#allocation4], 0  ;;  %s3110_s18 = smov [#allocation2]  }
   0x3   :  { %s24_s19 = sshll.u32 %s3110_s18, 4  ;;  %s25_s19 = int_to_ptr.vmem [resolvable:$true] %s24_s19 }
   0x4   :  { %s3052_s20 = scalar_lea.vmem %s25_s19, 19200  ;;  %p3057_p1 = scmp.lt.s32.totalorder %s25_s19, %s25_s19 }
   0x5   :  { %p3053_p0 = scmp.ne.s32.totalorder %s25_s19, %s3052_s20  ;;  %p3058_p2 = scmp.lt.s32.totalorder %s3052_s20, %s3052_s20 }
   0x7   :  { %p3059_p3 = por %p3058_p2, %p3057_p1 }
   0x9   :  { %p3060_p4 = pnand %p3059_p3, %p3053_p0 }
   0xb   :  { %3063 = shalt.err (!%p3060_p4)
}
   0xc   :  { %s3111_s21 = smov 3200   ;;  %s3112_s22 = smov 200  }
   0xd   :  { %30 = dma.hbm_to_vmem [thread:$0]  %s4833_s3, 19200, %s25_s19, [#allocation3], %s3111_s21, %s3111_s21, %s3112_s22  }
   0xe   :  { %s3113_s25 = smov [#allocation5]  }
   0xf   :  { %s36_s26 = sshll.u32 %s3113_s25, 4  ;;  %s37_s26 = int_to_ptr.vmem [resolvable:$true] %s36_s26 }
  0x10   :  { %s3072_s27 = scalar_lea.vmem %s37_s26, 19200  ;;  %p3077_p6 = scmp.lt.s32.totalorder %s37_s26, %s37_s26 }
  0x11   :  { %p3073_p5 = scmp.ne.s32.totalorder %s37_s26, %s3072_s27  ;;  %p3078_p7 = scmp.lt.s32.totalorder %s3072_s27, %s3072_s27 }
  0x13   :  { %p3079_p8 = por %p3078_p7, %p3077_p6 }
  0x15   :  { %p3080_p9 = pnand %p3079_p8, %p3073_p5 }
  0x17   :  { %3083 = shalt.err (!%p3080_p9)
}
  0x18   :  { %42 = dma.hbm_to_vmem [thread:$0]  %s4834_s4, 19200, %s37_s26, [#allocation6], %s3111_s21, %s3111_s21, %s3112_s22  }
  0x19   :  { %3104 = dma.done.wait [#allocation3], 19200  }
  0x1a   :  { %3105 = vsyncadd [#allocation3], 4294948096 }
  0x1b   :  { %3106 = dma.done.wait [#allocation6], 19200  }
  0x1c   :  { %3107 = vsyncadd [#allocation6], 4294948096  ;;  %v3114_v0 = vmov 0.0   ;;  %v181_v1 = vld [vmem:[#allocation2 + $0x3f0] sm:$0xff]  ;;  %v183_v2 = vld [vmem:[#allocation2 + $0x400] sm:$0xff]  ;;  %vm205_vm0 = vcmask 392192  }
  0x1d   :  { %288 = vmatprep.mubr.f32.mxu0 %v3114_v0  ;;  %389 = vmatprep.mubr.f32.mxu1 %v3114_v0  ;;  %v180_v3 = vld [vmem:[#allocation2 + $0x3e8] sm:$0xff]  ;;  %v182_v4 = vld [vmem:[#allocation2 + $0x3f8] sm:$0xff]  ;;  %v155_v7 = vld [vmem:[#allocation2 + $0x320] sm:$0xff]  ;;  %vm1554_vm1 = vcmask 523264  }
  0x1e   :  { %244 = vmatprep.subr.mxu0 %v181_v1  ;;  %345 = vmatprep.subr.mxu1 %v183_v2  ;;  %v156_v5 = vld [vmem:[#allocation2 + $0x328] sm:$0xff]  ;;  %v158_v6 = vld [vmem:[#allocation2 + $0x338] sm:$0xff]  ;;  %v157_v8 = vld [vmem:[#allocation2 + $0x330] sm:$0xff] }
  0x1f   :  { %245 = vmatpush1.msra.mxu0 %v180_v3  ;;  %346 = vmatpush1.msra.mxu1 %v182_v4  ;;  %v131_v9 = vld [vmem:[#allocation2 + $0x260] sm:$0xff]  ;;  %v133_v10 = vld [vmem:[#allocation2 + $0x270] sm:$0xff]  ;;  %v130_v11 = vld [vmem:[#allocation2 + $0x258] sm:$0xff] }
  0x20   :  { %246 = vmatprep.subr.mxu0 %v156_v5  ;;  %347 = vmatprep.subr.mxu1 %v158_v6  ;;  %v132_v12 = vld [vmem:[#allocation2 + $0x268] sm:$0xff]  ;;  %v106_v13 = vld [vmem:[#allocation2 + $0x198] sm:$0xff]  ;;  %v105_v15 = vld [vmem:[#allocation2 + $0x190] sm:$0xff] }
  0x21   :  { %247 = vmatpush1.msra.mxu0 %v155_v7  ;;  %348 = vmatpush1.msra.mxu1 %v157_v8  ;;  %v108_v14 = vld [vmem:[#allocation2 + $0x1a8] sm:$0xff]  ;;  %v107_v16 = vld [vmem:[#allocation2 + $0x1a0] sm:$0xff]  ;;  %v81_v17 = vld [vmem:[#allocation2 + $0xd0] sm:$0xff] }
  0x22   :  { %248 = vmatprep.subr.mxu0 %v131_v9  ;;  %349 = vmatprep.subr.mxu1 %v133_v10  ;;  %v83_v18 = vld [vmem:[#allocation2 + $0xe0] sm:$0xff]  ;;  %v80_v19 = vld [vmem:[#allocation2 + $0xc8] sm:$0xff]  ;;  %v82_v20 = vld [vmem:[#allocation2 + $0xd8] sm:$0xff] }
  0x23   :  { %249 = vmatpush1.msra.mxu0 %v130_v11  ;;  %350 = vmatpush1.msra.mxu1 %v132_v12  ;;  %v56_v21 = vld [vmem:[#allocation2 + $0x8] sm:$0xff]  ;;  %v58_v22 = vld [vmem:[#allocation2 + $0x18] sm:$0xff]  ;;  %v55_v23 = vld [vmem:[#allocation2] sm:$0xff] }
  0x24   :  { %250 = vmatprep.subr.mxu0 %v106_v13  ;;  %351 = vmatprep.subr.mxu1 %v108_v14  ;;  %v57_v24 = vld [vmem:[#allocation2 + $0x10] sm:$0xff]  ;;  %v3164_v25 = vld [vmem:[%s4830_s0] sm:$0xff]  ;;  %v186_v27 = vld [vmem:[#allocation2 + $0x418] sm:$0xff] }
  0x25   :  { %251 = vmatpush1.msra.mxu0 %v105_v15  ;;  %352 = vmatpush1.msra.mxu1 %v107_v16  ;;  %v187_v26 = vld [vmem:[#allocation2 + $0x420] sm:$0xff]  ;;  %v185_v28 = vld [vmem:[#allocation2 + $0x410] sm:$0xff]  ;;  %v162_v29 = vld [vmem:[#allocation2 + $0x358] sm:$0xff] }
  0x26   :  { %252 = vmatprep.subr.mxu0 %v81_v17  ;;  %353 = vmatprep.subr.mxu1 %v83_v18  ;;  %v3174_v30 = vld [vmem:[%s4830_s0 + $0x8] sm:$0xff]  ;;  %v161_v32 = vld [vmem:[#allocation2 + $0x350] sm:$0xff]  ;;  %v159_v36 = vld [vmem:[#allocation2 + $0x340] sm:$0xff] }
  0x27   :  { %253 = vmatpush1.msra.mxu0 %v80_v19  ;;  %354 = vmatpush1.msra.mxu1 %v82_v20  ;;  %v184_v31 = vld [vmem:[#allocation2 + $0x408] sm:$0xff]  ;;  %v137_v34 = vld [vmem:[#allocation2 + $0x290] sm:$0xff]  ;;  %v135_v38 = vld [vmem:[#allocation2 + $0x280] sm:$0xff] }
  0x28   :  { %254 = vmatprep.subr.mxu0 %v56_v21  ;;  %355 = vmatprep.subr.mxu1 %v58_v22  ;;  %v160_v33 = vld [vmem:[#allocation2 + $0x348] sm:$0xff]  ;;  %v3184_v35 = vld [vmem:[%s4830_s0 + $0x10] sm:$0xff]  ;;  %v3195_v40 = vld [vmem:[%s4830_s0 + $0x18] sm:$0xff] }
  0x29   :  { %255 = vmatpush1.msra.mxu0 %v55_v23  ;;  %356 = vmatpush1.msra.mxu1 %v57_v24  ;;  %v136_v37 = vld [vmem:[#allocation2 + $0x288] sm:$0xff]  ;;  %v134_v41 = vld [vmem:[#allocation2 + $0x278] sm:$0xff]  ;;  %v111_v42 = vld [vmem:[#allocation2 + $0x1c0] sm:$0xff] }
  0x2a   :  { %2900 = vmatmul.mubr.msk.f32.vlgmr.msra.gmra.mxu0 %vm205_vm0, %v3164_v25  ;;  %2906 = vmatmul.mubr.msk.f32.vlgmr.msra.gmra.mxu1 %vm205_vm0, %v3164_v25  ;;  %v112_v39 = vld [vmem:[#allocation2 + $0x1c8] sm:$0xff]  ;;  %v110_v43 = vld [vmem:[#allocation2 + $0x1b8] sm:$0xff]  ;;  %v87_v44 = vld [vmem:[#allocation2 + $0x100] sm:$0xff] }
  0x2b   :  { %547 = vmatprep.subr.mxu1 %v187_v26  ;;  %294 = vmatprep.mubr.f32.mxu0 %v3114_v0  ;;  %v3206_v45 = vld [vmem:[%s4830_s0 + $0x20] sm:$0xff]  ;;  %v109_v46 = vld [vmem:[#allocation2 + $0x1b0] sm:$0xff]  ;;  %v86_v47 = vld [vmem:[#allocation2 + $0xf8] sm:$0xff] }
  0x2c   :  { %548 = vmatpush1.msra.mxu1 %v186_v27  ;;  %395 = vmatprep.mubr.f32.mxu1 %v3114_v0  ;;  %v85_v48 = vld [vmem:[#allocation2 + $0xf0] sm:$0xff]  ;;  %v62_v49 = vld [vmem:[#allocation2 + $0x38] sm:$0xff]  ;;  %v3217_v50 = vld [vmem:[%s4830_s0 + $0x28] sm:$0xff] }
  0x2d   :  { %446 = vmatprep.subr.mxu0 %v185_v28  ;;  %549 = vmatprep.subr.mxu1 %v162_v29  ;;  %v84_v51 = vld [vmem:[#allocation2 + $0xe8] sm:$0xff]  ;;  %v61_v52 = vld [vmem:[#allocation2 + $0x30] sm:$0xff]  ;;  %v59_v54 = vld [vmem:[#allocation2 + $0x20] sm:$0xff] }
  0x2e   :  { %2901 = vmatmul.mubr.msk.f32.gmra.mxu0 %vm205_vm0, %v3174_v30  ;;  %2907 = vmatmul.mubr.msk.f32.gmra.mxu1 %vm205_vm0, %v3174_v30  ;;  %v60_v53 = vld [vmem:[#allocation2 + $0x28] sm:$0xff]  ;;  %v191_v55 = vld [vmem:[#allocation2 + $0x440] sm:$0xff]  ;;  %v190_v56 = vld [vmem:[#allocation2 + $0x438] sm:$0xff] }
  0x2f   :  { %447 = vmatpush1.msra.mxu0 %v184_v31  ;;  %550 = vmatpush1.msra.mxu1 %v161_v32  ;;  %v189_v57 = vld [vmem:[#allocation2 + $0x430] sm:$0xff]  ;;  %v166_v58 = vld [vmem:[#allocation2 + $0x378] sm:$0xff]  ;;  %v188_v59 = vld [vmem:[#allocation2 + $0x428] sm:$0xff] }
  0x30   :  { %300 = vmatprep.mubr.f32.mxu0 %v3114_v0  ;;  %401 = vmatprep.mubr.f32.mxu1 %v3114_v0  ;;  %v165_v60 = vld [vmem:[#allocation2 + $0x370] sm:$0xff]  ;;  %v164_v61 = vld [vmem:[#allocation2 + $0x368] sm:$0xff]  ;;  %v163_v63 = vld [vmem:[#allocation2 + $0x360] sm:$0xff] }
  0x31   :  { %448 = vmatprep.subr.mxu0 %v160_v33  ;;  %551 = vmatprep.subr.mxu1 %v137_v34  ;;  %v141_v62 = vld [vmem:[#allocation2 + $0x2b0] sm:$0xff]  ;;  %v140_v1 = vld [vmem:[#allocation2 + $0x2a8] sm:$0xff]  ;;  %v139_v2 = vld [vmem:[#allocation2 + $0x2a0] sm:$0xff] }
  0x32   :  { %2902 = vmatmul.mubr.msk.f32.gmra.mxu0 %vm205_vm0, %v3184_v35  ;;  %2908 = vmatmul.mubr.msk.f32.gmra.mxu1 %vm205_vm0, %v3184_v35  ;;  %v116_v3 = vld [vmem:[#allocation2 + $0x1e8] sm:$0xff]  ;;  %v138_v4 = vld [vmem:[#allocation2 + $0x298] sm:$0xff]  ;;  %v115_v5 = vld [vmem:[#allocation2 + $0x1e0] sm:$0xff] }
  0x33   :  { %449 = vmatpush1.msra.mxu0 %v159_v36  ;;  %552 = vmatpush1.msra.mxu1 %v136_v37  ;;  %v114_v6 = vld [vmem:[#allocation2 + $0x1d8] sm:$0xff]  ;;  %v91_v7 = vld [vmem:[#allocation2 + $0x120] sm:$0xff]  ;;  %v113_v8 = vld [vmem:[#allocation2 + $0x1d0] sm:$0xff] }
  0x34   :  { %306 = vmatprep.mubr.f32.mxu0 %v3114_v0  ;;  %407 = vmatprep.mubr.f32.mxu1 %v3114_v0  ;;  %v90_v9 = vld [vmem:[#allocation2 + $0x118] sm:$0xff]  ;;  %v89_v10 = vld [vmem:[#allocation2 + $0x110] sm:$0xff]  ;;  %v88_v12 = vld [vmem:[#allocation2 + $0x108] sm:$0xff] }
  0x35   :  { %450 = vmatprep.subr.mxu0 %v135_v38  ;;  %553 = vmatprep.subr.mxu1 %v112_v39  ;;  %v66_v11 = vld [vmem:[#allocation2 + $0x58] sm:$0xff]  ;;  %v65_v13 = vld [vmem:[#allocation2 + $0x50] sm:$0xff]  ;;  %v64_v14 = vld [vmem:[#allocation2 + $0x48] sm:$0xff] }
  0x36   :  { %2903 = vmatmul.mubr.msk.f32.gmra.mxu0 %vm205_vm0, %v3195_v40  ;;  %2909 = vmatmul.mubr.msk.f32.gmra.mxu1 %vm205_vm0, %v3195_v40  ;;  %v63_v15 = vld [vmem:[#allocation2 + $0x40] sm:$0xff]  ;;  %v194_v17 = vld [vmem:[#allocation2 + $0x458] sm:$0xff]  ;;  %v193_v18 = vld [vmem:[#allocation2 + $0x450] sm:$0xff] }
  0x37   :  { %451 = vmatpush1.msra.mxu0 %v134_v41  ;;  %554 = vmatpush1.msra.mxu1 %v111_v42  ;;  %v195_v16 = vld [vmem:[#allocation2 + $0x460] sm:$0xff]  ;;  %v170_v19 = vld [vmem:[#allocation2 + $0x398] sm:$0xff]  ;;  %v192_v20 = vld [vmem:[#allocation2 + $0x448] sm:$0xff] }
  0x38   :  { %312 = vmatprep.mubr.f32.mxu0 %v3114_v0  ;;  %413 = vmatprep.mubr.f32.mxu1 %v3114_v0  ;;  %v169_v21 = vld [vmem:[#allocation2 + $0x390] sm:$0xff]  ;;  %v168_v22 = vld [vmem:[#allocation2 + $0x388] sm:$0xff]  ;;  %v167_v24 = vld [vmem:[#allocation2 + $0x380] sm:$0xff] }
  0x39   :  { %452 = vmatprep.subr.mxu0 %v110_v43  ;;  %555 = vmatprep.subr.mxu1 %v87_v44  ;;  %v145_v23 = vld [vmem:[#allocation2 + $0x2d0] sm:$0xff]  ;;  %v144_v26 = vld [vmem:[#allocation2 + $0x2c8] sm:$0xff]  ;;  %v143_v27 = vld [vmem:[#allocation2 + $0x2c0] sm:$0xff] }
  0x3a   :  { %2904 = vmatmul.mubr.msk.f32.gmra.mxu0 %vm205_vm0, %v3206_v45  ;;  %2910 = vmatmul.mubr.msk.f32.gmra.mxu1 %vm205_vm0, %v3206_v45  ;;  %v120_v28 = vld [vmem:[#allocation2 + $0x208] sm:$0xff]  ;;  %v142_v29 = vld [vmem:[#allocation2 + $0x2b8] sm:$0xff]  ;;  %v119_v31 = vld [vmem:[#allocation2 + $0x200] sm:$0xff] }
  0x3b   :  { %453 = vmatpush1.msra.mxu0 %v109_v46  ;;  %556 = vmatpush1.msra.mxu1 %v86_v47  ;;  %v118_v32 = vld [vmem:[#allocation2 + $0x1f8] sm:$0xff]  ;;  %v95_v33 = vld [vmem:[#allocation2 + $0x140] sm:$0xff]  ;;  %v117_v34 = vld [vmem:[#allocation2 + $0x1f0] sm:$0xff] }
  0x3c   :  { %318 = vmatprep.mubr.f32.mxu0 %v3114_v0  ;;  %419 = vmatprep.mubr.f32.mxu1 %v3114_v0  ;;  %v94_v36 = vld [vmem:[#allocation2 + $0x138] sm:$0xff]  ;;  %v93_v37 = vld [vmem:[#allocation2 + $0x130] sm:$0xff]  ;;  %v92_v39 = vld [vmem:[#allocation2 + $0x128] sm:$0xff] }
  0x3d   :  { %454 = vmatprep.subr.mxu0 %v85_v48  ;;  %557 = vmatprep.subr.mxu1 %v62_v49  ;;  %v70_v38 = vld [vmem:[#allocation2 + $0x78] sm:$0xff]  ;;  %v69_v41 = vld [vmem:[#allocation2 + $0x70] sm:$0xff]  ;;  %v68_v42 = vld [vmem:[#allocation2 + $0x68] sm:$0xff] }
  0x3e   :  { %2905 = vmatmul.mubr.msk.f32.gmra.mxu0 %vm205_vm0, %v3217_v50  ;;  %2911 = vmatmul.mubr.msk.f32.gmra.mxu1 %vm205_vm0, %v3217_v50  ;;  %v67_v43 = vld [vmem:[#allocation2 + $0x60] sm:$0xff]  ;;  %v198_v46 = vld [vmem:[#allocation2 + $0x478] sm:$0xff]  ;;  %v197_v47 = vld [vmem:[#allocation2 + $0x470] sm:$0xff] }
  0x3f   :  { %455 = vmatpush1.msra.mxu0 %v84_v51  ;;  %558 = vmatpush1.msra.mxu1 %v61_v52  ;;  %v199_v44 = vld [vmem:[#allocation2 + $0x480] sm:$0xff]  ;;  %v174_v48 = vld [vmem:[#allocation2 + $0x3b8] sm:$0xff]  ;;  %v196_v49 = vld [vmem:[#allocation2 + $0x468] sm:$0xff] }
  0x40   :  { %456 = vmatprep.subr.mxu0 %v60_v53  ;;  %490 = vmatprep.mubr.f32.mxu0 %v3114_v0  ;;  %v173_v51 = vld [vmem:[#allocation2 + $0x3b0] sm:$0xff]  ;;  %v172_v52 = vld [vmem:[#allocation2 + $0x3a8] sm:$0xff] }
  0x41   :  { %457 = vmatpush1.msra.mxu0 %v59_v54  ;;  %591 = vmatprep.mubr.f32.mxu1 %v3114_v0  ;;  %v149_v53 = vld [vmem:[#allocation2 + $0x2f0] sm:$0xff]  ;;  %v171_v54 = vld [vmem:[#allocation2 + $0x3a0] sm:$0xff] }
  0x42   :  { %2912 = vmatmul.mubr.msk.f32.vlgmr.msra.gmra.mxu0 %vm205_vm0, %v3164_v25  ;;  %2918 = vmatmul.mubr.msk.f32.vlgmr.msra.gmra.mxu1 %vm205_vm0, %v3164_v25 }
  0x43   :  { %749 = vmatprep.subr.mxu1 %v191_v55  ;;  %496 = vmatprep.mubr.f32.mxu0 %v3114_v0  ;;  %v148_v55 = vld [vmem:[#allocation2 + $0x2e8] sm:$0xff] }
  0x44   :  { %750 = vmatpush1.msra.mxu1 %v190_v56  ;;  %597 = vmatprep.mubr.f32.mxu1 %v3114_v0  ;;  %v147_v56 = vld [vmem:[#allocation2 + $0x2e0] sm:$0xff] }
  0x45   :  { %648 = vmatprep.subr.mxu0 %v189_v57  ;;  %751 = vmatprep.subr.mxu1 %v166_v58  ;;  %v124_v57 = vld [vmem:[#allocation2 + $0x228] sm:$0xff]  ;;  %v146_v58 = vld [vmem:[#allocation2 + $0x2d8] sm:$0xff] }
  0x46   :  { %2913 = vmatmul.mubr.msk.f32.gmra.mxu0 %vm205_vm0, %v3174_v30  ;;  %2919 = vmatmul.mubr.msk.f32.gmra.mxu1 %vm205_vm0, %v3174_v30 }
  0x47   :  { %649 = vmatpush1.msra.mxu0 %v188_v59  ;;  %752 = vmatpush1.msra.mxu1 %v165_v60  ;;  %v123_v59 = vld [vmem:[#allocation2 + $0x220] sm:$0xff]  ;;  %v122_v60 = vld [vmem:[#allocation2 + $0x218] sm:$0xff] }
  0x48   :  { %502 = vmatprep.mubr.f32.mxu0 %v3114_v0  ;;  %603 = vmatprep.mubr.f32.mxu1 %v3114_v0 }
  0x49   :  { %650 = vmatprep.subr.mxu0 %v164_v61  ;;  %753 = vmatprep.subr.mxu1 %v141_v62  ;;  %v99_v61 = vld [vmem:[#allocation2 + $0x160] sm:$0xff]  ;;  %v121_v62 = vld [vmem:[#allocation2 + $0x210] sm:$0xff] }
  0x4a   :  { %2914 = vmatmul.mubr.msk.f32.gmra.mxu0 %vm205_vm0, %v3184_v35  ;;  %2920 = vmatmul.mubr.msk.f32.gmra.mxu1 %vm205_vm0, %v3184_v35 }
  0x4b   :  { %651 = vmatpush1.msra.mxu0 %v163_v63  ;;  %754 = vmatpush1.msra.mxu1 %v140_v1  ;;  %v98_v63 = vld [vmem:[#allocation2 + $0x158] sm:$0xff]  ;;  %v97_v1 = vld [vmem:[#allocation2 + $0x150] sm:$0xff] }
  0x4c   :  { %508 = vmatprep.mubr.f32.mxu0 %v3114_v0  ;;  %609 = vmatprep.mubr.f32.mxu1 %v3114_v0 }
  0x4d   :  { %652 = vmatprep.subr.mxu0 %v139_v2  ;;  %755 = vmatprep.subr.mxu1 %v116_v3  ;;  %v74_v2 = vld [vmem:[#allocation2 + $0x98] sm:$0xff]  ;;  %v96_v3 = vld [vmem:[#allocation2 + $0x148] sm:$0xff] }
  0x4e   :  { %2915 = vmatmul.mubr.msk.f32.gmra.mxu0 %vm205_vm0, %v3195_v40  ;;  %2921 = vmatmul.mubr.msk.f32.gmra.mxu1 %vm205_vm0, %v3195_v40 }
  0x4f   :  { %653 = vmatpush1.msra.mxu0 %v138_v4  ;;  %756 = vmatpush1.msra.mxu1 %v115_v5  ;;  %v73_v4 = vld [vmem:[#allocation2 + $0x90] sm:$0xff]  ;;  %v72_v5 = vld [vmem:[#allocation2 + $0x88] sm:$0xff] }
  0x50   :  { %514 = vmatprep.mubr.f32.mxu0 %v3114_v0  ;;  %615 = vmatprep.mubr.f32.mxu1 %v3114_v0 }
  0x51   :  { %654 = vmatprep.subr.mxu0 %v114_v6  ;;  %757 = vmatprep.subr.mxu1 %v91_v7  ;;  %v71_v6 = vld [vmem:[#allocation2 + $0x80] sm:$0xff] }
  0x52   :  { %2916 = vmatmul.mubr.msk.f32.gmra.mxu0 %vm205_vm0, %v3206_v45  ;;  %2922 = vmatmul.mubr.msk.f32.gmra.mxu1 %vm205_vm0, %v3206_v45  ;;  %v203_v7 = vld [vmem:[#allocation2 + $0x4a0] sm:$0xff] }
  0x53   :  { %655 = vmatpush1.msra.mxu0 %v113_v8  ;;  %758 = vmatpush1.msra.mxu1 %v90_v9  ;;  %v202_v8 = vld [vmem:[#allocation2 + $0x498] sm:$0xff]  ;;  %v201_v9 = vld [vmem:[#allocation2 + $0x490] sm:$0xff] }
  0x54   :  { %520 = vmatprep.mubr.f32.mxu0 %v3114_v0  ;;  %621 = vmatprep.mubr.f32.mxu1 %v3114_v0 }
  0x55   :  { %656 = vmatprep.subr.mxu0 %v89_v10  ;;  %759 = vmatprep.subr.mxu1 %v66_v11  ;;  %v178_v10 = vld [vmem:[#allocation2 + $0x3d8] sm:$0xff]  ;;  %v200_v11 = vld [vmem:[#allocation2 + $0x488] sm:$0xff] }
  0x56   :  { %2917 = vmatmul.mubr.msk.f32.gmra.mxu0 %vm205_vm0, %v3217_v50  ;;  %2923 = vmatmul.mubr.msk.f32.gmra.mxu1 %vm205_vm0, %v3217_v50 }
  0x57   :  { %657 = vmatpush1.msra.mxu0 %v88_v12  ;;  %760 = vmatpush1.msra.mxu1 %v65_v13  ;;  %v177_v12 = vld [vmem:[#allocation2 + $0x3d0] sm:$0xff]  ;;  %v176_v13 = vld [vmem:[#allocation2 + $0x3c8] sm:$0xff] }
  0x58   :  { %658 = vmatprep.subr.mxu0 %v64_v14  ;;  %692 = vmatprep.mubr.f32.mxu0 %v3114_v0  ;;  %v153_v14 = vld [vmem:[#allocation2 + $0x310] sm:$0xff] }
  0x59   :  { %659 = vmatpush1.msra.mxu0 %v63_v15  ;;  %793 = vmatprep.mubr.f32.mxu1 %v3114_v0  ;;  %v175_v15 = vld [vmem:[#allocation2 + $0x3c0] sm:$0xff] }
  0x5a   :  { %2924 = vmatmul.mubr.msk.f32.vlgmr.msra.gmra.mxu0 %vm205_vm0, %v3164_v25  ;;  %2930 = vmatmul.mubr.msk.f32.vlgmr.msra.gmra.mxu1 %vm205_vm0, %v3164_v25 }
  0x5b   :  { %951 = vmatprep.subr.mxu1 %v195_v16  ;;  %698 = vmatprep.mubr.f32.mxu0 %v3114_v0  ;;  %v152_v16 = vld [vmem:[#allocation2 + $0x308] sm:$0xff] }
  0x5c   :  { %952 = vmatpush1.msra.mxu1 %v194_v17  ;;  %799 = vmatprep.mubr.f32.mxu1 %v3114_v0  ;;  %v151_v17 = vld [vmem:[#allocation2 + $0x300] sm:$0xff] }
  0x5d   :  { %850 = vmatprep.subr.mxu0 %v193_v18  ;;  %953 = vmatprep.subr.mxu1 %v170_v19  ;;  %v128_v18 = vld [vmem:[#allocation2 + $0x248] sm:$0xff]  ;;  %v150_v19 = vld [vmem:[#allocation2 + $0x2f8] sm:$0xff] }
  0x5e   :  { %2925 = vmatmul.mubr.msk.f32.gmra.mxu0 %vm205_vm0, %v3174_v30  ;;  %2931 = vmatmul.mubr.msk.f32.gmra.mxu1 %vm205_vm0, %v3174_v30 }
  0x5f   :  { %851 = vmatpush1.msra.mxu0 %v192_v20  ;;  %954 = vmatpush1.msra.mxu1 %v169_v21  ;;  %v127_v20 = vld [vmem:[#allocation2 + $0x240] sm:$0xff]  ;;  %v126_v21 = vld [vmem:[#allocation2 + $0x238] sm:$0xff] }
  0x60   :  { %704 = vmatprep.mubr.f32.mxu0 %v3114_v0  ;;  %805 = vmatprep.mubr.f32.mxu1 %v3114_v0 }
  0x61   :  { %852 = vmatprep.subr.mxu0 %v168_v22  ;;  %955 = vmatprep.subr.mxu1 %v145_v23  ;;  %v103_v22 = vld [vmem:[#allocation2 + $0x180] sm:$0xff]  ;;  %v125_v23 = vld [vmem:[#allocation2 + $0x230] sm:$0xff] }
  0x62   :  { %2926 = vmatmul.mubr.msk.f32.gmra.mxu0 %vm205_vm0, %v3184_v35  ;;  %2932 = vmatmul.mubr.msk.f32.gmra.mxu1 %vm205_vm0, %v3184_v35 }
  0x63   :  { %853 = vmatpush1.msra.mxu0 %v167_v24  ;;  %956 = vmatpush1.msra.mxu1 %v144_v26  ;;  %v102_v24 = vld [vmem:[#allocation2 + $0x178] sm:$0xff]  ;;  %v101_v26 = vld [vmem:[#allocation2 + $0x170] sm:$0xff] }
  0x64   :  { %710 = vmatprep.mubr.f32.mxu0 %v3114_v0  ;;  %811 = vmatprep.mubr.f32.mxu1 %v3114_v0 }
  0x65   :  { %854 = vmatprep.subr.mxu0 %v143_v27  ;;  %957 = vmatprep.subr.mxu1 %v120_v28  ;;  %v78_v27 = vld [vmem:[#allocation2 + $0xb8] sm:$0xff]  ;;  %v100_v28 = vld [vmem:[#allocation2 + $0x168] sm:$0xff] }
  0x66   :  { %2927 = vmatmul.mubr.msk.f32.gmra.mxu0 %vm205_vm0, %v3195_v40  ;;  %2933 = vmatmul.mubr.msk.f32.gmra.mxu1 %vm205_vm0, %v3195_v40 }
  0x67   :  { %855 = vmatpush1.msra.mxu0 %v142_v29  ;;  %958 = vmatpush1.msra.mxu1 %v119_v31  ;;  %v77_v29 = vld [vmem:[#allocation2 + $0xb0] sm:$0xff]  ;;  %v76_v31 = vld [vmem:[#allocation2 + $0xa8] sm:$0xff] }
  0x68   :  { %716 = vmatprep.mubr.f32.mxu0 %v3114_v0  ;;  %817 = vmatprep.mubr.f32.mxu1 %v3114_v0 }
  0x69   :  { %856 = vmatprep.subr.mxu0 %v118_v32  ;;  %959 = vmatprep.subr.mxu1 %v95_v33  ;;  %v75_v32 = vld [vmem:[#allocation2 + $0xa0] sm:$0xff]  ;;  %v204_v33 = vld [vmem:[#allocation2 + $0x4a8] sm:$0xff] }
  0x6a   :  { %2928 = vmatmul.mubr.msk.f32.gmra.mxu0 %vm205_vm0, %v3206_v45  ;;  %2934 = vmatmul.mubr.msk.f32.gmra.mxu1 %vm205_vm0, %v3206_v45 }
  0x6b   :  { %857 = vmatpush1.msra.mxu0 %v117_v34  ;;  %960 = vmatpush1.msra.mxu1 %v94_v36  ;;  %v179_v34 = vld [vmem:[#allocation2 + $0x3e0] sm:$0xff]  ;;  %v154_v36 = vld [vmem:[#allocation2 + $0x318] sm:$0xff] }
  0x6c   :  { %722 = vmatprep.mubr.f32.mxu0 %v3114_v0  ;;  %823 = vmatprep.mubr.f32.mxu1 %v3114_v0 }
  0x6d   :  { %858 = vmatprep.subr.mxu0 %v93_v37  ;;  %961 = vmatprep.subr.mxu1 %v70_v38  ;;  %v129_v37 = vld [vmem:[#allocation2 + $0x250] sm:$0xff]  ;;  %v104_v38 = vld [vmem:[#allocation2 + $0x188] sm:$0xff] }
  0x6e   :  { %2929 = vmatmul.mubr.msk.f32.gmra.mxu0 %vm205_vm0, %v3217_v50  ;;  %2935 = vmatmul.mubr.msk.f32.gmra.mxu1 %vm205_vm0, %v3217_v50 }
  0x6f   :  { %859 = vmatpush1.msra.mxu0 %v92_v39  ;;  %962 = vmatpush1.msra.mxu1 %v69_v41  ;;  %v79_v39 = vld [vmem:[#allocation2 + $0xc0] sm:$0xff] }
  0x70   :  { %860 = vmatprep.subr.mxu0 %v68_v42  ;;  %894 = vmatprep.mubr.f32.mxu0 %v3114_v0 }
  0x71   :  { %861 = vmatpush1.msra.mxu0 %v67_v43  ;;  %995 = vmatprep.mubr.f32.mxu1 %v3114_v0 }
  0x72   :  { %2936 = vmatmul.mubr.msk.f32.vlgmr.msra.gmra.mxu0 %vm205_vm0, %v3164_v25  ;;  %2942 = vmatmul.mubr.msk.f32.vlgmr.msra.gmra.mxu1 %vm205_vm0, %v3164_v25 }
  0x73   :  { %1153 = vmatprep.subr.mxu1 %v199_v44  ;;  %900 = vmatprep.mubr.f32.mxu0 %v3114_v0 }
  0x74   :  { %1154 = vmatpush1.msra.mxu1 %v198_v46  ;;  %1001 = vmatprep.mubr.f32.mxu1 %v3114_v0 }
  0x75   :  { %1052 = vmatprep.subr.mxu0 %v197_v47  ;;  %1155 = vmatprep.subr.mxu1 %v174_v48 }
  0x76   :  { %2937 = vmatmul.mubr.msk.f32.gmra.mxu0 %vm205_vm0, %v3174_v30  ;;  %2943 = vmatmul.mubr.msk.f32.gmra.mxu1 %vm205_vm0, %v3174_v30 }
  0x77   :  { %1053 = vmatpush1.msra.mxu0 %v196_v49  ;;  %1156 = vmatpush1.msra.mxu1 %v173_v51 }
  0x78   :  { %906 = vmatprep.mubr.f32.mxu0 %v3114_v0  ;;  %1007 = vmatprep.mubr.f32.mxu1 %v3114_v0 }
  0x79   :  { %1054 = vmatprep.subr.mxu0 %v172_v52  ;;  %1157 = vmatprep.subr.mxu1 %v149_v53 }
  0x7a   :  { %2938 = vmatmul.mubr.msk.f32.gmra.mxu0 %vm205_vm0, %v3184_v35  ;;  %2944 = vmatmul.mubr.msk.f32.gmra.mxu1 %vm205_vm0, %v3184_v35 }
  0x7b   :  { %1055 = vmatpush1.msra.mxu0 %v171_v54  ;;  %1158 = vmatpush1.msra.mxu1 %v148_v55 }
  0x7c   :  { %912 = vmatprep.mubr.f32.mxu0 %v3114_v0  ;;  %1013 = vmatprep.mubr.f32.mxu1 %v3114_v0 }
  0x7d   :  { %1056 = vmatprep.subr.mxu0 %v147_v56  ;;  %1159 = vmatprep.subr.mxu1 %v124_v57 }
  0x7e   :  { %2939 = vmatmul.mubr.msk.f32.gmra.mxu0 %vm205_vm0, %v3195_v40  ;;  %2945 = vmatmul.mubr.msk.f32.gmra.mxu1 %vm205_vm0, %v3195_v40 }
  0x7f   :  { %1057 = vmatpush1.msra.mxu0 %v146_v58  ;;  %1160 = vmatpush1.msra.mxu1 %v123_v59 }
  0x80   :  { %918 = vmatprep.mubr.f32.mxu0 %v3114_v0  ;;  %1019 = vmatprep.mubr.f32.mxu1 %v3114_v0 }
  0x81   :  { %1058 = vmatprep.subr.mxu0 %v122_v60  ;;  %1161 = vmatprep.subr.mxu1 %v99_v61 }
  0x82   :  { %2940 = vmatmul.mubr.msk.f32.gmra.mxu0 %vm205_vm0, %v3206_v45  ;;  %2946 = vmatmul.mubr.msk.f32.gmra.mxu1 %vm205_vm0, %v3206_v45 }
  0x83   :  { %1059 = vmatpush1.msra.mxu0 %v121_v62  ;;  %1162 = vmatpush1.msra.mxu1 %v98_v63 }
  0x84   :  { %924 = vmatprep.mubr.f32.mxu0 %v3114_v0  ;;  %1025 = vmatprep.mubr.f32.mxu1 %v3114_v0 }
  0x85   :  { %1060 = vmatprep.subr.mxu0 %v97_v1  ;;  %1163 = vmatprep.subr.mxu1 %v74_v2 }
  0x86   :  { %2941 = vmatmul.mubr.msk.f32.gmra.mxu0 %vm205_vm0, %v3217_v50  ;;  %2947 = vmatmul.mubr.msk.f32.gmra.mxu1 %vm205_vm0, %v3217_v50 }
  0x87   :  { %1061 = vmatpush1.msra.mxu0 %v96_v3  ;;  %1164 = vmatpush1.msra.mxu1 %v73_v4 }
  0x88   :  { %1062 = vmatprep.subr.mxu0 %v72_v5  ;;  %1096 = vmatprep.mubr.f32.mxu0 %v3114_v0 }
  0x89   :  { %1063 = vmatpush1.msra.mxu0 %v71_v6  ;;  %1197 = vmatprep.mubr.f32.mxu1 %v3114_v0 }
  0x8a   :  { %2948 = vmatmul.mubr.msk.f32.vlgmr.msra.gmra.mxu0 %vm205_vm0, %v3164_v25  ;;  %2954 = vmatmul.mubr.msk.f32.vlgmr.msra.gmra.mxu1 %vm205_vm0, %v3164_v25 }
  0x8b   :  { %1355 = vmatprep.subr.mxu1 %v203_v7  ;;  %1102 = vmatprep.mubr.f32.mxu0 %v3114_v0 }
  0x8c   :  { %1356 = vmatpush1.msra.mxu1 %v202_v8  ;;  %1203 = vmatprep.mubr.f32.mxu1 %v3114_v0 }
  0x8d   :  { %1254 = vmatprep.subr.mxu0 %v201_v9  ;;  %1357 = vmatprep.subr.mxu1 %v178_v10 }
  0x8e   :  { %2949 = vmatmul.mubr.msk.f32.gmra.mxu0 %vm205_vm0, %v3174_v30  ;;  %2955 = vmatmul.mubr.msk.f32.gmra.mxu1 %vm205_vm0, %v3174_v30 }
  0x8f   :  { %1255 = vmatpush1.msra.mxu0 %v200_v11  ;;  %1358 = vmatpush1.msra.mxu1 %v177_v12 }
  0x90   :  { %1108 = vmatprep.mubr.f32.mxu0 %v3114_v0  ;;  %1209 = vmatprep.mubr.f32.mxu1 %v3114_v0 }
  0x91   :  { %1256 = vmatprep.subr.mxu0 %v176_v13  ;;  %1359 = vmatprep.subr.mxu1 %v153_v14 }
  0x92   :  { %2950 = vmatmul.mubr.msk.f32.gmra.mxu0 %vm205_vm0, %v3184_v35  ;;  %2956 = vmatmul.mubr.msk.f32.gmra.mxu1 %vm205_vm0, %v3184_v35 }
  0x93   :  { %1257 = vmatpush1.msra.mxu0 %v175_v15  ;;  %1360 = vmatpush1.msra.mxu1 %v152_v16 }
  0x94   :  { %1114 = vmatprep.mubr.f32.mxu0 %v3114_v0  ;;  %1215 = vmatprep.mubr.f32.mxu1 %v3114_v0 }
  0x95   :  { %1258 = vmatprep.subr.mxu0 %v151_v17  ;;  %1361 = vmatprep.subr.mxu1 %v128_v18 }
  0x96   :  { %2951 = vmatmul.mubr.msk.f32.gmra.mxu0 %vm205_vm0, %v3195_v40  ;;  %2957 = vmatmul.mubr.msk.f32.gmra.mxu1 %vm205_vm0, %v3195_v40 }
  0x97   :  { %1259 = vmatpush1.msra.mxu0 %v150_v19  ;;  %1362 = vmatpush1.msra.mxu1 %v127_v20 }
  0x98   :  { %1120 = vmatprep.mubr.f32.mxu0 %v3114_v0  ;;  %1221 = vmatprep.mubr.f32.mxu1 %v3114_v0 }
  0x99   :  { %1260 = vmatprep.subr.mxu0 %v126_v21  ;;  %1363 = vmatprep.subr.mxu1 %v103_v22 }
  0x9a   :  { %2952 = vmatmul.mubr.msk.f32.gmra.mxu0 %vm205_vm0, %v3206_v45  ;;  %2958 = vmatmul.mubr.msk.f32.gmra.mxu1 %vm205_vm0, %v3206_v45 }
  0x9b   :  { %1261 = vmatpush1.msra.mxu0 %v125_v23  ;;  %1364 = vmatpush1.msra.mxu1 %v102_v24 }
  0x9c   :  { %1126 = vmatprep.mubr.f32.mxu0 %v3114_v0  ;;  %1227 = vmatprep.mubr.f32.mxu1 %v3114_v0 }
  0x9d   :  { %1262 = vmatprep.subr.mxu0 %v101_v26  ;;  %1365 = vmatprep.subr.mxu1 %v78_v27 }
  0x9e   :  { %2953 = vmatmul.mubr.msk.f32.gmra.mxu0 %vm205_vm0, %v3217_v50  ;;  %2959 = vmatmul.mubr.msk.f32.gmra.mxu1 %vm205_vm0, %v3217_v50 }
  0x9f   :  { %1263 = vmatpush1.msra.mxu0 %v100_v28  ;;  %1366 = vmatpush1.msra.mxu1 %v77_v29 }
  0xa0   :  { %1264 = vmatprep.subr.mxu0 %v76_v31  ;;  %1298 = vmatprep.mubr.f32.mxu0 %v3114_v0 }
  0xa1   :  { %1265 = vmatpush1.msra.mxu0 %v75_v32  ;;  %1399 = vmatprep.mubr.f32.mxu1 %v3114_v0 }
  0xa2   :  { %2960 = vmatmul.mubr.msk.f32.vlgmr.msra.gmra.mxu0 %vm205_vm0, %v3164_v25  ;;  %2966 = vmatmul.mubr.msk.f32.vlgmr.msra.gmra.mxu1 %vm205_vm0, %v3164_v25 }
  0xa3   :  { %3011 = vmatprep.subr.mxu1 %v204_v33  ;;  %1304 = vmatprep.mubr.f32.mxu0 %v3114_v0 }
  0xa4   :  { %3017 = vmatpush3.msra.mxu1 %v204_v33  ;;  %1405 = vmatprep.mubr.f32.mxu1 %v3114_v0 }
  0xa5   :  { %2990 = vmatprep.subr.mxu0 %v204_v33  ;;  %3012 = vmatprep.subr.mxu1 %v179_v34 }
  0xa6   :  { %2961 = vmatmul.mubr.msk.f32.gmra.mxu0 %vm205_vm0, %v3174_v30  ;;  %2967 = vmatmul.mubr.msk.f32.gmra.mxu1 %vm205_vm0, %v3174_v30 }
  0xa7   :  { %2991 = vmatpush3.msra.mxu0 %v204_v33  ;;  %3018 = vmatpush3.msra.mxu1 %v179_v34 }
  0xa8   :  { %1310 = vmatprep.mubr.f32.mxu0 %v3114_v0  ;;  %1411 = vmatprep.mubr.f32.mxu1 %v3114_v0 }
  0xa9   :  { %2992 = vmatprep.subr.mxu0 %v179_v34  ;;  %3013 = vmatprep.subr.mxu1 %v154_v36 }
  0xaa   :  { %2962 = vmatmul.mubr.msk.f32.gmra.mxu0 %vm205_vm0, %v3184_v35  ;;  %2968 = vmatmul.mubr.msk.f32.gmra.mxu1 %vm205_vm0, %v3184_v35 }
  0xab   :  { %2993 = vmatpush3.msra.mxu0 %v179_v34  ;;  %3019 = vmatpush3.msra.mxu1 %v154_v36 }
  0xac   :  { %1316 = vmatprep.mubr.f32.mxu0 %v3114_v0  ;;  %1417 = vmatprep.mubr.f32.mxu1 %v3114_v0 }
  0xad   :  { %2994 = vmatprep.subr.mxu0 %v154_v36  ;;  %3014 = vmatprep.subr.mxu1 %v129_v37 }
  0xae   :  { %2963 = vmatmul.mubr.msk.f32.gmra.mxu0 %vm205_vm0, %v3195_v40  ;;  %2969 = vmatmul.mubr.msk.f32.gmra.mxu1 %vm205_vm0, %v3195_v40 }
  0xaf   :  { %2995 = vmatpush3.msra.mxu0 %v154_v36  ;;  %3020 = vmatpush3.msra.mxu1 %v129_v37 }
  0xb0   :  { %1322 = vmatprep.mubr.f32.mxu0 %v3114_v0  ;;  %1423 = vmatprep.mubr.f32.mxu1 %v3114_v0 }
  0xb1   :  { %2996 = vmatprep.subr.mxu0 %v129_v37  ;;  %3015 = vmatprep.subr.mxu1 %v104_v38 }
  0xb2   :  { %2964 = vmatmul.mubr.msk.f32.gmra.mxu0 %vm205_vm0, %v3206_v45  ;;  %2970 = vmatmul.mubr.msk.f32.gmra.mxu1 %vm205_vm0, %v3206_v45 }
  0xb3   :  { %2997 = vmatpush3.msra.mxu0 %v129_v37  ;;  %3021 = vmatpush3.msra.mxu1 %v104_v38 }
  0xb4   :  { %1328 = vmatprep.mubr.f32.mxu0 %v3114_v0  ;;  %1429 = vmatprep.mubr.f32.mxu1 %v3114_v0 }
  0xb5   :  { %2998 = vmatprep.subr.mxu0 %v104_v38  ;;  %3016 = vmatprep.subr.mxu1 %v79_v39 }
  0xb6   :  { %2965 = vmatmul.mubr.msk.f32.gmra.mxu0 %vm205_vm0, %v3217_v50  ;;  %2971 = vmatmul.mubr.msk.f32.gmra.mxu1 %vm205_vm0, %v3217_v50 }
  0xb7   :  { %2999 = vmatpush3.msra.mxu0 %v104_v38  ;;  %3022 = vmatpush3.msra.mxu1 %v79_v39 }
  0xb8   :  { %3000 = vmatprep.subr.mxu0 %v79_v39  ;;  %3002 = vmatprep.mubr.msk.f32.mxu0 %vm205_vm0, %v3164_v25 }
  0xb9   :  { %3001 = vmatpush3.msra.mxu0 %v79_v39  ;;  %3005 = vmatprep.mubr.msk.f32.mxu1 %vm205_vm0, %v3184_v35 }
  0xba   :  { %3003 = vmatmul.mubr.msk.f32.vlgmr.msra.gmra.mxu0 %vm205_vm0, %v3174_v30  ;;  %3006 = vmatmul.mubr.msk.f32.vlgmr.msra.gmra.mxu1 %vm205_vm0, %v3195_v40 }
  0xbb   :  { %3008 = vmatprep.mubr.msk.f32.mxu1 %vm205_vm0, %v3206_v45 }
  0xbe   :  { %3009 = vmatmul.mubr.msk.f32.gmra.mxu1 %vm205_vm0, %v3217_v50 }
  0xea   :  { %v3417_v0 = vpop.f32.mrf.mxu0  ;;  %v3419_v41 = vpop.f32.mrf.mxu1 }
  0xeb   :  { %4966 = vst [vmem:[#allocation11_spill] sm:$0xff] %v3417_v0  ;;  %4967 = vst [vmem:[#allocation12_spill] sm:$0xff] %v3419_v41  ;;  %v1700_v19 = vmul.f32 %v3417_v0, %v3417_v0  ;;  %v1702_v38 = vmul.f32 %v3419_v41, %v3419_v41 }
  0xec   :  { %v3421_v25 = vpop.f32.mrf.mxu0  ;;  %v3423_v42 = vpop.f32.mrf.mxu1 }
  0xed   :  { %4968 = vst [vmem:[#allocation13_spill] sm:$0xff] %v3421_v25  ;;  %4969 = vst [vmem:[#allocation14_spill] sm:$0xff] %v3423_v42  ;;  %v1701_v20 = vmul.f32 %v3421_v25, %v3421_v25  ;;  %v1531_v26 = vadd.f32 %v3421_v25, %v3417_v0 }
  0xee   :  { %v3425_v35 = vpop.f32.mrf.mxu0  ;;  %v3427_v30 = vpop.f32.mrf.mxu1 }
  0xef   :  { %4970 = vst [vmem:[#allocation15_spill] sm:$0xff] %v3425_v35  ;;  %4971 = vst [vmem:[#allocation16_spill] sm:$0xff] %v3427_v30  ;;  %v1725_v21 = vmul.f32 %v3425_v35, %v3425_v35  ;;  %v1850_v29 = vadd.f32 %v1701_v20, %v1700_v19  ;;  %v1532_v39 = vadd.f32 %v1531_v26, %v3419_v41 }
  0xf0   :  { %v3429_v43 = vpop.f32.mrf.mxu0  ;;  %v3431_v40 = vpop.f32.mrf.mxu1  ;;  %v1727_v19 = vmul.f32 %v3427_v30, %v3427_v30 }
  0xf1   :  { %4972 = vst [vmem:[#allocation17_spill] sm:$0xff] %v3429_v43  ;;  %4973 = vst [vmem:[#allocation18_spill] sm:$0xff] %v3431_v40  ;;  %v1726_v22 = vmul.f32 %v3429_v43, %v3429_v43  ;;  %v1559_v31 = vadd.f32 %v3429_v43, %v3425_v35 }
  0xf2   :  { %v3433_v45 = vpop.f32.mrf.mxu0  ;;  %v3435_v44 = vpop.f32.mrf.mxu1 }
  0xf3   :  { %4974 = vst [vmem:[#allocation19_spill] sm:$0xff] %v3433_v45  ;;  %4975 = vst [vmem:[#allocation20_spill] sm:$0xff] %v3435_v44  ;;  %v1750_v32 = vmul.f32 %v3433_v45, %v3433_v45  ;;  %v1877_v34 = vadd.f32 %v1726_v22, %v1725_v21  ;;  %v1851_v21 = vadd.f32 %v1850_v29, %v1702_v38 }
  0xf4   :  { %v3437_v50 = vpop.f32.mrf.mxu0  ;;  %v3439_v46 = vpop.f32.mrf.mxu1  ;;  %v1560_v22 = vadd.f32 %v1559_v31, %v3427_v30  ;;  %v1703_v29 = vmul.f32 %v3423_v42, %v3423_v42  ;;  %v1752_v31 = vmul.f32 %v3435_v44, %v3435_v44  ;;  %v1728_v38 = vmul.f32 %v3431_v40, %v3431_v40 }
  0xf5   :  { %4976 = vst [vmem:[#allocation21_spill] sm:$0xff] %v3437_v50  ;;  %4977 = vst [vmem:[#allocation22_spill] sm:$0xff] %v3439_v46  ;;  %v1751_v33 = vmul.f32 %v3437_v50, %v3437_v50  ;;  %v1586_v20 = vadd.f32 %v3437_v50, %v3433_v45  ;;  %v1878_v35 = vadd.f32 %v1877_v34, %v1727_v19 }
  0xf6   :  { %v3441_v47 = vpop.f32.mrf.mxu0  ;;  %v3443_v48 = vpop.f32.mrf.mxu1  ;;  %v1533_v34 = vadd.f32 %v1532_v39, %v3423_v42  ;;  %v1561_v30 = vadd.f32 %v1560_v22, %v3431_v40 }
  0xf7   :  { %4978 = vst [vmem:[#allocation23_spill] sm:$0xff] %v3441_v47  ;;  %4979 = vst [vmem:[#allocation24_spill] sm:$0xff] %v3443_v48  ;;  %v1904_v43 = vadd.f32 %v1751_v33, %v1750_v32  ;;  %v1587_v19 = vadd.f32 %v1586_v20, %v3435_v44 }
  0xf8   :  { %v3445_v49 = vpop.f32.mrf.mxu0  ;;  %v3447_v51 = vpop.f32.mrf.mxu1 }
  0xf9   :  { %4980 = vst [vmem:[#allocation25_spill] sm:$0xff] %v3445_v49  ;;  %4981 = vst [vmem:[#allocation26_spill] sm:$0xff] %v3447_v51  ;;  %v1613_v26 = vadd.f32 %v3445_v49, %v3441_v47  ;;  %v1776_v41 = vmul.f32 %v3445_v49, %v3445_v49 }
  0xfa   :  { %v3449_v52 = vpop.f32.mrf.mxu0  ;;  %v3451_v53 = vpop.f32.mrf.mxu1 }
  0xfb   :  { %4982 = vst [vmem:[#allocation27_spill] sm:$0xff] %v3449_v52  ;;  %4983 = vst [vmem:[#allocation28_spill] sm:$0xff] %v3451_v53  ;;  %v1800_v32 = vmul.f32 %v3449_v52, %v3449_v52  ;;  %v1614_v39 = vadd.f32 %v1613_v26, %v3443_v48 }
  0xfc   :  { %v3453_v54 = vpop.f32.mrf.mxu0  ;;  %v3455_v55 = vpop.f32.mrf.mxu1 }
  0xfd   :  { %4984 = vst [vmem:[#allocation29_spill] sm:$0xff] %v3453_v54  ;;  %4985 = vst [vmem:[#allocation30_spill] sm:$0xff] %v3455_v55  ;;  %v1801_v33 = vmul.f32 %v3453_v54, %v3453_v54  ;;  %v1640_v42 = vadd.f32 %v3453_v54, %v3449_v52  ;;  %v1615_v54 = vadd.f32 %v1614_v39, %v3447_v51 }
  0xfe   :  { %v3457_v56 = vpop.f32.mrf.mxu0  ;;  %v3459_v57 = vpop.f32.mrf.mxu1 }
  0xff   :  { %4986 = vst [vmem:[#allocation31_spill] sm:$0xff] %v3457_v56  ;;  %4987 = vst [vmem:[#allocation32_spill] sm:$0xff] %v3459_v57  ;;  %v1958_v44 = vadd.f32 %v1801_v33, %v1800_v32  ;;  %v1778_v33 = vmul.f32 %v3447_v51, %v3447_v51  ;;  %v1641_v52 = vadd.f32 %v1640_v42, %v3451_v53 }
 0x100   :  { %v3461_v58 = vpop.f32.mrf.mxu0  ;;  %v3463_v59 = vpop.f32.mrf.mxu1 }
 0x101   :  { %4988 = vst [vmem:[#allocation33_spill] sm:$0xff] %v3461_v58  ;;  %4989 = vst [vmem:[#allocation34_spill] sm:$0xff] %v3463_v59  ;;  %v1667_v22 = vadd.f32 %v3461_v58, %v3457_v56 }
 0x102   :  { %v3465_v60 = vpop.f32.mrf.mxu0  ;;  %v3467_v61 = vpop.f32.mrf.mxu1 }
 0x103   :  { %4990 = vst [vmem:[#allocation35_spill] sm:$0xff] %v3465_v60  ;;  %4991 = vst [vmem:[#allocation36_spill] sm:$0xff] %v3467_v61  ;;  %v1704_v26 = vmul.f32 %v3465_v60, %v3465_v60 }
 0x104   :  { %v3469_v62 = vpop.f32.mrf.mxu0  ;;  %v3471_v63 = vpop.f32.mrf.mxu1 }
 0x105   :  { %4992 = vst [vmem:[#allocation37_spill] sm:$0xff] %v3469_v62  ;;  %4993 = vst [vmem:[#allocation38_spill] sm:$0xff] %v3471_v63  ;;  %v1705_v42 = vmul.f32 %v3469_v62, %v3469_v62 }
 0x106   :  { %v3473_v1 = vpop.f32.mrf.mxu0  ;;  %v3475_v2 = vpop.f32.mrf.mxu1 }
 0x107   :  { %4994 = vst [vmem:[#allocation39_spill] sm:$0xff] %v3473_v1 }
 0x108   :  { %v3477_v3 = vpop.f32.mrf.mxu0  ;;  %v3479_v4 = vpop.f32.mrf.mxu1 }
 0x109   :  { %4995 = vst [vmem:[#allocation40_spill] sm:$0xff] %v3479_v4 }
 0x10a   :  { %v3481_v5 = vpop.f32.mrf.mxu0  ;;  %v3483_v6 = vpop.f32.mrf.mxu1 }
 0x10b   :  { %4996 = vst [vmem:[#allocation41_spill] sm:$0xff] %v3481_v5  ;;  %4997 = vst [vmem:[#allocation42_spill] sm:$0xff] %v3483_v6 }
 0x10c   :  { %v3485_v7 = vpop.f32.mrf.mxu0  ;;  %v3487_v8 = vpop.f32.mrf.mxu1 }
 0x10d   :  { %4998 = vst [vmem:[#allocation43_spill] sm:$0xff] %v3485_v7  ;;  %4999 = vst [vmem:[#allocation44_spill] sm:$0xff] %v3487_v8 }
 0x10e   :  { %v3489_v9 = vpop.f32.mrf.mxu0  ;;  %v3491_v10 = vpop.f32.mrf.mxu1 }
 0x10f   :  { %5000 = vst [vmem:[#allocation45_spill] sm:$0xff] %v3489_v9  ;;  %5001 = vst [vmem:[#allocation46_spill] sm:$0xff] %v3491_v10 }
 0x110   :  { %v3493_v11 = vpop.f32.mrf.mxu0  ;;  %v3495_v12 = vpop.f32.mrf.mxu1 }
 0x111   :  { %5002 = vst [vmem:[#allocation47_spill] sm:$0xff] %v3493_v11  ;;  %5003 = vst [vmem:[#allocation48_spill] sm:$0xff] %v3495_v12 }
 0x112   :  { %v3497_v13 = vpop.f32.mrf.mxu0  ;;  %v3499_v14 = vpop.f32.mrf.mxu1 }
 0x113   :  { %5004 = vst [vmem:[#allocation49_spill] sm:$0xff] %v3497_v13  ;;  %5005 = vst [vmem:[#allocation50_spill] sm:$0xff] %v3499_v14 }
 0x114   :  { %v3501_v15 = vpop.f32.mrf.mxu0  ;;  %v3503_v16 = vpop.f32.mrf.mxu1 }
 0x115   :  { %5006 = vst [vmem:[#allocation51_spill] sm:$0xff] %v3501_v15  ;;  %5007 = vst [vmem:[#allocation52_spill] sm:$0xff] %v3503_v16 }
 0x116   :  { %v3505_v17 = vpop.f32.mrf.mxu0  ;;  %v3507_v18 = vpop.f32.mrf.mxu1 }
 0x117   :  { %5008 = vst [vmem:[#allocation53_spill] sm:$0xff] %v3505_v17  ;;  %5009 = vst [vmem:[#allocation54_spill] sm:$0xff] %v3507_v18 }
 0x118   :  { %v3517_v23 = vpop.f32.mrf.mxu0  ;;  %v3519_v24 = vpop.f32.mrf.mxu1 }
 0x119   :  { %5010 = vst [vmem:[#allocation55_spill] sm:$0xff] %v3517_v23  ;;  %5011 = vst [vmem:[#allocation56_spill] sm:$0xff] %v3519_v24  ;;  %v1879_v24 = vadd.f32 %v1878_v35, %v1728_v38  ;;  %v1826_v35 = vmul.f32 %v3461_v58, %v3461_v58  ;;  %v1802_v38 = vmul.f32 %v3451_v53, %v3451_v53 }
 0x11a   :  { %v3523_v27 = vpop.f32.mrf.mxu0  ;;  %v3525_v28 = vpop.f32.mrf.mxu1  ;;  %v1803_v58 = vmul.f32 %v3455_v55, %v3455_v55 }
 0x11b   :  { %5012 = vst [vmem:[#allocation57_spill] sm:$0xff] %v3523_v27  ;;  %5013 = vst [vmem:[#allocation58_spill] sm:$0xff] %v3525_v28 }
 0x11c   :  { %v3533_v36 = vpop.f32.mrf.mxu0  ;;  %v3535_v37 = vpop.f32.mrf.mxu1 }
 0x11d   :  { %5014 = vst [vmem:[#allocation59_spill] sm:$0xff] %v3533_v36  ;;  %5015 = vst [vmem:[#allocation60_spill] sm:$0xff] %v3535_v37  ;;  %v1775_v37 = vmul.f32 %v3441_v47, %v3441_v47  ;;  %v1852_v47 = vadd.f32 %v1851_v21, %v1703_v29  ;;  %v1825_v21 = vmul.f32 %v3457_v56, %v3457_v56 }
 0x11e   :  { %v3544_v25 = vpop.f32.mrf.mxu0  ;;  %v3546_v0 = vpop.f32.mrf.mxu1 }
 0x11f   :  { %5016 = vst [vmem:[#allocation61_spill] sm:$0xff] %v3544_v25  ;;  %5017 = vst [vmem:[#allocation62_spill] sm:$0xff] %v3546_v0  ;;  %v1905_v0 = vadd.f32 %v1904_v43, %v1752_v31  ;;  %v1777_v43 = vmul.f32 %v3443_v48, %v3443_v48  ;;  %v1985_v48 = vadd.f32 %v1826_v35, %v1825_v21 }
 0x120   :  { %v3555_v28 = vpop.f32.mrf.mxu0  ;;  %v3557_v50 = vpop.f32.mrf.mxu1  ;;  %v1853_v40 = vadd.f32 %v1852_v47, %v1704_v26  ;;  %v1754_v47 = vmul.f32 %v3481_v5, %v3481_v5  ;;  %v1642_v35 = vadd.f32 %v1641_v52, %v3455_v55 }
 0x121   :  { %5018 = vst [vmem:[#allocation63_spill] sm:$0xff] %v3555_v28  ;;  %5019 = vst [vmem:[#allocation64_spill] sm:$0xff] %v3557_v50  ;;  %v1753_v50 = vmul.f32 %v3439_v46, %v3439_v46  ;;  %v1931_v28 = vadd.f32 %v1776_v41, %v1775_v37  ;;  %v1588_v41 = vadd.f32 %v1587_v19, %v3439_v46 }
 0x122   :  { %v3571_v45 = vpop.f32.mrf.mxu0  ;;  %v3573_v49 = vpop.f32.mrf.mxu1  ;;  %v1534_v37 = vadd.f32 %v1533_v34, %v3465_v60  ;;  %v1729_v19 = vmul.f32 %v3473_v1, %v3473_v1  ;;  %v1827_v46 = vmul.f32 %v3459_v57, %v3459_v57  ;;  %v1668_v60 = vadd.f32 %v1667_v22, %v3459_v57 }
 0x123   :  { %5020 = vst [vmem:[#allocation65_spill] sm:$0xff] %v3571_v45  ;;  %5021 = vst [vmem:[#allocation66_spill] sm:$0xff] %v3573_v49  ;;  %v1906_v32 = vadd.f32 %v1905_v0, %v1753_v50  ;;  %v1932_v34 = vadd.f32 %v1931_v28, %v1777_v43  ;;  %v1959_v50 = vadd.f32 %v1958_v44, %v1802_v38 }
 0x124   :  { %v3581_v16 = vpop.f32.mrf.mxu0  ;;  %v3583_v20 = vpop.f32.mrf.mxu1  ;;  %v1535_v39 = vadd.f32 %v1534_v37, %v3469_v62  ;;  %v1562_v28 = vadd.f32 %v1561_v30, %v3473_v1  ;;  %v1880_v51 = vadd.f32 %v1879_v24, %v1729_v19  ;;  %v1730_v44 = vmul.f32 %v3477_v3, %v3477_v3 }
 0x125   :  { %5022 = vst [vmem:[#allocation67_spill] sm:$0xff] %v3581_v16  ;;  %5023 = vst [vmem:[#allocation68_spill] sm:$0xff] %v3583_v20  ;;  %v1589_v21 = vadd.f32 %v1588_v41, %v3481_v5  ;;  %v1933_v22 = vadd.f32 %v1932_v34, %v1778_v33  ;;  %v1828_v37 = vmul.f32 %v3463_v59, %v3463_v59 }
 0x126   :  { %v3597_v29 = vpop.f32.mrf.mxu0  ;;  %v3599_v31 = vpop.f32.mrf.mxu1  ;;  %v1779_v30 = vmul.f32 %v3489_v9, %v3489_v9  ;;  %v1960_v38 = vadd.f32 %v1959_v50, %v1803_v58  ;;  %v1669_v19 = vadd.f32 %v1668_v60, %v3463_v59  ;;  %v1986_v41 = vadd.f32 %v1985_v48, %v1827_v46 }
 0x127   :  { %5024 = vst [vmem:[#allocation69_spill] sm:$0xff] %v3597_v29  ;;  %5025 = vst [vmem:[#allocation70_spill] sm:$0xff] %v3599_v31  ;;  %v1706_v57 = vmul.f32 %v3467_v61, %v3467_v61  ;;  %v1854_v33 = vadd.f32 %v1853_v40, %v1705_v42  ;;  %v1536_v52 = vadd.f32 %v1535_v39, %v3467_v61 }
 0x128   :  { %v3611_v56 = vpop.f32.mrf.mxu0  ;;  %v3613_v0 = vpop.f32.mrf.mxu1  ;;  %v1707_v34 = vmul.f32 %v3471_v63, %v3471_v63  ;;  %v1563_v55 = vadd.f32 %v1562_v28, %v3477_v3  ;;  %v1881_v1 = vadd.f32 %v1880_v51, %v1730_v44  ;;  %v1907_v58 = vadd.f32 %v1906_v32, %v1754_v47 }
 0x129   :  { %5026 = vst [vmem:[#allocation71_spill] sm:$0xff] %v3611_v56  ;;  %5027 = vst [vmem:[#allocation72_spill] sm:$0xff] %v3613_v0  ;;  %v1590_v60 = vadd.f32 %v1589_v21, %v3485_v7  ;;  %v1755_v46 = vmul.f32 %v3485_v7, %v3485_v7  ;;  %v1616_v40 = vadd.f32 %v1615_v54, %v3489_v9 }
 0x12a   :  { %v3622_v43 = vpop.f32.mrf.mxu0  ;;  %v3624_v53 = vpop.f32.mrf.mxu1  ;;  %v1934_v48 = vadd.f32 %v1933_v22, %v1779_v30  ;;  %v1780_v50 = vmul.f32 %v3493_v11, %v3493_v11  ;;  %v1804_v39 = vmul.f32 %v3497_v13, %v3497_v13  ;;  %v1987_v51 = vadd.f32 %v1986_v41, %v1828_v37 }
 0x12b   :  { %5028 = vst [vmem:[#allocation73_spill] sm:$0xff] %v3622_v43  ;;  %5029 = vst [vmem:[#allocation74_spill] sm:$0xff] %v3624_v53  ;;  %v1731_v32 = vmul.f32 %v3475_v2, %v3475_v2  ;;  %v1643_v44 = vadd.f32 %v1642_v35, %v3497_v13  ;;  %v1829_v54 = vmul.f32 %v3505_v17, %v3505_v17 }
 0x12c   :  { %v3636_v26 = vpop.f32.mrf.mxu0  ;;  %v3638_v24 = vpop.f32.mrf.mxu1  ;;  %v1537_v21 = vadd.f32 %v1536_v52, %v3471_v63  ;;  %v1855_v47 = vadd.f32 %v1854_v33, %v1706_v57  ;;  %v1564_v22 = vadd.f32 %v1563_v55, %v3475_v2  ;;  %v1732_v30 = vmul.f32 %v3479_v4, %v3479_v4 }
 0x12d   :  { %5030 = vst [vmem:[#allocation75_spill] sm:$0xff] %v3636_v26  ;;  %5031 = vst [vmem:[#allocation76_spill] sm:$0xff] %v3638_v24  ;;  %v1882_v37 = vadd.f32 %v1881_v1, %v1731_v32  ;;  %v1756_v41 = vmul.f32 %v3483_v6, %v3483_v6  ;;  %v1908_v35 = vadd.f32 %v1907_v58, %v1755_v46 }
 0x12e   :  { %v3647_v5 = vpop.f32.mrf.mxu0  ;;  %v3649_v62 = vpop.f32.mrf.mxu1  ;;  %v1591_v13 = vadd.f32 %v1590_v60, %v3483_v6  ;;  %v1617_v9 = vadd.f32 %v1616_v40, %v3493_v11  ;;  %v1935_v52 = vadd.f32 %v1934_v48, %v1780_v50  ;;  %v1961_v57 = vadd.f32 %v1960_v38, %v1804_v39 }
 0x12f   :  { %5032 = vst [vmem:[#allocation77_spill] sm:$0xff] %v3647_v5  ;;  %5033 = vst [vmem:[#allocation78_spill] sm:$0xff] %v3649_v62  ;;  %v1805_v55 = vmul.f32 %v3501_v15, %v3501_v15  ;;  %v1644_v61 = vadd.f32 %v1643_v44, %v3501_v15  ;;  %v1670_v1 = vadd.f32 %v1669_v19, %v3505_v17 }
 0x130   :  { %v3659_v42 = vpop.f32.mrf.mxu0  ;;  %v3661_v28 = vpop.f32.mrf.mxu1  ;;  %v1988_v32 = vadd.f32 %v1987_v51, %v1829_v54  ;;  %v1830_v58 = vmul.f32 %v3517_v23, %v3517_v23  ;;  %v1856_v60 = vadd.f32 %v1855_v47, %v1707_v34  ;;  %v1565_v46 = vadd.f32 %v1564_v22, %v3479_v4 }
 0x131   :  { %5034 = vst [vmem:[#allocation79_spill] sm:$0xff] %v3659_v42  ;;  %5035 = vst [vmem:[#allocation80_spill] sm:$0xff] %v3661_v28  ;;  %v1781_v38 = vmul.f32 %v3491_v10, %v3491_v10  ;;  %v1708_v40 = vmul.f32 %v3523_v27, %v3523_v27  ;;  %v1883_v39 = vadd.f32 %v1882_v37, %v1732_v30 }
 0x132   :  { %v3672_v59 = vpop.f32.mrf.mxu0  ;;  %v3674_v7 = vpop.f32.mrf.mxu1  ;;  %v1592_v19 = vadd.f32 %v1591_v13, %v3487_v8  ;;  %v1757_v51 = vmul.f32 %v3487_v8, %v3487_v8  ;;  %v1909_v44 = vadd.f32 %v1908_v35, %v1756_v41  ;;  %v1618_v34 = vadd.f32 %v1617_v9, %v3491_v10 }
 0x133   :  { %5036 = vst [vmem:[#allocation81_spill] sm:$0xff] %v3672_v59  ;;  %v1782_v54 = vmul.f32 %v3495_v12, %v3495_v12  ;;  %v1936_v47 = vadd.f32 %v1935_v52, %v1781_v38  ;;  %v1962_v22 = vadd.f32 %v1961_v57, %v1805_v55  ;;  %v1645_v6 = vadd.f32 %v1644_v61, %v3499_v14  ;;  %v5041_v38 = vld [vmem:[#allocation52_spill] sm:$0xff] }
 0x134   :  { %v3682_v33 = vpop.f32.mrf.mxu0  ;;  %v3684_v63 = vpop.f32.mrf.mxu1  ;;  %v1671_v30 = vadd.f32 %v1670_v1, %v3517_v23  ;;  %v1989_v13 = vadd.f32 %v1988_v32, %v1830_v58  ;;  %v1538_v37 = vadd.f32 %v1537_v21, %v3523_v27  ;;  %v1806_v41 = vmul.f32 %v3499_v14, %v3499_v14 }
 0x135   :  { %5037 = vst [vmem:[#allocation82_spill] sm:$0xff] %v3682_v33  ;;  %v1857_v9 = vadd.f32 %v1856_v60, %v1708_v40  ;;  %v1709_v35 = vmul.f32 %v3533_v36, %v3533_v36  ;;  %v1733_v52 = vmul.f32 %v3544_v25, %v3544_v25  ;;  %v1910_v61 = vadd.f32 %v1909_v44, %v1757_v51 }
 0x136   :  { %v3695_v48 = vpop.f32.mrf.mxu0  ;;  %v3697_v50 = vpop.f32.mrf.mxu1  ;;  %v1831_v1 = vmul.f32 %v3507_v18, %v3507_v18  ;;  %v1566_v21 = vadd.f32 %v1565_v46, %v3544_v25  ;;  %v1758_v32 = vmul.f32 %v3571_v45, %v3571_v45  ;;  %v1619_v58 = vadd.f32 %v1618_v34, %v3495_v12  ;;  %v5044_v25 = vld [vmem:[#allocation63_spill] sm:$0xff] }
 0x137   :  { %5038 = vst [vmem:[#allocation83_spill] sm:$0xff] %v3695_v48  ;;  %v1937_v60 = vadd.f32 %v1936_v47, %v1782_v54  ;;  %v1807_v40 = vmul.f32 %v5041_v38, %v5041_v38  ;;  %v1963_v14 = vadd.f32 %v1962_v22, %v1806_v41  ;;  %v1646_v51 = vadd.f32 %v1645_v6, %v5041_v38 }
 0x138   :  { %v3705_v15 = vpop.f32.mrf.mxu0  ;;  %v3707_v17 = vpop.f32.mrf.mxu1  ;;  %v1672_v44 = vadd.f32 %v1671_v30, %v3507_v18  ;;  %v1990_v10 = vadd.f32 %v1989_v13, %v1831_v1  ;;  %v1539_v46 = vadd.f32 %v1538_v37, %v3533_v36  ;;  %v1858_v11 = vadd.f32 %v1857_v9, %v1709_v35  ;;  %v5048_v9 = vld [vmem:[#allocation58_spill] sm:$0xff] }
 0x139   :  { %v1884_v27 = vadd.f32 %v1883_v39, %v1733_v52  ;;  %v1734_v34 = vmul.f32 %v5044_v25, %v5044_v25  ;;  %v1593_v54 = vadd.f32 %v1592_v19, %v3571_v45  ;;  %v1567_v41 = vadd.f32 %v1566_v21, %v5044_v25  ;;  %v5047_v39 = vld [vmem:[#allocation56_spill] sm:$0xff]  ;;  %v5054_v25 = vld [vmem:[#allocation62_spill] sm:$0xff] }
 0x13a   :  { %v3718_v57 = vpop.f32.mrf.mxu0  ;;  %v3720_v55 = vpop.f32.mrf.mxu1  ;;  %v1911_v12 = vadd.f32 %v1910_v61, %v1758_v32  ;;  %v1759_v6 = vmul.f32 %v3581_v16, %v3581_v16  ;;  %v1783_v30 = vmul.f32 %v3597_v29, %v3597_v29  ;;  %v1964_v13 = vadd.f32 %v1963_v14, %v1807_v40  ;;  %v5051_v32 = vld [vmem:[#allocation60_spill] sm:$0xff] }
 0x13b   :  { %5039 = vst [vmem:[#allocation84_spill] sm:$0xff] %v3718_v57  ;;  %5040 = vst [vmem:[#allocation85_spill] sm:$0xff] %v3720_v55  ;;  %v1832_v37 = vmul.f32 %v5047_v39, %v5047_v39  ;;  %v1710_v19 = vmul.f32 %v5048_v9, %v5048_v9  ;;  %v1620_v35 = vadd.f32 %v1619_v58, %v3597_v29 }
 0x13c   :  { %v3730_v23 = vpop.f32.mrf.mxu0  ;;  %v3732_v8 = vpop.f32.mrf.mxu1  ;;  %v1673_v61 = vadd.f32 %v1672_v44, %v5047_v39  ;;  %v1540_v21 = vadd.f32 %v1539_v46, %v5048_v9  ;;  %v1711_v38 = vmul.f32 %v5051_v32, %v5051_v32  ;;  %v1808_v14 = vmul.f32 %v3622_v43, %v3622_v43 }
 0x13d   :  { %5042 = vst [vmem:[#allocation86_spill] sm:$0xff] %v3730_v23  ;;  %5043 = vst [vmem:[#allocation87_spill] sm:$0xff] %v3732_v8  ;;  %v1991_v40 = vadd.f32 %v1990_v10, %v1832_v37  ;;  %v1859_v18 = vadd.f32 %v1858_v11, %v1710_v19  ;;  %v1885_v45 = vadd.f32 %v1884_v27, %v1734_v34  ;;  %v5057_v37 = vld [vmem:[#allocation64_spill] sm:$0xff] }
 0x13e   :  { %v3740_v47 = vpop.f32.mrf.mxu0  ;;  %v3742_v22 = vpop.f32.mrf.mxu1  ;;  %v1594_v36 = vadd.f32 %v1593_v54, %v3581_v16  ;;  %v1568_v4 = vadd.f32 %v1567_v41, %v5054_v25  ;;  %v1912_v44 = vadd.f32 %v1911_v12, %v1759_v6  ;;  %v1938_v39 = vadd.f32 %v1937_v60, %v1783_v30 }
 0x13f   :  { %5045 = vst [vmem:[#allocation88_spill] sm:$0xff] %v3740_v47  ;;  %5046 = vst [vmem:[#allocation89_spill] sm:$0xff] %v3742_v22  ;;  %v1784_v46 = vmul.f32 %v3611_v56, %v3611_v56  ;;  %v1735_v9 = vmul.f32 %v5054_v25, %v5054_v25  ;;  %v1621_v10 = vadd.f32 %v1620_v35, %v3611_v56 }
 0x140   :  { %v3754_v52 = vpop.f32.mrf.mxu0  ;;  %v3756_v1 = vpop.f32.mrf.mxu1  ;;  %v1647_v11 = vadd.f32 %v1646_v51, %v3622_v43  ;;  %v1833_v27 = vmul.f32 %v3647_v5, %v3647_v5  ;;  %v1541_v12 = vadd.f32 %v1540_v21, %v5051_v32  ;;  %v1760_v60 = vmul.f32 %v3573_v49, %v3573_v49 }
 0x141   :  { %5049 = vst [vmem:[#allocation90_spill] sm:$0xff] %v3754_v52  ;;  %5050 = vst [vmem:[#allocation91_spill] sm:$0xff] %v3756_v1  ;;  %v1965_v41 = vadd.f32 %v1964_v13, %v1808_v14  ;;  %v1809_v6 = vmul.f32 %v3636_v26, %v3636_v26  ;;  %v1860_v30 = vadd.f32 %v1859_v18, %v1711_v38 }
 0x142   :  { %v3765_v58 = vpop.f32.mrf.mxu0  ;;  %v3767_v29 = vpop.f32.mrf.mxu1  ;;  %v1736_v51 = vmul.f32 %v5057_v37, %v5057_v37  ;;  %v1886_v19 = vadd.f32 %v1885_v45, %v1735_v9  ;;  %v1595_v35 = vadd.f32 %v1594_v36, %v3573_v49  ;;  %v1569_v21 = vadd.f32 %v1568_v4, %v5057_v37 }
 0x143   :  { %5052 = vst [vmem:[#allocation92_spill] sm:$0xff] %v3765_v58  ;;  %5053 = vst [vmem:[#allocation93_spill] sm:$0xff] %v3767_v29  ;;  %v1913_v56 = vadd.f32 %v1912_v44, %v1760_v60  ;;  %v1939_v32 = vadd.f32 %v1938_v39, %v1784_v46  ;;  %v1674_v13 = vadd.f32 %v1673_v61, %v3647_v5 }
 0x144   :  { %v3778_v34 = vpop.f32.mrf.mxu0  ;;  %v3780_v54 = vpop.f32.mrf.mxu1  ;;  %v1622_v14 = vadd.f32 %v1621_v10, %v3599_v31  ;;  %v1648_v18 = vadd.f32 %v1647_v11, %v3636_v26  ;;  %v1992_v38 = vadd.f32 %v1991_v40, %v1833_v27  ;;  %v1834_v45 = vmul.f32 %v3659_v42, %v3659_v42 }
 0x145   :  { %5055 = vst [vmem:[#allocation62_spill] sm:$0xff] %v3778_v34  ;;  %5056 = vst [vmem:[#allocation94_spill] sm:$0xff] %v3780_v54  ;;  %v1761_v49 = vmul.f32 %v3583_v20, %v3583_v20  ;;  %v1966_v4 = vadd.f32 %v1965_v41, %v1809_v6  ;;  %v1542_v39 = vadd.f32 %v1541_v12, %v3672_v59 }
 0x146   :  { %v3790_v43 = vpop.f32.mrf.mxu0  ;;  %v3792_v16 = vpop.f32.mrf.mxu1  ;;  %v1712_v61 = vmul.f32 %v3672_v59, %v3672_v59  ;;  %v1887_v44 = vadd.f32 %v1886_v19, %v1736_v51  ;;  %v1596_v46 = vadd.f32 %v1595_v35, %v3583_v20  ;;  %v1785_v40 = vmul.f32 %v3599_v31, %v3599_v31 }
 0x147   :  { %5058 = vst [vmem:[#allocation64_spill] sm:$0xff] %v3790_v43  ;;  %5059 = vst [vmem:[#allocation95_spill] sm:$0xff] %v3792_v16  ;;  %v1786_v10 = vmul.f32 %v3613_v0, %v3613_v0  ;;  %v1914_v60 = vadd.f32 %v1913_v56, %v1761_v49  ;;  %v1810_v12 = vmul.f32 %v3624_v53, %v3624_v53 }
 0x148   :  { %v3800_v9 = vpop.f32.mrf.mxu0  ;;  %v3802_v36 = vpop.f32.mrf.mxu1  ;;  %v1675_v41 = vadd.f32 %v1674_v13, %v3659_v42  ;;  %v1737_v6 = vmul.f32 %v3695_v48, %v3695_v48  ;;  %v1623_v51 = vadd.f32 %v1622_v14, %v3613_v0  ;;  %v1940_v19 = vadd.f32 %v1939_v32, %v1785_v40 }
 0x149   :  { %5060 = vst [vmem:[#allocation96_spill] sm:$0xff] %v3800_v9  ;;  %5061 = vst [vmem:[#allocation97_spill] sm:$0xff] %v3802_v36  ;;  %v1649_v35 = vadd.f32 %v1648_v18, %v3624_v53  ;;  %v1993_v26 = vadd.f32 %v1992_v38, %v1834_v45  ;;  %v1967_v31 = vadd.f32 %v1966_v4, %v1810_v12 }
 0x14a   :  { %v3814_v11 = vpop.f32.mrf.mxu0  ;;  %v3816_v27 = vpop.f32.mrf.mxu1  ;;  %v1861_v49 = vadd.f32 %v1860_v30, %v1712_v61  ;;  %v1543_v56 = vadd.f32 %v1542_v39, %v3682_v33  ;;  %v1713_v13 = vmul.f32 %v3682_v33, %v3682_v33  ;;  %v1811_v42 = vmul.f32 %v3638_v24, %v3638_v24 }
 0x14b   :  { %5062 = vst [vmem:[#allocation98_spill] sm:$0xff] %v3816_v27  ;;  %v1835_v32 = vmul.f32 %v3649_v62, %v3649_v62  ;;  %v1570_v14 = vadd.f32 %v1569_v21, %v3695_v48  ;;  %v1762_v18 = vmul.f32 %v3718_v57, %v3718_v57  ;;  %v1676_v30 = vadd.f32 %v1675_v41, %v3649_v62 }
 0x14c   :  { %v3825_v5 = vpop.f32.mrf.mxu0  ;;  %v3827_v20 = vpop.f32.mrf.mxu1  ;;  %v1888_v4 = vadd.f32 %v1887_v44, %v1737_v6  ;;  %v1738_v39 = vmul.f32 %v3705_v15, %v3705_v15  ;;  %v1597_v61 = vadd.f32 %v1596_v46, %v3718_v57  ;;  %v1941_v40 = vadd.f32 %v1940_v19, %v1786_v10 }
 0x14d   :  { %5063 = vst [vmem:[#allocation99_spill] sm:$0xff] %v3825_v5  ;;  %5064 = vst [vmem:[#allocation100_spill] sm:$0xff] %v3827_v20  ;;  %v1650_v12 = vadd.f32 %v1649_v35, %v3638_v24  ;;  %v1836_v21 = vmul.f32 %v3661_v28, %v3661_v28  ;;  %v1994_v53 = vadd.f32 %v1993_v26, %v1835_v32 }
 0x14e   :  { %v3839_v38 = vpop.f32.mrf.mxu0  ;;  %v3841_v45 = vpop.f32.mrf.mxu1  ;;  %v1968_v59 = vadd.f32 %v1967_v31, %v1811_v42  ;;  %v1862_v48 = vadd.f32 %v1861_v49, %v1713_v13  ;;  %v1544_v44 = vadd.f32 %v1543_v56, %v3674_v7  ;;  %v1787_v41 = vmul.f32 %v3740_v47, %v3740_v47 }
 0x14f   :  { %v1571_v46 = vadd.f32 %v1570_v14, %v3705_v15  ;;  %v1915_v10 = vadd.f32 %v1914_v60, %v1762_v18  ;;  %v1763_v6 = vmul.f32 %v3730_v23, %v3730_v23  ;;  %v1624_v19 = vadd.f32 %v1623_v51, %v3740_v47 }
 0x150   :  { %v3850_v0 = vpop.f32.mrf.mxu0  ;;  %v3852_v33 = vpop.f32.mrf.mxu1  ;;  %v1677_v31 = vadd.f32 %v1676_v30, %v3661_v28  ;;  %v1714_v42 = vmul.f32 %v3674_v7, %v3674_v7  ;;  %v1889_v49 = vadd.f32 %v1888_v4, %v1738_v39  ;;  %v1598_v56 = vadd.f32 %v1597_v61, %v3730_v23 }
 0x151   :  { %v1995_v13 = vadd.f32 %v1994_v53, %v1836_v21  ;;  %v1715_v60 = vmul.f32 %v3684_v63, %v3684_v63  ;;  %v1739_v32 = vmul.f32 %v3697_v50, %v3697_v50  ;;  %v1812_v51 = vmul.f32 %v3765_v58, %v3765_v58 }
 0x152   :  { %v3861_v26 = vpop.f32.mrf.mxu0  ;;  %v3863_v35 = vpop.f32.mrf.mxu1  ;;  %v1545_v30 = vadd.f32 %v1544_v44, %v3684_v63  ;;  %v1942_v24 = vadd.f32 %v1941_v40, %v1787_v41  ;;  %v1788_v4 = vmul.f32 %v3754_v52, %v3754_v52  ;;  %v1837_v53 = vmul.f32 %v3790_v43, %v3790_v43 }
 0x153   :  { %5065 = vst [vmem:[#allocation101_spill] sm:$0xff] %v3861_v26  ;;  %5066 = vst [vmem:[#allocation102_spill] sm:$0xff] %v3863_v35  ;;  %v1863_v39 = vadd.f32 %v1862_v48, %v1714_v42  ;;  %v1572_v61 = vadd.f32 %v1571_v46, %v3697_v50  ;;  %v1916_v21 = vadd.f32 %v1915_v10, %v1763_v6 }
 0x154   :  { %v3875_v14 = vpop.f32.mrf.mxu0  ;;  %v3877_v18 = vpop.f32.mrf.mxu1  ;;  %v1625_v28 = vadd.f32 %v1624_v19, %v3754_v52  ;;  %v1740_v44 = vmul.f32 %v3707_v17, %v3707_v17  ;;  %v1890_v40 = vadd.f32 %v1889_v49, %v1739_v32  ;;  %v1764_v41 = vmul.f32 %v3720_v55, %v3720_v55 }
 0x155   :  { %5067 = vst [vmem:[#allocation103_spill] sm:$0xff] %v3875_v14  ;;  %5068 = vst [vmem:[#allocation104_spill] sm:$0xff] %v3877_v18  ;;  %v1599_v57 = vadd.f32 %v1598_v56, %v3720_v55  ;;  %v1651_v48 = vadd.f32 %v1650_v12, %v3765_v58  ;;  %v1969_v42 = vadd.f32 %v1968_v59, %v1812_v51 }
 0x156   :  { %v3886_v62 = vpop.f32.mrf.mxu0  ;;  %v3888_v23 = vpop.f32.mrf.mxu1  ;;  %v1813_v46 = vmul.f32 %v3778_v34, %v3778_v34  ;;  %v1678_v10 = vadd.f32 %v1677_v31, %v3790_v43  ;;  %v1943_v52 = vadd.f32 %v1942_v24, %v1788_v4  ;;  %v1996_v47 = vadd.f32 %v1995_v13, %v1837_v53 }
 0x157   :  { %5069 = vst [vmem:[#allocation105_spill] sm:$0xff] %v3886_v62  ;;  %5070 = vst [vmem:[#allocation106_spill] sm:$0xff] %v3888_v23  ;;  %v1838_v49 = vmul.f32 %v3800_v9, %v3800_v9  ;;  %v1716_v56 = vmul.f32 %v3814_v11, %v3814_v11  ;;  %v1864_v32 = vadd.f32 %v1863_v39, %v1715_v60 }
 0x158   :  { %v3899_v6 = vpop.f32.mrf.mxu0  ;;  %v3901_v19 = vpop.f32.mrf.mxu1  ;;  %v1573_v59 = vadd.f32 %v1572_v61, %v3707_v17  ;;  %v1917_v12 = vadd.f32 %v1916_v21, %v1764_v41  ;;  %v1626_v51 = vadd.f32 %v1625_v28, %v3742_v22  ;;  %v1891_v43 = vadd.f32 %v1890_v40, %v1740_v44 }
 0x159   :  { %5071 = vst [vmem:[#allocation107_spill] sm:$0xff] %v3899_v6  ;;  %5072 = vst [vmem:[#allocation108_spill] sm:$0xff] %v3901_v19  ;;  %v1600_v24 = vadd.f32 %v1599_v57, %v3732_v8  ;;  %v1765_v13 = vmul.f32 %v3732_v8, %v3732_v8  ;;  %v1789_v4 = vmul.f32 %v3742_v22, %v3742_v22 }
 0x15a   :  { %v3909_v58 = vpop.f32.mrf.mxu0  ;;  %v3911_v31 = vpop.f32.mrf.mxu1  ;;  %v1652_v60 = vadd.f32 %v1651_v48, %v3778_v34  ;;  %v1970_v53 = vadd.f32 %v1969_v42, %v1813_v46  ;;  %v1679_v39 = vadd.f32 %v1678_v10, %v3800_v9  ;;  %v1546_v28 = vadd.f32 %v1545_v30, %v3814_v11 }
 0x15b   :  { %5073 = vst [vmem:[#allocation109_spill] sm:$0xff] %v3909_v58  ;;  %5074 = vst [vmem:[#allocation110_spill] sm:$0xff] %v3911_v31  ;;  %v1944_v44 = vadd.f32 %v1943_v52, %v1789_v4  ;;  %v1997_v40 = vadd.f32 %v1996_v47, %v1838_v49  ;;  %v1865_v57 = vadd.f32 %v1864_v32, %v1716_v56 }
 0x15c   :  { %v3921_v61 = vpop.f32.mrf.mxu0  ;;  %v3923_v21 = vpop.f32.mrf.mxu1  ;;  %v1717_v41 = vmul.f32 %v3825_v5, %v3825_v5  ;;  %v1918_v8 = vadd.f32 %v1917_v12, %v1765_v13  ;;  %v1627_v55 = vadd.f32 %v1626_v51, %v3756_v1  ;;  %v1790_v48 = vmul.f32 %v3756_v1, %v3756_v1 }
 0x15d   :  { %5075 = vst [vmem:[#allocation111_spill] sm:$0xff] %v3921_v61  ;;  %5076 = vst [vmem:[#allocation112_spill] sm:$0xff] %v3923_v21  ;;  %v1814_v42 = vmul.f32 %v3767_v29, %v3767_v29  ;;  %v1815_v47 = vmul.f32 %v3780_v54, %v3780_v54  ;;  %v1839_v52 = vmul.f32 %v3792_v16, %v3792_v16 }
 0x15e   :  { %v3932_v30 = vpop.f32.mrf.mxu0  ;;  %v3934_v46 = vpop.f32.mrf.mxu1  ;;  %v1574_v10 = vadd.f32 %v1573_v59, %v3839_v38  ;;  %v1741_v49 = vmul.f32 %v3839_v38, %v3839_v38  ;;  %v1653_v56 = vadd.f32 %v1652_v60, %v3767_v29  ;;  %v1680_v12 = vadd.f32 %v1679_v39, %v3792_v16 }
 0x15f   :  { %5077 = vst [vmem:[#allocation113_spill] sm:$0xff] %v3932_v30  ;;  %5078 = vst [vmem:[#allocation114_spill] sm:$0xff] %v3934_v46  ;;  %v1971_v32 = vadd.f32 %v1970_v53, %v1814_v42  ;;  %v1547_v51 = vadd.f32 %v1546_v28, %v3825_v5  ;;  %v1945_v34 = vadd.f32 %v1944_v44, %v1790_v48 }
 0x160   :  { %v3946_v13 = vpop.f32.mrf.mxu0  ;;  %v3948_v4 = vpop.f32.mrf.mxu1  ;;  %v1998_v9 = vadd.f32 %v1997_v40, %v1839_v52  ;;  %v1866_v1 = vadd.f32 %v1865_v57, %v1717_v41  ;;  %v1628_v22 = vadd.f32 %v1627_v55, %v3886_v62  ;;  %v1840_v59 = vmul.f32 %v3802_v36, %v3802_v36 }
 0x161   :  { %5079 = vst [vmem:[#allocation115_spill] sm:$0xff] %v3946_v13  ;;  %5080 = vst [vmem:[#allocation116_spill] sm:$0xff] %v3948_v4  ;;  %v1718_v60 = vmul.f32 %v3816_v27, %v3816_v27  ;;  %v1601_v53 = vadd.f32 %v1600_v24, %v3861_v26  ;;  %v1766_v39 = vmul.f32 %v3861_v26, %v3861_v26 }
 0x162   :  { %v3958_v28 = vpop.f32.mrf.mxu0  ;;  %v3960_v42 = vpop.f32.mrf.mxu1  ;;  %v1892_v44 = vadd.f32 %v1891_v43, %v1741_v49  ;;  %v1575_v40 = vadd.f32 %v1574_v10, %v3850_v0  ;;  %v1742_v55 = vmul.f32 %v3850_v0, %v3850_v0  ;;  %v1791_v57 = vmul.f32 %v3886_v62, %v3886_v62 }
 0x163   :  { %5081 = vst [vmem:[#allocation117_spill] sm:$0xff] %v3960_v42  ;;  %v1654_v41 = vadd.f32 %v1653_v56, %v3780_v54  ;;  %v1972_v48 = vadd.f32 %v1971_v32, %v1815_v47  ;;  %v1681_v24 = vadd.f32 %v1680_v12, %v3802_v36  ;;  %v1548_v52 = vadd.f32 %v1547_v51, %v3816_v27 }
 0x164   :  { %v3970_v29 = vpop.f32.mrf.mxu0  ;;  %v3972_v16 = vpop.f32.mrf.mxu1  ;;  %v1999_v43 = vadd.f32 %v1998_v9, %v1840_v59  ;;  %v1719_v10 = vmul.f32 %v3827_v20, %v3827_v20  ;;  %v1867_v49 = vadd.f32 %v1866_v1, %v1718_v60  ;;  %v1629_v26 = vadd.f32 %v1628_v22, %v3899_v6 }
 0x165   :  { %5082 = vst [vmem:[#allocation118_spill] sm:$0xff] %v3970_v29  ;;  %v1919_v5 = vadd.f32 %v1918_v8, %v1766_v39  ;;  %v1602_v62 = vadd.f32 %v1601_v53, %v3875_v14  ;;  %v1767_v47 = vmul.f32 %v3875_v14, %v3875_v14  ;;  %v1816_v56 = vmul.f32 %v3909_v58, %v3909_v58 }
 0x166   :  { %v3982_v32 = vpop.f32.mrf.mxu0  ;;  %v3984_v12 = vpop.f32.mrf.mxu1  ;;  %v1893_v9 = vadd.f32 %v1892_v44, %v1742_v55  ;;  %v1576_v51 = vadd.f32 %v1575_v40, %v3841_v45  ;;  %v1946_v59 = vadd.f32 %v1945_v34, %v1791_v57  ;;  %v1792_v22 = vmul.f32 %v3899_v6, %v3899_v6 }
 0x167   :  { %v1549_v8 = vadd.f32 %v1548_v52, %v3827_v20  ;;  %v1743_v1 = vmul.f32 %v3841_v45, %v3841_v45  ;;  %v1655_v60 = vadd.f32 %v1654_v41, %v3909_v58  ;;  %v1841_v53 = vmul.f32 %v3932_v30, %v3932_v30 }
 0x168   :  { %v3995_v39 = vpop.f32.mrf.mxu0  ;;  %v3997_v54 = vpop.f32.mrf.mxu1  ;;  %v1868_v44 = vadd.f32 %v1867_v49, %v1719_v10  ;;  %v1744_v34 = vmul.f32 %v3852_v33, %v3852_v33  ;;  %v1768_v40 = vmul.f32 %v3863_v35, %v3863_v35  ;;  %v1630_v55 = vadd.f32 %v1629_v26, %v3888_v23 }
 0x169   :  { %v1920_v57 = vadd.f32 %v1919_v5, %v1767_v47  ;;  %v1603_v52 = vadd.f32 %v1602_v62, %v3863_v35  ;;  %v1973_v41 = vadd.f32 %v1972_v48, %v1816_v56  ;;  %v1817_v58 = vmul.f32 %v3921_v61, %v3921_v61 }
 0x16a   :  { %v4007_v36 = vpop.f32.mrf.mxu0  ;;  %v4009_v14 = vpop.f32.mrf.mxu1  ;;  %v1577_v10 = vadd.f32 %v1576_v51, %v3852_v33  ;;  %v1894_v49 = vadd.f32 %v1893_v9, %v1743_v1  ;;  %v1947_v6 = vadd.f32 %v1946_v59, %v1792_v22  ;;  %v1682_v20 = vadd.f32 %v1681_v24, %v3932_v30 }
 0x16b   :  { %5083 = vst [vmem:[#allocation119_spill] sm:$0xff] %v4007_v36  ;;  %5084 = vst [vmem:[#allocation120_spill] sm:$0xff] %v4009_v14  ;;  %v1656_v27 = vadd.f32 %v1655_v60, %v3921_v61  ;;  %v2000_v26 = vadd.f32 %v1999_v43, %v1841_v53  ;;  %v1842_v62 = vmul.f32 %v3946_v13, %v3946_v13 }
 0x16c   :  { %v1720_v5 = vmul.f32 %v3958_v28, %v3958_v28  ;;  %v4018_v48 = vpop.f32.mrf.mxu0  ;;  %v4020_v47 = vpop.f32.mrf.mxu1  ;;  %v1769_v56 = vmul.f32 %v3877_v18, %v3877_v18  ;;  %v1793_v9 = vmul.f32 %v3888_v23, %v3888_v23  ;;  %v1631_v24 = vadd.f32 %v1630_v55, %v3901_v19 }
 0x16d   :  { %5085 = vst [vmem:[#allocation121_spill] sm:$0xff] %v4018_v48  ;;  %v1550_v43 = vadd.f32 %v1549_v8, %v3958_v28  ;;  %v1604_v51 = vadd.f32 %v1603_v52, %v3877_v18  ;;  %v1921_v59 = vadd.f32 %v1920_v57, %v1768_v40  ;;  %v1818_v22 = vmul.f32 %v3911_v31, %v3911_v31 }
 0x16e   :  { %v1974_v1 = vadd.f32 %v1973_v41, %v1817_v58  ;;  %v4031_v60 = vpop.f32.mrf.mxu0  ;;  %v4033_v53 = vpop.f32.mrf.mxu1  ;;  %v1948_v61 = vadd.f32 %v1947_v6, %v1793_v9  ;;  %v1683_v30 = vadd.f32 %v1682_v20, %v3946_v13  ;;  %v1578_v35 = vadd.f32 %v1577_v10, %v3982_v32 }
 0x16f   :  { %5086 = vst [vmem:[#allocation122_spill] sm:$0xff] %v4031_v60  ;;  %v1632_v55 = vadd.f32 %v1631_v24, %v4031_v60  ;;  %v1657_v8 = vadd.f32 %v1656_v27, %v3911_v31  ;;  %v2001_v23 = vadd.f32 %v2000_v26, %v1842_v62  ;;  %v1869_v52 = vadd.f32 %v1868_v44, %v1720_v5 }
 0x170   :  { %v1721_v40 = vmul.f32 %v3970_v29, %v3970_v29  ;;  %v4041_v57 = vpop.f32.mrf.mxu0  ;;  %v4043_v58 = vpop.f32.mrf.mxu1  ;;  %v1895_v41 = vadd.f32 %v1894_v49, %v1744_v34  ;;  %v1551_v6 = vadd.f32 %v1550_v43, %v3970_v29  ;;  %v1745_v20 = vmul.f32 %v3982_v32, %v3982_v32 }
 0x171   :  { %5087 = vst [vmem:[#allocation123_spill] sm:$0xff] %v4041_v57  ;;  %v1605_v10 = vadd.f32 %v1604_v51, %v4007_v36  ;;  %v1794_v27 = vmul.f32 %v3901_v19, %v3901_v19  ;;  %v1975_v44 = vadd.f32 %v1974_v1, %v1818_v22  ;;  %v1843_v26 = vmul.f32 %v3934_v46, %v3934_v46 }
 0x172   :  { %v1633_v62 = vadd.f32 %v1632_v55, %v4041_v57  ;;  %v4054_v5 = vpop.f32.mrf.mxu0  ;;  %v4056_v9 = vpop.f32.mrf.mxu1  ;;  %v1922_v34 = vadd.f32 %v1921_v59, %v1769_v56  ;;  %v1819_v49 = vmul.f32 %v3923_v21, %v3923_v21  ;;  %v1684_v24 = vadd.f32 %v1683_v30, %v3934_v46 }
 0x173   :  { %5088 = vst [vmem:[#allocation124_spill] sm:$0xff] %v4054_v5  ;;  %5089 = vst [vmem:[#allocation125_spill] sm:$0xff] %v4056_v9  ;;  %v1579_v43 = vadd.f32 %v1578_v35, %v3995_v39  ;;  %v1949_v51 = vadd.f32 %v1948_v61, %v1794_v27  ;;  %v1658_v22 = vadd.f32 %v1657_v8, %v3923_v21 }
 0x174   :  { %v2002_v1 = vadd.f32 %v2001_v23, %v1843_v26  ;;  %v1870_v31 = vadd.f32 %v1869_v52, %v1721_v40  ;;  %v4063_v13 = vpop.f32.mrf.mxu0  ;;  %v4065_v55 = vpop.f32.mrf.mxu1  ;;  %v1896_v18 = vadd.f32 %v1895_v41, %v1745_v20  ;;  %v1746_v56 = vmul.f32 %v3995_v39, %v3995_v39 }
 0x175   :  { %5090 = vst [vmem:[#allocation126_spill] sm:$0xff] %v4063_v13  ;;  %5091 = vst [vmem:[#allocation127_spill] sm:$0xff] %v4065_v55  ;;  %v1606_v59 = vadd.f32 %v1605_v10, %v4018_v48  ;;  %v1552_v19 = vadd.f32 %v1551_v6, %v3960_v42  ;;  %v4071_v30 = vadd.f32 %v1975_v44, %v1819_v49 }
 0x176   :  { %v1844_v35 = vmul.f32 %v3948_v4, %v3948_v4  ;;  %v1795_v23 = vmul.f32 %v4031_v60, %v4031_v60  ;;  %v4077_v61 = vpop.f32.mrf.mxu0  ;;  %v4079_v8 = vpop.f32.mrf.mxu1  ;;  %v1634_v52 = vadd.f32 %v1633_v62, %v4033_v53  ;;  %v1685_v40 = vadd.f32 %v1684_v24, %v3948_v4 }
 0x177   :  { %5092 = vst [vmem:[#allocation128_spill] sm:$0xff] %v4077_v61  ;;  %5093 = vst [vmem:[#allocation129_spill] sm:$0xff] %v4079_v8  ;;  %v1722_v41 = vmul.f32 %v3960_v42, %v3960_v42  ;;  %v1770_v6 = vmul.f32 %v4007_v36, %v4007_v36  ;;  %v1580_v20 = vadd.f32 %v1579_v43, %v3984_v12 }
 0x178   :  { %v2003_v10 = vadd.f32 %v2002_v1, %v1844_v35  ;;  %v1723_v27 = vmul.f32 %v3972_v16, %v3972_v16  ;;  %v1747_v44 = vmul.f32 %v3984_v12, %v3984_v12  ;;  %v1748_v26 = vmul.f32 %v3997_v54, %v3997_v54  ;;  %v4094_v62 = vpop.f32.mrf.mxu0  ;;  %v4096_v49 = vpop.f32.mrf.mxu1 }
 0x179   :  { %5094 = vst [vmem:[#allocation130_spill] sm:$0xff] %v4094_v62  ;;  %5095 = vst [vmem:[#allocation131_spill] sm:$0xff] %v4096_v49  ;;  %v1897_v24 = vadd.f32 %v1896_v18, %v1746_v56  ;;  %v1607_v21 = vadd.f32 %v1606_v59, %v4009_v14  ;;  %v1553_v4 = vadd.f32 %v1552_v19, %v3972_v16 }
 0x17a   :  { %v1871_v43 = vadd.f32 %v1870_v31, %v1722_v41  ;;  %v1772_v1 = vmul.f32 %v4009_v14, %v4009_v14  ;;  %v1950_v35 = vadd.f32 %v1949_v51, %v1795_v23  ;;  %v1796_v46 = vmul.f32 %v4041_v57, %v4041_v57  ;;  %v4104_v36 = vpop.f32.mrf.mxu0  ;;  %v4106_v60 = vpop.f32.mrf.mxu1 }
 0x17b   :  { %v1635_v42 = vadd.f32 %v1634_v52, %v4043_v58  ;;  %v1923_v29 = vadd.f32 %v1922_v34, %v1770_v6  ;;  %v1771_v18 = vmul.f32 %v4018_v48, %v4018_v48  ;;  %v1636_v19 = vsel %vm1554_vm1, %v4106_v60, 0.0 }
 0x17c   :  { %v1581_v31 = vadd.f32 %v1580_v20, %v3997_v54  ;;  %v1686_v51 = vadd.f32 %v1685_v40, %v4077_v61  ;;  %v1845_v56 = vmul.f32 %v4077_v61, %v4077_v61  ;;  %v4117_v59 = vpop.f32.mrf.mxu0  ;;  %v4119_v23 = vpop.f32.mrf.mxu1  ;;  %v1582_v34 = vsel %vm1554_vm1, %v4104_v36, 0.0 }
 0x17d   :  { %v1637_v41 = vadd.f32 %v1636_v19, %v1635_v42  ;;  %v1749_v52 = vmul.f32 %v4104_v36, %v4104_v36  ;;  %v1608_v14 = vadd.f32 %v1607_v21, %v4020_v47  ;;  %v1898_v20 = vadd.f32 %v1897_v24, %v1747_v44 }
 0x17e   :  { %v1583_v6 = vadd.f32 %v1582_v34, %v1581_v31  ;;  %v1951_v48 = vadd.f32 %v1950_v35, %v1796_v46  ;;  %v1555_v40 = vsel %vm1554_vm1, %v4117_v59, 0.0  ;;  %v1724_v61 = vmul.f32 %v4117_v59, %v4117_v59 }
 0x17f   :  { %1638 = vadd.xlane.f32.xlu1 %v1637_v41  ;;  %v1609_v42 = vsel %vm1554_vm1, %v4119_v23, 0.0  ;;  %v1924_v19 = vadd.f32 %v1923_v29, %v1771_v18  ;;  %v1797_v57 = vmul.f32 %v4033_v53, %v4033_v53  ;;  %v1659_v31 = vadd.f32 %v1658_v22, %v4054_v5 }
 0x180   :  { %v1820_v21 = vmul.f32 %v4054_v5, %v4054_v5  ;;  %1584 = vadd.xlane.f32.xlu0 %v1583_v6  ;;  %v2004_v46 = vadd.f32 %v2003_v10, %v1845_v56  ;;  %v1687_v44 = vadd.f32 %v1686_v51, %v4094_v62  ;;  %v1846_v24 = vmul.f32 %v4094_v62, %v4094_v62 }
 0x181   :  { %v1610_v35 = vadd.f32 %v1609_v42, %v1608_v14  ;;  %v1799_v41 = vmul.f32 %v4106_v60, %v4106_v60  ;;  %v1556_v29 = vadd.f32 %v1555_v40, %v1553_v4  ;;  %v1900_v18 = vsel %vm1554_vm1, %v1749_v52, 0.0  ;;  %v4150_v42 = vpop.f32.mrf.mxu1 }
 0x182   :  { %v1872_v34 = vadd.f32 %v1871_v43, %v1723_v27  ;;  %v1774_v22 = vmul.f32 %v4119_v23, %v4119_v23  ;;  %v1899_v5 = vadd.f32 %v1898_v20, %v1748_v26  ;;  %v1873_v10 = vsel %vm1554_vm1, %v1724_v61, 0.0  ;;  %5096 = vst [vmem:[#allocation132_spill] sm:$0xff] %v4150_v42 }
 0x183   :  { %1611 = vadd.xlane.f32.xlu1 %v1610_v35  ;;  %v1952_v56 = vadd.f32 %v1951_v48, %v1797_v57  ;;  %v1977_v51 = vadd.f32 %v4071_v30, %v1820_v21  ;;  %v1660_v6 = vadd.f32 %v1659_v31, %v4063_v13  ;;  %v1821_v14 = vmul.f32 %v4063_v13, %v4063_v13 }
 0x184   :  { %1557 = vadd.xlane.f32.xlu0 %v1556_v29  ;;  %v1925_v4 = vadd.f32 %v1924_v19, %v1772_v1  ;;  %v1798_v27 = vmul.f32 %v4043_v58, %v4043_v58  ;;  %v2005_v43 = vadd.f32 %v2004_v46, %v1846_v24  ;;  %v1901_v52 = vadd.f32 %v1900_v18, %v1899_v5  ;;  %v4161_v19 = vpop.f32.mrf.mxu1 }
 0x185   :  { %v1688_v26 = vadd.f32 %v1687_v44, %v4079_v8  ;;  %v1773_v48 = vmul.f32 %v4020_v47, %v4020_v47  ;;  %v1874_v57 = vadd.f32 %v1873_v10, %v1872_v34  ;;  %v1954_v30 = vsel %vm1554_vm1, %v1799_v41, 0.0  ;;  %5097 = vst [vmem:[#allocation133_spill] sm:$0xff] %v4161_v19 }
 0x186   :  { %v1847_v61 = vmul.f32 %v4079_v8, %v4079_v8  ;;  %v1953_v20 = vadd.f32 %v1952_v56, %v1798_v27  ;;  %v1927_v1 = vsel %vm1554_vm1, %v1774_v22, 0.0  ;;  %v1978_v40 = vadd.f32 %v1977_v51, %v1821_v14 }
 0x187   :  { %1902 = vadd.xlane.f32.xlu1 %v1901_v52  ;;  %v1926_v5 = vadd.f32 %v1925_v4, %v1773_v48  ;;  %v1661_v31 = vadd.f32 %v1660_v6, %v4056_v9  ;;  %v1689_v46 = vadd.f32 %v1688_v26, %v4096_v49  ;;  %v1822_v24 = vmul.f32 %v4056_v9, %v4056_v9 }
 0x188   :  { %1875 = vadd.xlane.f32.xlu0 %v1874_v57  ;;  %v1955_v21 = vadd.f32 %v1954_v30, %v1953_v20  ;;  %v2006_v44 = vadd.f32 %v2005_v43, %v1847_v61  ;;  %v1849_v35 = vmul.f32 %v4150_v42, %v4150_v42  ;;  %v1690_v29 = vsel %vm1554_vm1, %v4150_v42, 0.0 }
 0x189   :  { %v1928_v41 = vadd.f32 %v1927_v1, %v1926_v5  ;;  %v1848_v18 = vmul.f32 %v4096_v49, %v4096_v49  ;;  %v1663_v34 = vsel %vm1554_vm1, %v4161_v19, 0.0  ;;  %v1824_v22 = vmul.f32 %v4161_v19, %v4161_v19 }
 0x18a   :  { %v1662_v10 = vadd.f32 %v1661_v31, %v4065_v55  ;;  %v1979_v56 = vadd.f32 %v1978_v40, %v1822_v24  ;;  %v1691_v51 = vadd.f32 %v1690_v29, %v1689_v46  ;;  %v1823_v14 = vmul.f32 %v4065_v55, %v4065_v55 }
 0x18b   :  { %1956 = vadd.xlane.f32.xlu1 %v1955_v21  ;;  %v2007_v6 = vadd.f32 %v2006_v44, %v1848_v18  ;;  %v2008_v27 = vsel %vm1554_vm1, %v1849_v35, 0.0  ;;  %v1981_v43 = vsel %vm1554_vm1, %v1824_v22, 0.0  ;;  %v3115_v57 = vmov 0  }
 0x18c   :  { %1929 = vadd.xlane.f32.xlu0 %v1928_v41  ;;  %v1664_v4 = vadd.f32 %v1663_v34, %v1662_v10  ;;  %v1980_v52 = vadd.f32 %v1979_v56, %v1823_v14  ;;  %3030 = vset.pattern.permute.xlu1 %v3115_v57 }
 0x18d   :  { %v2009_v26 = vadd.f32 %v2008_v27, %v2007_v6  ;;  %3031 = vset.pattern.permute.xlu0 %v3115_v57 }
 0x18e   :  { %v1982_v48 = vadd.f32 %v1981_v43, %v1980_v52 }
 0x18f   :  { %1692 = vadd.xlane.f32.xlu1 %v1691_v51 }
 0x190   :  { %1665 = vadd.xlane.f32.xlu0 %v1664_v4 }
 0x193   :  { %2010 = vadd.xlane.f32.xlu1 %v2009_v26 }
 0x194   :  { %1983 = vadd.xlane.f32.xlu0 %v1982_v48 }
 0x208   :  { %v1639_v30 = vpop.xlane.xlu1 %1638 }
 0x209   :  { %v1585_v61 = vpop.xlane.xlu0 %1584  ;;  %v1697_v21 = vmul.f32 0.00031887754, %v1639_v30 }
 0x20a   :  { %v4182_v1 = vmul.f32 0.00031887754, %v1585_v61 }
 0x20b   :  { %v2021_v10 = vmul.f32 %v1697_v21, %v1697_v21 }
 0x20c   :  { %v1612_v20 = vpop.xlane.xlu1 %1611  ;;  %v2019_v46 = vmul.f32 %v4182_v1, %v4182_v1 }
 0x20d   :  { %v1558_v40 = vpop.xlane.xlu0 %1557  ;;  %v4188_v35 = vmul.f32 0.00031887754, %v1612_v20 }
 0x20e   :  { %v4184_v5 = vmul.f32 0.00031887754, %v1558_v40 }
 0x20f   :  { %v2020_v14 = vmul.f32 %v4188_v35, %v4188_v35 }
 0x210   :  { %v1903_v31 = vpop.xlane.xlu1 %1902  ;;  %v2018_v41 = vmul.f32 %v4184_v5, %v4184_v5 }
 0x211   :  { %v2013_v44 = vmul.f32 0.00031887754, %v1903_v31  ;;  %v1876_v24 = vpop.xlane.xlu0 %1875 }
 0x212   :  { %v2012_v29 = vmul.f32 0.00031887754, %v1876_v24 }
 0x213   :  { %v2025_v18 = vsub.f32 %v2013_v44, %v2019_v46 }
 0x214   :  { %v2024_v34 = vsub.f32 %v2012_v29, %v2018_v41  ;;  %v1957_v22 = vpop.xlane.xlu1 %1956 }
 0x215   :  { %v2037_v56 = vadd.f32 1e-05, %v2025_v18  ;;  %v2015_v51 = vmul.f32 0.00031887754, %v1957_v22  ;;  %v1930_v6 = vpop.xlane.xlu0 %1929  ;;  %v2031_v22 = vld [vmem:[%s4831_s1 + $0x8] sm:$0xff] }
 0x216   :  { %v2036_v4 = vadd.f32 1e-05, %v2024_v34  ;;  %v2014_v27 = vmul.f32 0.00031887754, %v1930_v6 }
 0x217   :  { %3032 = vrsqrt.f32 %v2037_v56  ;;  %v2027_v43 = vsub.f32 %v2015_v51, %v2021_v10  ;;  %v2030_v10 = vld [vmem:[%s4831_s1] sm:$0xff] }
 0x218   :  { %3034 = vrsqrt.f32 %v2036_v4  ;;  %v2026_v52 = vsub.f32 %v2014_v27, %v2020_v14  ;;  %v1693_v26 = vpop.xlane.xlu1 %1692  ;;  %v2033_v27 = vld [vmem:[%s4831_s1 + $0x18] sm:$0xff] }
 0x219   :  { %v2039_v48 = vadd.f32 1e-05, %v2027_v43  ;;  %v1699_v57 = vmul.f32 0.00031887754, %v1693_v26  ;;  %v1666_v30 = vpop.xlane.xlu0 %1665 }
 0x21a   :  { %v2038_v61 = vadd.f32 1e-05, %v2026_v52  ;;  %v1698_v20 = vmul.f32 0.00031887754, %v1666_v30  ;;  %v2032_v30 = vld [vmem:[%s4831_s1 + $0x10] sm:$0xff] }
 0x21b   :  { %3036 = vrsqrt.f32 %v2039_v48  ;;  %v2023_v31 = vmul.f32 %v1699_v57, %v1699_v57  ;;  %v2057_v48 = vld [vmem:[%s4832_s2 + $0x18] sm:$0xff] }
 0x21c   :  { %v2011_v40 = vpop.xlane.xlu1 %2010  ;;  %3038 = vrsqrt.f32 %v2038_v61  ;;  %v2022_v41 = vmul.f32 %v1698_v20, %v1698_v20 }
 0x21d   :  { %v2017_v46 = vmul.f32 0.00031887754, %v2011_v40  ;;  %v1984_v44 = vpop.xlane.xlu0 %1983 }
 0x21e   :  { %v2016_v24 = vmul.f32 0.00031887754, %v1984_v44 }
 0x21f   :  { %v2029_v29 = vsub.f32 %v2017_v46, %v2023_v31  ;;  %v2035_v46 = vld [vmem:[%s4831_s1 + $0x28] sm:$0xff] }
 0x220   :  { %v2028_v34 = vsub.f32 %v2016_v24, %v2022_v41 }
 0x221   :  { %v2041_v18 = vadd.f32 1e-05, %v2029_v29  ;;  %v2059_v29 = vld [vmem:[%s4832_s2 + $0x28] sm:$0xff] }
 0x222   :  { %v2040_v6 = vadd.f32 1e-05, %v2028_v34 }
 0x223   :  { %3040 = vrsqrt.f32 %v2041_v18 }
 0x224   :  { %v3033_v56 = vpop.eup %3032  ;;  %3042 = vrsqrt.f32 %v2040_v6  ;;  %v2054_v6 = vld [vmem:[%s4832_s2] sm:$0xff] }
 0x225   :  { %v3035_v51 = vpop.eup %3034  ;;  %v2049_v14 = vmul.f32 %v3033_v56, %v2031_v22  ;;  %v2034_v56 = vld [vmem:[%s4831_s1 + $0x20] sm:$0xff] }
 0x226   :  { %v2048_v4 = vmul.f32 %v3035_v51, %v2030_v10 }
 0x227   :  { %2229 = vperm.xlu1 %3030, %v2049_v14   ;;  %v2061_v41 = vmul.f32 %v2049_v14, %v4182_v1 }
 0x228   :  { %v3037_v43 = vpop.eup %3036  ;;  %2224 = vperm.xlu0 %3031, %v2048_v4   ;;  %v2060_v51 = vmul.f32 %v2048_v4, %v4184_v5 }
 0x229   :  { %v2051_v52 = vmul.f32 %v3037_v43, %v2033_v27  ;;  %v3039_v26 = vpop.eup %3038  ;;  %v2056_v27 = vld [vmem:[%s4832_s2 + $0x10] sm:$0xff] }
 0x22a   :  { %v2050_v31 = vmul.f32 %v3039_v26, %v2032_v30  ;;  %v2066_v14 = vsub.f32 %v2054_v6, %v2060_v51  ;;  %v2058_v26 = vld [vmem:[%s4832_s2 + $0x20] sm:$0xff] }
 0x22b   :  { %2239 = vperm.xlu1 %3030, %v2051_v52   ;;  %v2063_v61 = vmul.f32 %v2051_v52, %v1697_v21  ;;  %v2055_v21 = vld [vmem:[%s4832_s2 + $0x8] sm:$0xff]  ;;  %s3116_s2 = smov [#allocation7]  }
 0x22c   :  { %v2067_v22 = vsub.f32 %v2055_v21, %v2061_v41  ;;  %v5103_v21 = vld [vmem:[#allocation40_spill] sm:$0xff]  ;;  %s2887_s12 = sshll.u32 %s3116_s2, 4  ;;  %s2888_s12 = int_to_ptr.vmem [resolvable:$true] %s2887_s12 }
 0x22d   :  { %v2069_v40 = vsub.f32 %v2057_v48, %v2063_v61  ;;  %v5098_v48 = vld [vmem:[#allocation15_spill] sm:$0xff]  ;;  %v5099_v61 = vld [vmem:[#allocation17_spill] sm:$0xff]  ;;  %s3084_s13 = scalar_lea.vmem %s2888_s12, 19200  ;;  %p3089_p11 = scmp.lt.s32.totalorder %s2888_s12, %s2888_s12 }
 0x22e   :  { %p3085_p10 = scmp.ne.s32.totalorder %s2888_s12, %s3084_s13  ;;  %p3090_p12 = scmp.lt.s32.totalorder %s3084_s13, %s3084_s13 }
 0x22f   :  { %2569 = vperm.xlu0 %3031, %v2069_v40   ;;  %2234 = vperm.xlu1 %3030, %v2050_v31   ;;  %v5100_v40 = vld [vmem:[#allocation16_spill] sm:$0xff] }
 0x230   :  { %v3041_v44 = vpop.eup %3040  ;;  %p3091_p13 = por %p3090_p12, %p3089_p11 }
 0x231   :  { %v2053_v24 = vmul.f32 %v3041_v44, %v2035_v46  ;;  %v3043_v10 = vpop.eup %3042  ;;  %v5101_v46 = vld [vmem:[#allocation18_spill] sm:$0xff] }
 0x232   :  { %v2052_v1 = vmul.f32 %v3043_v10, %v2034_v56  ;;  %v5106_v10 = vld [vmem:[#allocation63_spill] sm:$0xff]  ;;  %p3092_p0 = pnand %p3091_p13, %p3085_p10 }
 0x233   :  { %2249 = vperm.xlu1 %3030, %v2053_v24   ;;  %v2065_v18 = vmul.f32 %v2053_v24, %v1699_v57  ;;  %v2062_v57 = vmul.f32 %v2050_v31, %v4188_v35 }
 0x234   :  { %v2064_v52 = vmul.f32 %v2052_v1, %v1698_v20  ;;  %v5102_v20 = vld [vmem:[#allocation39_spill] sm:$0xff] }
 0x235   :  { %v2071_v34 = vsub.f32 %v2059_v29, %v2065_v18  ;;  %v2068_v43 = vsub.f32 %v2056_v27, %v2062_v57 }
 0x236   :  { %v2070_v5 = vsub.f32 %v2058_v26, %v2064_v52 }
 0x237   :  { %2579 = vperm.xlu0 %3031, %v2071_v34   ;;  %2559 = vperm.xlu1 %3030, %v2067_v22   ;;  %v5104_v34 = vld [vmem:[#allocation61_spill] sm:$0xff] }
 0x23b   :  { %2244 = vperm.xlu1 %3030, %v2052_v1  }
 0x23f   :  { %2554 = vperm.xlu1 %3030, %v2066_v14  }
 0x243   :  { %2564 = vperm.xlu1 %3030, %v2068_v43  }
 0x247   :  { %2574 = vperm.xlu1 %3030, %v2070_v5  }
 0x2a2   :  { %v2230_v4 = vpop.permute.xlu1 %2229 }
 0x2a3   :  { %v4234_v30 = vmul.f32 %v2230_v4, %v5098_v48  ;;  %v4237_v35 = vmul.f32 %v2230_v4, %v5099_v61  ;;  %v4240_v31 = vmul.f32 %v2230_v4, %v5100_v40  ;;  %v4243_v44 = vmul.f32 %v2230_v4, %v5101_v46  ;;  %v2225_v27 = vpop.permute.xlu0 %2224 }
 0x2a4   :  { %v4246_v24 = vmul.f32 %v2230_v4, %v5102_v20  ;;  %v4249_v41 = vmul.f32 %v2230_v4, %v3477_v3  ;;  %v4252_v29 = vmul.f32 %v2230_v4, %v3475_v2  ;;  %v4255_v18 = vmul.f32 %v2230_v4, %v5103_v21  ;;  %v5110_v3 = vld [vmem:[#allocation83_spill] sm:$0xff]  ;;  %v5138_v20 = vld [vmem:[#allocation38_spill] sm:$0xff] }
 0x2a5   :  { %v4258_v22 = vmul.f32 %v2230_v4, %v5104_v34  ;;  %v4261_v56 = vmul.f32 %v2230_v4, %v5106_v10  ;;  %v4264_v1 = vmul.f32 %v2230_v4, %v5054_v25  ;;  %v4267_v51 = vmul.f32 %v2230_v4, %v5057_v37  ;;  %v5140_v34 = vld [vmem:[#allocation57_spill] sm:$0xff] }
 0x2a6   :  { %v4270_v6 = vmul.f32 %v2230_v4, %v5110_v3  ;;  %v4273_v2 = vmul.f32 %v2230_v4, %v3705_v15  ;;  %v4276_v14 = vmul.f32 %v2230_v4, %v3697_v50  ;;  %v4279_v57 = vmul.f32 %v2230_v4, %v3707_v17  ;;  %v5142_v3 = vld [vmem:[#allocation59_spill] sm:$0xff] }
 0x2a7   :  { %5105 = vst [vmem:[#allocation15_spill] sm:$0xff] %v4258_v22  ;;  %5107 = vst [vmem:[#allocation17_spill] sm:$0xff] %v4261_v56  ;;  %v4282_v43 = vmul.f32 %v2230_v4, %v3839_v38  ;;  %v4285_v25 = vmul.f32 %v2230_v4, %v3850_v0  ;;  %v4288_v37 = vmul.f32 %v2230_v4, %v3841_v45  ;;  %v5124_v45 = vld [vmem:[#allocation11_spill] sm:$0xff]  ;;  %v2169_v22 = vld [vmem:[#allocation5 + $0x308] sm:$0xff] }
 0x2a8   :  { %5108 = vst [vmem:[#allocation16_spill] sm:$0xff] %v4264_v1  ;;  %5109 = vst [vmem:[#allocation18_spill] sm:$0xff] %v4267_v51  ;;  %v4291_v52 = vmul.f32 %v2230_v4, %v3852_v33  ;;  %v4294_v15 = vmul.f32 %v2230_v4, %v3982_v32  ;;  %v4297_v50 = vmul.f32 %v2230_v4, %v3995_v39  ;;  %v5126_v33 = vld [vmem:[#allocation13_spill] sm:$0xff]  ;;  %v5128_v32 = vld [vmem:[#allocation12_spill] sm:$0xff] }
 0x2a9   :  { %5111 = vst [vmem:[#allocation39_spill] sm:$0xff] %v4270_v6  ;;  %5112 = vst [vmem:[#allocation40_spill] sm:$0xff] %v4273_v2  ;;  %v4300_v17 = vmul.f32 %v2230_v4, %v3984_v12  ;;  %v4303_v38 = vmul.f32 %v2230_v4, %v3997_v54  ;;  %v4306_v0 = vmul.f32 %v4104_v36, %v2230_v4  ;;  %v5130_v39 = vld [vmem:[#allocation14_spill] sm:$0xff]  ;;  %v5132_v12 = vld [vmem:[#allocation35_spill] sm:$0xff] }
 0x2aa   :  { %5113 = vst [vmem:[#allocation61_spill] sm:$0xff] %v4276_v14  ;;  %5114 = vst [vmem:[#allocation63_spill] sm:$0xff] %v4279_v57  ;;  %v4309_v26 = vmul.f32 %v2225_v27, %v5124_v45  ;;  %v4312_v5 = vmul.f32 %v2225_v27, %v5126_v33  ;;  %v4315_v48 = vmul.f32 %v2225_v27, %v5128_v32  ;;  %v5134_v54 = vld [vmem:[#allocation37_spill] sm:$0xff]  ;;  %v5136_v36 = vld [vmem:[#allocation36_spill] sm:$0xff] }
 0x2ab   :  { %5115 = vst [vmem:[#allocation83_spill] sm:$0xff] %v4282_v43  ;;  %5116 = vst [vmem:[#allocation134_spill] sm:$0xff] %v4285_v25  ;;  %v4318_v61 = vmul.f32 %v2225_v27, %v5130_v39  ;;  %v4321_v40 = vmul.f32 %v2225_v27, %v5132_v12  ;;  %v4324_v46 = vmul.f32 %v2225_v27, %v5134_v54  ;;  %v5144_v33 = vld [vmem:[#allocation58_spill] sm:$0xff]  ;;  %v5146_v39 = vld [vmem:[#allocation60_spill] sm:$0xff] }
 0x2ac   :  { %5117 = vst [vmem:[#allocation135_spill] sm:$0xff] %v4288_v37  ;;  %5118 = vst [vmem:[#allocation136_spill] sm:$0xff] %v4291_v52  ;;  %v4327_v4 = vmul.f32 %v2225_v27, %v5136_v36  ;;  %v4330_v21 = vmul.f32 %v2225_v27, %v5138_v20  ;;  %v4333_v10 = vmul.f32 %v2225_v27, %v5140_v34  ;;  %v5148_v54 = vld [vmem:[#allocation81_spill] sm:$0xff]  ;;  %v5150_v36 = vld [vmem:[#allocation82_spill] sm:$0xff]  ;;  %v2240_v34 = vpop.permute.xlu1 %2239 }
 0x2ad   :  { %5119 = vst [vmem:[#allocation137_spill] sm:$0xff] %v4294_v15  ;;  %5120 = vst [vmem:[#allocation138_spill] sm:$0xff] %v4297_v50  ;;  %v4336_v45 = vmul.f32 %v2225_v27, %v5142_v3  ;;  %v4339_v32 = vmul.f32 %v2225_v27, %v5144_v33  ;;  %v4342_v12 = vmul.f32 %v2225_v27, %v5146_v39  ;;  %v5155_v33 = vld [vmem:[#allocation99_spill] sm:$0xff]  ;;  %v5157_v39 = vld [vmem:[#allocation98_spill] sm:$0xff] }
 0x2ae   :  { %5121 = vst [vmem:[#allocation139_spill] sm:$0xff] %v4300_v17  ;;  %5122 = vst [vmem:[#allocation140_spill] sm:$0xff] %v4303_v38  ;;  %v4345_v19 = vmul.f32 %v2225_v27, %v5148_v54  ;;  %v4348_v55 = vmul.f32 %v2225_v27, %v5150_v36  ;;  %v4351_v20 = vmul.f32 %v2225_v27, %v3674_v7  ;;  %v5159_v54 = vld [vmem:[#allocation100_spill] sm:$0xff]  ;;  %v5162_v7 = vld [vmem:[#allocation118_spill] sm:$0xff] }
 0x2af   :  { %5123 = vst [vmem:[#allocation141_spill] sm:$0xff] %v4306_v0  ;;  %5125 = vst [vmem:[#allocation11_spill] sm:$0xff] %v4309_v26  ;;  %v4354_v9 = vmul.f32 %v2225_v27, %v3684_v63  ;;  %v4357_v3 = vmul.f32 %v2225_v27, %v3814_v11  ;;  %v4360_v13 = vmul.f32 %v2225_v27, %v5155_v33  ;;  %v5164_v63 = vld [vmem:[#allocation117_spill] sm:$0xff]  ;;  %v2149_v50 = vld [vmem:[#allocation5 + $0x268] sm:$0xff] }
 0x2b0   :  { %5127 = vst [vmem:[#allocation13_spill] sm:$0xff] %v4312_v5  ;;  %5129 = vst [vmem:[#allocation12_spill] sm:$0xff] %v4315_v48  ;;  %v4369_v36 = vmul.f32 %v2225_v27, %v3958_v28  ;;  %v4378_v11 = vmul.f32 %v2225_v27, %v3972_v16  ;;  %v4381_v33 = vmul.f32 %v2225_v27, %v4117_v59  ;;  %v5170_v28 = vld [vmem:[#allocation24_spill] sm:$0xff]  ;;  %v5173_v16 = vld [vmem:[#allocation47_spill] sm:$0xff] }
 0x2b1   :  { %5131 = vst [vmem:[#allocation14_spill] sm:$0xff] %v4318_v61  ;;  %5133 = vst [vmem:[#allocation35_spill] sm:$0xff] %v4321_v40  ;;  %v5174_v59 = vld [vmem:[#allocation46_spill] sm:$0xff]  ;;  %v2152_v15 = vld [vmem:[#allocation5 + $0x280] sm:$0xff] }
 0x2b2   :  { %5135 = vst [vmem:[#allocation37_spill] sm:$0xff] %v4324_v46  ;;  %5137 = vst [vmem:[#allocation36_spill] sm:$0xff] %v4327_v4  ;;  %v5218_v52 = vld [vmem:[#allocation85_spill] sm:$0xff]  ;;  %v2155_v25 = vld [vmem:[#allocation5 + $0x298] sm:$0xff] }
 0x2b3   :  { %5139 = vst [vmem:[#allocation38_spill] sm:$0xff] %v4330_v21  ;;  %5141 = vst [vmem:[#allocation57_spill] sm:$0xff] %v4333_v10  ;;  %v5182_v21 = vld [vmem:[#allocation89_spill] sm:$0xff]  ;;  %v5226_v43 = vld [vmem:[#allocation102_spill] sm:$0xff] }
 0x2b4   :  { %5143 = vst [vmem:[#allocation59_spill] sm:$0xff] %v4336_v45  ;;  %5145 = vst [vmem:[#allocation58_spill] sm:$0xff] %v4339_v32  ;;  %v4426_v4 = vmul.f32 %v2240_v34, %v5182_v21  ;;  %v5189_v21 = vld [vmem:[#allocation123_spill] sm:$0xff]  ;;  %v2158_v14 = vld [vmem:[#allocation5 + $0x2b0] sm:$0xff] }
 0x2b5   :  { %5147 = vst [vmem:[#allocation60_spill] sm:$0xff] %v4342_v12  ;;  %5149 = vst [vmem:[#allocation81_spill] sm:$0xff] %v4345_v19  ;;  %v4363_v12 = vmul.f32 %v2225_v27, %v5157_v39  ;;  %v4366_v19 = vmul.f32 %v2225_v27, %v5159_v54  ;;  %v5168_v39 = vld [vmem:[#allocation23_spill] sm:$0xff]  ;;  %v5169_v54 = vld [vmem:[#allocation25_spill] sm:$0xff]  ;;  %v4447_v42 = vmul.f32 %v2240_v34, %v5189_v21 }
 0x2b6   :  { %5151 = vst [vmem:[#allocation82_spill] sm:$0xff] %v4348_v55  ;;  %5152 = vst [vmem:[#allocation142_spill] sm:$0xff] %v4351_v20  ;;  %v4372_v20 = vmul.f32 %v2225_v27, %v5162_v7  ;;  %v5171_v7 = vld [vmem:[#allocation26_spill] sm:$0xff]  ;;  %v5234_v2 = vld [vmem:[#allocation120_spill] sm:$0xff] }
 0x2b7   :  { %5153 = vst [vmem:[#allocation143_spill] sm:$0xff] %v4354_v9  ;;  %5154 = vst [vmem:[#allocation144_spill] sm:$0xff] %v4357_v3  ;;  %v4375_v9 = vmul.f32 %v2225_v27, %v5164_v63  ;;  %v5172_v63 = vld [vmem:[#allocation45_spill] sm:$0xff]  ;;  %v4402_v27 = vmul.f32 %v2240_v34, %v5174_v59  ;;  %v5181_v59 = vld [vmem:[#allocation90_spill] sm:$0xff] }
 0x2b8   :  { %5156 = vst [vmem:[#allocation99_spill] sm:$0xff] %v4360_v13  ;;  %5158 = vst [vmem:[#allocation98_spill] sm:$0xff] %v4363_v12  ;;  %v4384_v12 = vmul.f32 %v2240_v34, %v5168_v39  ;;  %v5175_v39 = vld [vmem:[#allocation48_spill] sm:$0xff]  ;;  %v4423_v10 = vmul.f32 %v2240_v34, %v5181_v59  ;;  %v5188_v59 = vld [vmem:[#allocation122_spill] sm:$0xff] }
 0x2b9   :  { %5160 = vst [vmem:[#allocation100_spill] sm:$0xff] %v4366_v19  ;;  %5161 = vst [vmem:[#allocation145_spill] sm:$0xff] %v4369_v36  ;;  %v4387_v19 = vmul.f32 %v2240_v34, %v5169_v54  ;;  %v4390_v36 = vmul.f32 %v2240_v34, %v5170_v28  ;;  %v5176_v54 = vld [vmem:[#allocation69_spill] sm:$0xff]  ;;  %v5177_v28 = vld [vmem:[#allocation71_spill] sm:$0xff]  ;;  %v4444_v26 = vmul.f32 %v2240_v34, %v5188_v59 }
 0x2ba   :  { %5163 = vst [vmem:[#allocation118_spill] sm:$0xff] %v4372_v20  ;;  %5165 = vst [vmem:[#allocation117_spill] sm:$0xff] %v4375_v9  ;;  %v4393_v20 = vmul.f32 %v2240_v34, %v5171_v7  ;;  %v4396_v9 = vmul.f32 %v2240_v34, %v5172_v63  ;;  %v4408_v13 = vmul.f32 %v2240_v34, %v5176_v54  ;;  %v5178_v7 = vld [vmem:[#allocation70_spill] sm:$0xff]  ;;  %v5179_v63 = vld [vmem:[#allocation72_spill] sm:$0xff] }
 0x2bb   :  { %5166 = vst [vmem:[#allocation146_spill] sm:$0xff] %v4378_v11  ;;  %5167 = vst [vmem:[#allocation147_spill] sm:$0xff] %v4381_v33  ;;  %v4399_v11 = vmul.f32 %v2240_v34, %v5173_v16  ;;  %v4405_v33 = vmul.f32 %v2240_v34, %v5175_v39  ;;  %v4411_v3 = vmul.f32 %v2240_v34, %v5177_v28  ;;  %v5180_v16 = vld [vmem:[#allocation88_spill] sm:$0xff]  ;;  %v2235_v39 = vpop.permute.xlu1 %2234  ;;  %v5183_v54 = vld [vmem:[#allocation91_spill] sm:$0xff] }
 0x2bc   :  { %v4414_v55 = vmul.f32 %v2240_v34, %v5178_v7  ;;  %v4417_v32 = vmul.f32 %v2240_v34, %v5179_v63  ;;  %v4420_v45 = vmul.f32 %v2240_v34, %v5180_v16  ;;  %v4429_v46 = vmul.f32 %v2240_v34, %v5183_v54  ;;  %v5184_v28 = vld [vmem:[#allocation105_spill] sm:$0xff]  ;;  %v5185_v7 = vld [vmem:[#allocation107_spill] sm:$0xff]  ;;  %v5186_v63 = vld [vmem:[#allocation106_spill] sm:$0xff] }
 0x2bd   :  { %v4432_v40 = vmul.f32 %v2240_v34, %v5184_v28  ;;  %v4435_v61 = vmul.f32 %v2240_v34, %v5185_v7  ;;  %v4438_v48 = vmul.f32 %v2240_v34, %v5186_v63  ;;  %v5187_v16 = vld [vmem:[#allocation108_spill] sm:$0xff]  ;;  %v4450_v54 = vmul.f32 %v2240_v34, %v4033_v53  ;;  %v5190_v63 = vld [vmem:[#allocation19_spill] sm:$0xff]  ;;  %v5196_v21 = vld [vmem:[#allocation22_spill] sm:$0xff] }
 0x2be   :  { %v4441_v5 = vmul.f32 %v2240_v34, %v5187_v16  ;;  %v4453_v28 = vmul.f32 %v2240_v34, %v4043_v58  ;;  %v4456_v7 = vmul.f32 %v4106_v60, %v2240_v34  ;;  %v4459_v49 = vmul.f32 %v2235_v39, %v5190_v63  ;;  %v5192_v16 = vld [vmem:[#allocation21_spill] sm:$0xff]  ;;  %v5194_v59 = vld [vmem:[#allocation20_spill] sm:$0xff]  ;;  %v5200_v58 = vld [vmem:[#allocation43_spill] sm:$0xff] }
 0x2bf   :  { %v4462_v8 = vmul.f32 %v2235_v39, %v5192_v16  ;;  %v4465_v62 = vmul.f32 %v2235_v39, %v5194_v59  ;;  %v4468_v0 = vmul.f32 %v2235_v39, %v5196_v21  ;;  %v5198_v53 = vld [vmem:[#allocation41_spill] sm:$0xff]  ;;  %v4474_v17 = vmul.f32 %v2235_v39, %v5200_v58  ;;  %v5202_v60 = vld [vmem:[#allocation42_spill] sm:$0xff]  ;;  %v5204_v63 = vld [vmem:[#allocation44_spill] sm:$0xff] }
 0x2c0   :  { %5191 = vst [vmem:[#allocation23_spill] sm:$0xff] %v4459_v49  ;;  %v4471_v38 = vmul.f32 %v2235_v39, %v5198_v53  ;;  %v4477_v34 = vmul.f32 %v2235_v39, %v5202_v60  ;;  %v4480_v49 = vmul.f32 %v2235_v39, %v5204_v63  ;;  %v5206_v16 = vld [vmem:[#allocation65_spill] sm:$0xff]  ;;  %v2147_v59 = vld [vmem:[#allocation5 + $0x258] sm:$0xff]  ;;  %v5208_v21 = vld [vmem:[#allocation67_spill] sm:$0xff]  ;;  %v4501_v37 = vmul.f32 %v2235_v39, %v5218_v52 }
 0x2c1   :  { %5193 = vst [vmem:[#allocation25_spill] sm:$0xff] %v4462_v8  ;;  %5195 = vst [vmem:[#allocation24_spill] sm:$0xff] %v4465_v62  ;;  %v4483_v8 = vmul.f32 %v2235_v39, %v5206_v16  ;;  %v2148_v62 = vld [vmem:[#allocation5 + $0x260] sm:$0xff]  ;;  %v5210_v53 = vld [vmem:[#allocation66_spill] sm:$0xff]  ;;  %v4513_v57 = vmul.f32 %v2235_v39, %v5226_v43  ;;  %v4525_v6 = vmul.f32 %v2235_v39, %v5234_v2 }
 0x2c2   :  { %5197 = vst [vmem:[#allocation26_spill] sm:$0xff] %v4468_v0  ;;  %5199 = vst [vmem:[#allocation45_spill] sm:$0xff] %v4471_v38  ;;  %v4486_v0 = vmul.f32 %v2235_v39, %v5208_v21  ;;  %v4489_v38 = vmul.f32 %v2235_v39, %v5210_v53  ;;  %v5212_v58 = vld [vmem:[#allocation68_spill] sm:$0xff]  ;;  %v2150_v63 = vld [vmem:[#allocation5 + $0x270] sm:$0xff]  ;;  %v4531_v43 = vmul.f32 %v2235_v39, %v4119_v23 }
 0x2c3   :  { %5201 = vst [vmem:[#allocation47_spill] sm:$0xff] %v4474_v17  ;;  %5203 = vst [vmem:[#allocation46_spill] sm:$0xff] %v4477_v34  ;;  %v4492_v17 = vmul.f32 %v2235_v39, %v5212_v58  ;;  %v5214_v60 = vld [vmem:[#allocation84_spill] sm:$0xff]  ;;  %v5216_v16 = vld [vmem:[#allocation86_spill] sm:$0xff]  ;;  %v2477_v51 = vadd.f32 %v4384_v12, %v2147_v59  ;;  %v2480_v2 = vadd.f32 %v4393_v20, %v2150_v63 }
 0x2c4   :  { %5205 = vst [vmem:[#allocation48_spill] sm:$0xff] %v4480_v49  ;;  %5207 = vst [vmem:[#allocation69_spill] sm:$0xff] %v4483_v8  ;;  %v4495_v34 = vmul.f32 %v2235_v39, %v5214_v60  ;;  %v2151_v49 = vld [vmem:[#allocation5 + $0x278] sm:$0xff]  ;;  %v4498_v8 = vmul.f32 %v2235_v39, %v5216_v16  ;;  %v5220_v21 = vld [vmem:[#allocation87_spill] sm:$0xff]  ;;  %v2488_v20 = vadd.f32 %v4417_v32, %v2158_v14 }
 0x2c5   :  { %5209 = vst [vmem:[#allocation71_spill] sm:$0xff] %v4486_v0  ;;  %5211 = vst [vmem:[#allocation70_spill] sm:$0xff] %v4489_v38  ;;  %v4504_v0 = vmul.f32 %v2235_v39, %v5220_v21  ;;  %v5222_v53 = vld [vmem:[#allocation101_spill] sm:$0xff]  ;;  %v2153_v58 = vld [vmem:[#allocation5 + $0x288] sm:$0xff]  ;;  %v2481_v23 = vadd.f32 %v4396_v9, %v2151_v49 }
 0x2c6   :  { %5213 = vst [vmem:[#allocation72_spill] sm:$0xff] %v4492_v17  ;;  %5215 = vst [vmem:[#allocation88_spill] sm:$0xff] %v4495_v34  ;;  %v4507_v38 = vmul.f32 %v2235_v39, %v5222_v53  ;;  %v2154_v17 = vld [vmem:[#allocation5 + $0x290] sm:$0xff]  ;;  %v5224_v60 = vld [vmem:[#allocation103_spill] sm:$0xff] }
 0x2c7   :  { %5217 = vst [vmem:[#allocation90_spill] sm:$0xff] %v4498_v8  ;;  %5219 = vst [vmem:[#allocation89_spill] sm:$0xff] %v4501_v37  ;;  %v4510_v34 = vmul.f32 %v2235_v39, %v5224_v60  ;;  %v5228_v16 = vld [vmem:[#allocation104_spill] sm:$0xff]  ;;  %v5230_v52 = vld [vmem:[#allocation119_spill] sm:$0xff]  ;;  %v4528_v60 = vmul.f32 %v2235_v39, %v4020_v47  ;;  %v2484_v1 = vadd.f32 %v4405_v33, %v2154_v17 }
 0x2c8   :  { %5221 = vst [vmem:[#allocation91_spill] sm:$0xff] %v4504_v0  ;;  %5223 = vst [vmem:[#allocation105_spill] sm:$0xff] %v4507_v38  ;;  %v4516_v8 = vmul.f32 %v2235_v39, %v5228_v16  ;;  %v4519_v37 = vmul.f32 %v2235_v39, %v5230_v52  ;;  %v2156_v21 = vld [vmem:[#allocation5 + $0x2a0] sm:$0xff]  ;;  %v2157_v0 = vld [vmem:[#allocation5 + $0x2a8] sm:$0xff] }
 0x2c9   :  { %5225 = vst [vmem:[#allocation107_spill] sm:$0xff] %v4510_v34  ;;  %5227 = vst [vmem:[#allocation106_spill] sm:$0xff] %v4513_v57  ;;  %v5232_v53 = vld [vmem:[#allocation121_spill] sm:$0xff]  ;;  %v2159_v16 = vld [vmem:[#allocation5 + $0x2b8] sm:$0xff] }
 0x2ca   :  { %5229 = vst [vmem:[#allocation108_spill] sm:$0xff] %v4516_v8  ;;  %5231 = vst [vmem:[#allocation122_spill] sm:$0xff] %v4519_v37  ;;  %v4522_v38 = vmul.f32 %v2235_v39, %v5232_v53  ;;  %v2160_v8 = vld [vmem:[#allocation5 + $0x2c0] sm:$0xff]  ;;  %v2161_v57 = vld [vmem:[#allocation5 + $0x2c8] sm:$0xff]  ;;  %v2478_v53 = vadd.f32 %v4387_v19, %v2148_v62  ;;  %v2482_v39 = vadd.f32 %v4399_v11, %v2152_v15  ;;  %v4549_v11 = vpop.permute.xlu0 %2569 }
 0x2cb   :  { %5235 = vst [vmem:[#allocation19_spill] sm:$0xff] %v4525_v6  ;;  %5236 = vst [vmem:[#allocation21_spill] sm:$0xff] %v4528_v60  ;;  %v2162_v52 = vld [vmem:[#allocation5 + $0x2d0] sm:$0xff]  ;;  %v2163_v37 = vld [vmem:[#allocation5 + $0x2d8] sm:$0xff]  ;;  %v2485_v62 = vadd.f32 %v4408_v13, %v2155_v25  ;;  %v2486_v19 = vadd.f32 %v4411_v3, %v2156_v21  ;;  %v2489_v9 = vadd.f32 %v4420_v45, %v2159_v16 }
 0x2cc   :  { %5233 = vst [vmem:[#allocation123_spill] sm:$0xff] %v4522_v38  ;;  %5237 = vst [vmem:[#allocation20_spill] sm:$0xff] %v4531_v43  ;;  %v2164_v34 = vld [vmem:[#allocation5 + $0x2e0] sm:$0xff]  ;;  %v2479_v38 = vadd.f32 %v4390_v36, %v2149_v50  ;;  %v2165_v6 = vld [vmem:[#allocation5 + $0x2e8] sm:$0xff]  ;;  %v2483_v43 = vadd.f32 %v4402_v27, %v2153_v58  ;;  %v2487_v50 = vadd.f32 %v4414_v55, %v2157_v0 }
 0x2cd   :  { %v2166_v47 = vld [vmem:[#allocation5 + $0x2f0] sm:$0xff]  ;;  %v2167_v60 = vld [vmem:[#allocation5 + $0x2f8] sm:$0xff]  ;;  %v2168_v56 = vld [vmem:[#allocation5 + $0x300] sm:$0xff]  ;;  %v2490_v49 = vadd.f32 %v4423_v10, %v2160_v8  ;;  %v2491_v15 = vadd.f32 %v4426_v4, %v2161_v57  ;;  %v2492_v17 = vadd.f32 %v4429_v46, %v2162_v52  ;;  %v2493_v33 = vadd.f32 %v4432_v40, %v2163_v37 }
 0x2ce   :  { %v2170_v12 = vld [vmem:[#allocation5 + $0x310] sm:$0xff]  ;;  %v2171_v36 = vld [vmem:[#allocation5 + $0x318] sm:$0xff]  ;;  %v2494_v13 = vadd.f32 %v4435_v61, %v2164_v34  ;;  %v2495_v25 = vadd.f32 %v4438_v48, %v2165_v6  ;;  %v2496_v55 = vadd.f32 %v4441_v5, %v2166_v47  ;;  %v2497_v14 = vadd.f32 %v4444_v26, %v2167_v60  ;;  %v2100_v45 = vld [vmem:[#allocation5 + $0xe0] sm:$0xff] }
 0x2cf   :  { %v2498_v0 = vadd.f32 %v4447_v42, %v2168_v56  ;;  %v2499_v8 = vadd.f32 %v4450_v54, %v2169_v22  ;;  %v2500_v57 = vadd.f32 %v4453_v28, %v2170_v12  ;;  %v2501_v46 = vadd.f32 %v4456_v7, %v2171_v36  ;;  %v2097_v56 = vld [vmem:[#allocation5 + $0xc8] sm:$0xff]  ;;  %v2099_v10 = vld [vmem:[#allocation5 + $0xd8] sm:$0xff]  ;;  %v4575_v54 = vpop.permute.xlu1 %2249  ;;  %v2102_v7 = vld [vmem:[#allocation5 + $0xf0] sm:$0xff] }
 0x2d0   :  { %v2657_v4 = vadd.f32 %v4549_v11, %v2477_v51  ;;  %v2658_v37 = vadd.f32 %v4549_v11, %v2478_v53  ;;  %v2659_v61 = vadd.f32 %v4549_v11, %v2479_v38  ;;  %v2660_v6 = vadd.f32 %v4549_v11, %v2480_v2  ;;  %v2098_v38 = vld [vmem:[#allocation5 + $0xd0] sm:$0xff]  ;;  %v2101_v28 = vld [vmem:[#allocation5 + $0xe8] sm:$0xff]  ;;  %v2103_v34 = vld [vmem:[#allocation5 + $0xf8] sm:$0xff] }
 0x2d1   :  { %v2661_v5 = vadd.f32 %v4549_v11, %v2481_v23  ;;  %v2662_v26 = vadd.f32 %v4549_v11, %v2482_v39  ;;  %v2663_v42 = vadd.f32 %v4549_v11, %v2483_v43  ;;  %v2664_v22 = vadd.f32 %v4549_v11, %v2484_v1  ;;  %v2104_v60 = vld [vmem:[#allocation5 + $0x100] sm:$0xff]  ;;  %v2105_v43 = vld [vmem:[#allocation5 + $0x108] sm:$0xff]  ;;  %v2106_v16 = vld [vmem:[#allocation5 + $0x110] sm:$0xff] }
 0x2d2   :  { %v2665_v48 = vadd.f32 %v4549_v11, %v2485_v62  ;;  %v2666_v40 = vadd.f32 %v4549_v11, %v2486_v19  ;;  %v2667_v51 = vadd.f32 %v4549_v11, %v2487_v50  ;;  %2807 = vst [vmem:[#allocation7 + $0x258] sm:$0xff] %v2657_v4  ;;  %2808 = vst [vmem:[#allocation7 + $0x260] sm:$0xff] %v2658_v37  ;;  %v2107_v23 = vld [vmem:[#allocation5 + $0x118] sm:$0xff]  ;;  %v2108_v39 = vld [vmem:[#allocation5 + $0x120] sm:$0xff] }
 0x2d3   :  { %2809 = vst [vmem:[#allocation7 + $0x268] sm:$0xff] %v2659_v61  ;;  %v2668_v32 = vadd.f32 %v4549_v11, %v2488_v20  ;;  %v2669_v3 = vadd.f32 %v4549_v11, %v2489_v9  ;;  %v2670_v27 = vadd.f32 %v4549_v11, %v2490_v49  ;;  %v2671_v1 = vadd.f32 %v4549_v11, %v2491_v15  ;;  %v2109_v12 = vld [vmem:[#allocation5 + $0x128] sm:$0xff]  ;;  %v2110_v50 = vld [vmem:[#allocation5 + $0x130] sm:$0xff]  ;;  %v2111_v20 = vld [vmem:[#allocation5 + $0x138] sm:$0xff] }
 0x2d4   :  { %2810 = vst [vmem:[#allocation7 + $0x270] sm:$0xff] %v2660_v6  ;;  %2811 = vst [vmem:[#allocation7 + $0x278] sm:$0xff] %v2661_v5  ;;  %v2672_v59 = vadd.f32 %v4549_v11, %v2492_v17  ;;  %v2673_v63 = vadd.f32 %v4549_v11, %v2493_v33  ;;  %v2674_v58 = vadd.f32 %v4549_v11, %v2494_v13  ;;  %v2112_v36 = vld [vmem:[#allocation5 + $0x140] sm:$0xff]  ;;  %v2113_v15 = vld [vmem:[#allocation5 + $0x148] sm:$0xff] }
 0x2d5   :  { %2812 = vst [vmem:[#allocation7 + $0x280] sm:$0xff] %v2662_v26  ;;  %2813 = vst [vmem:[#allocation7 + $0x288] sm:$0xff] %v2663_v42  ;;  %v2675_v21 = vadd.f32 %v4549_v11, %v2495_v25  ;;  %v2676_v52 = vadd.f32 %v4549_v11, %v2496_v55  ;;  %v2677_v53 = vadd.f32 %v4549_v11, %v2497_v14  ;;  %v2114_v17 = vld [vmem:[#allocation5 + $0x150] sm:$0xff]  ;;  %v2115_v33 = vld [vmem:[#allocation5 + $0x158] sm:$0xff] }
 0x2d6   :  { %2814 = vst [vmem:[#allocation7 + $0x290] sm:$0xff] %v2664_v22  ;;  %2815 = vst [vmem:[#allocation7 + $0x298] sm:$0xff] %v2665_v48  ;;  %v2678_v2 = vadd.f32 %v4549_v11, %v2498_v0  ;;  %v2679_v47 = vadd.f32 %v4549_v11, %v2499_v8  ;;  %v2680_v62 = vadd.f32 %v4549_v11, %v2500_v57  ;;  %v2118_v14 = vld [vmem:[#allocation5 + $0x170] sm:$0xff]  ;;  %v5238_v57 = vld [vmem:[#allocation15_spill] sm:$0xff]  ;;  %v2560_v48 = vpop.permute.xlu1 %2559 }
 0x2d7   :  { %2816 = vst [vmem:[#allocation7 + $0x2a0] sm:$0xff] %v2666_v40  ;;  %2817 = vst [vmem:[#allocation7 + $0x2a8] sm:$0xff] %v2667_v51  ;;  %v2681_v19 = vadd.f32 %v4549_v11, %v2501_v46  ;;  %v2427_v9 = vadd.f32 %v4234_v30, %v2097_v56  ;;  %v2428_v49 = vadd.f32 %v4237_v35, %v2098_v38  ;;  %v2116_v30 = vld [vmem:[#allocation5 + $0x160] sm:$0xff]  ;;  %v2117_v35 = vld [vmem:[#allocation5 + $0x168] sm:$0xff] }
 0x2d8   :  { %2818 = vst [vmem:[#allocation7 + $0x2b0] sm:$0xff] %v2668_v32  ;;  %2819 = vst [vmem:[#allocation7 + $0x2b8] sm:$0xff] %v2669_v3  ;;  %v2429_v11 = vadd.f32 %v4240_v31, %v2099_v10  ;;  %v2430_v13 = vadd.f32 %v4243_v44, %v2100_v45  ;;  %v2431_v25 = vadd.f32 %v4246_v24, %v2101_v28  ;;  %v5239_v4 = vld [vmem:[#allocation17_spill] sm:$0xff]  ;;  %v2119_v37 = vld [vmem:[#allocation5 + $0x178] sm:$0xff] }
 0x2d9   :  { %2820 = vst [vmem:[#allocation7 + $0x2c0] sm:$0xff] %v2670_v27  ;;  %2821 = vst [vmem:[#allocation7 + $0x2c8] sm:$0xff] %v2671_v1  ;;  %v2432_v55 = vadd.f32 %v4249_v41, %v2102_v7  ;;  %v2433_v0 = vadd.f32 %v4252_v29, %v2103_v34  ;;  %v2434_v8 = vadd.f32 %v4255_v18, %v2104_v60  ;;  %v2120_v44 = vld [vmem:[#allocation5 + $0x180] sm:$0xff]  ;;  %v2121_v61 = vld [vmem:[#allocation5 + $0x188] sm:$0xff] }
 0x2da   :  { %2822 = vst [vmem:[#allocation7 + $0x2d0] sm:$0xff] %v2672_v59  ;;  %2823 = vst [vmem:[#allocation7 + $0x2d8] sm:$0xff] %v2673_v63  ;;  %v2435_v46 = vadd.f32 %v5238_v57, %v2105_v43  ;;  %v2436_v31 = vadd.f32 %v5239_v4, %v2106_v16  ;;  %v5240_v24 = vld [vmem:[#allocation16_spill] sm:$0xff]  ;;  %v5241_v41 = vld [vmem:[#allocation18_spill] sm:$0xff] }
 0x2db   :  { %2824 = vst [vmem:[#allocation7 + $0x2e0] sm:$0xff] %v2674_v58  ;;  %2825 = vst [vmem:[#allocation7 + $0x2e8] sm:$0xff] %v2675_v21  ;;  %v2437_v6 = vadd.f32 %v5240_v24, %v2107_v23  ;;  %v2438_v5 = vadd.f32 %v5241_v41, %v2108_v39  ;;  %v5242_v26 = vld [vmem:[#allocation39_spill] sm:$0xff]  ;;  %v5243_v56 = vld [vmem:[#allocation40_spill] sm:$0xff]  ;;  %v2610_v23 = vadd.f32 %v2560_v48, %v2430_v13 }
 0x2dc   :  { %2826 = vst [vmem:[#allocation7 + $0x2f0] sm:$0xff] %v2676_v52  ;;  %2827 = vst [vmem:[#allocation7 + $0x2f8] sm:$0xff] %v2677_v53  ;;  %v2439_v42 = vadd.f32 %v5242_v26, %v2109_v12  ;;  %v2440_v22 = vadd.f32 %v5243_v56, %v2110_v50  ;;  %v5244_v40 = vld [vmem:[#allocation61_spill] sm:$0xff]  ;;  %v5245_v51 = vld [vmem:[#allocation63_spill] sm:$0xff]  ;;  %v2607_v53 = vadd.f32 %v2560_v48, %v2427_v9 }
 0x2dd   :  { %2828 = vst [vmem:[#allocation7 + $0x300] sm:$0xff] %v2678_v2  ;;  %2829 = vst [vmem:[#allocation7 + $0x308] sm:$0xff] %v2679_v47  ;;  %v2441_v29 = vadd.f32 %v5244_v40, %v2111_v20  ;;  %v2442_v18 = vadd.f32 %v5245_v51, %v2112_v36  ;;  %v5246_v38 = vld [vmem:[#allocation83_spill] sm:$0xff]  ;;  %v5247_v45 = vld [vmem:[#allocation134_spill] sm:$0xff]  ;;  %v2608_v2 = vadd.f32 %v2560_v48, %v2428_v49 }
 0x2de   :  { %2830 = vst [vmem:[#allocation7 + $0x310] sm:$0xff] %v2680_v62  ;;  %2831 = vst.msk [vmem:[#allocation7 + $0x318] sm:$0xff] %vm1554_vm1, %v2681_v19  ;;  %v2443_v10 = vadd.f32 %v5246_v38, %v2113_v15  ;;  %v2444_v32 = vadd.f32 %v5247_v45, %v2114_v17  ;;  %v5248_v3 = vld [vmem:[#allocation135_spill] sm:$0xff]  ;;  %v5249_v1 = vld [vmem:[#allocation136_spill] sm:$0xff]  ;;  %v2609_v47 = vadd.f32 %v2560_v48, %v2429_v11 }
 0x2df   :  { %v2445_v27 = vadd.f32 %v5248_v3, %v2115_v33  ;;  %v2446_v28 = vadd.f32 %v5249_v1, %v2116_v30  ;;  %v5250_v7 = vld [vmem:[#allocation137_spill] sm:$0xff]  ;;  %v5251_v59 = vld [vmem:[#allocation138_spill] sm:$0xff]  ;;  %v5252_v58 = vld [vmem:[#allocation139_spill] sm:$0xff]  ;;  %v2611_v39 = vadd.f32 %v2560_v48, %v2431_v25  ;;  %v2612_v12 = vadd.f32 %v2560_v48, %v2432_v55  ;;  %2757 = vst [vmem:[#allocation7 + $0xc8] sm:$0xff] %v2607_v53 }
 0x2e0   :  { %v2447_v34 = vadd.f32 %v5250_v7, %v2117_v35  ;;  %v2448_v63 = vadd.f32 %v5251_v59, %v2118_v14  ;;  %v2449_v21 = vadd.f32 %v5252_v58, %v2119_v37  ;;  %v5253_v60 = vld [vmem:[#allocation140_spill] sm:$0xff]  ;;  %v5254_v16 = vld [vmem:[#allocation141_spill] sm:$0xff]  ;;  %v2613_v62 = vadd.f32 %v2560_v48, %v2433_v0  ;;  %2758 = vst [vmem:[#allocation7 + $0xd0] sm:$0xff] %v2608_v2  ;;  %v5255_v57 = vld [vmem:[#allocation31_spill] sm:$0xff] }
 0x2e1   :  { %v2450_v43 = vadd.f32 %v5253_v60, %v2120_v44  ;;  %v2451_v52 = vadd.f32 %v5254_v16, %v2121_v61  ;;  %v2614_v19 = vadd.f32 %v2560_v48, %v2434_v8  ;;  %v2615_v50 = vadd.f32 %v2560_v48, %v2435_v46  ;;  %2759 = vst [vmem:[#allocation7 + $0xd8] sm:$0xff] %v2609_v47  ;;  %v5256_v4 = vld [vmem:[#allocation33_spill] sm:$0xff]  ;;  %v5257_v37 = vld [vmem:[#allocation32_spill] sm:$0xff]  ;;  %v5258_v61 = vld [vmem:[#allocation34_spill] sm:$0xff] }
 0x2e2   :  { %v2616_v20 = vadd.f32 %v2560_v48, %v2436_v31  ;;  %v2617_v36 = vadd.f32 %v2560_v48, %v2437_v6  ;;  %v2618_v15 = vadd.f32 %v2560_v48, %v2438_v5  ;;  %v2619_v17 = vadd.f32 %v2560_v48, %v2439_v42  ;;  %2760 = vst [vmem:[#allocation7 + $0xe0] sm:$0xff] %v2610_v23  ;;  %v2197_v6 = vld [vmem:[#allocation5 + $0x3e8] sm:$0xff]  ;;  %v2198_v41 = vld [vmem:[#allocation5 + $0x3f0] sm:$0xff]  ;;  %v5260_v42 = vld [vmem:[#allocation55_spill] sm:$0xff] }
 0x2e3   :  { %2761 = vst [vmem:[#allocation7 + $0xe8] sm:$0xff] %v2611_v39  ;;  %v2620_v33 = vadd.f32 %v2560_v48, %v2440_v22  ;;  %v2621_v30 = vadd.f32 %v2560_v48, %v2441_v29  ;;  %v2622_v9 = vadd.f32 %v2560_v48, %v2442_v18  ;;  %v2623_v49 = vadd.f32 %v2560_v48, %v2443_v10  ;;  %v5259_v5 = vld [vmem:[#allocation53_spill] sm:$0xff]  ;;  %v5261_v22 = vld [vmem:[#allocation54_spill] sm:$0xff]  ;;  %v5262_v40 = vld [vmem:[#allocation56_spill] sm:$0xff] }
 0x2e4   :  { %2762 = vst [vmem:[#allocation7 + $0xf0] sm:$0xff] %v2612_v12  ;;  %2763 = vst [vmem:[#allocation7 + $0xf8] sm:$0xff] %v2613_v62  ;;  %v2624_v11 = vadd.f32 %v2560_v48, %v2444_v32  ;;  %v2625_v13 = vadd.f32 %v2560_v48, %v2445_v27  ;;  %v2626_v25 = vadd.f32 %v2560_v48, %v2446_v28  ;;  %v2199_v51 = vld [vmem:[#allocation5 + $0x3f8] sm:$0xff]  ;;  %v2200_v18 = vld [vmem:[#allocation5 + $0x400] sm:$0xff] }
 0x2e5   :  { %2764 = vst [vmem:[#allocation7 + $0x100] sm:$0xff] %v2614_v19  ;;  %2765 = vst [vmem:[#allocation7 + $0x108] sm:$0xff] %v2615_v50  ;;  %v2627_v55 = vadd.f32 %v2560_v48, %v2447_v34  ;;  %v2628_v35 = vadd.f32 %v2560_v48, %v2448_v63  ;;  %v2629_v14 = vadd.f32 %v2560_v48, %v2449_v21  ;;  %v2201_v38 = vld [vmem:[#allocation5 + $0x408] sm:$0xff]  ;;  %v5263_v10 = vld [vmem:[#allocation77_spill] sm:$0xff] }
 0x2e6   :  { %2766 = vst [vmem:[#allocation7 + $0x110] sm:$0xff] %v2616_v20  ;;  %2767 = vst [vmem:[#allocation7 + $0x118] sm:$0xff] %v2617_v36  ;;  %v2630_v0 = vadd.f32 %v2560_v48, %v2450_v43  ;;  %v2631_v8 = vadd.f32 %v2560_v48, %v2451_v52  ;;  %v2377_v46 = vmul.f32 %v4575_v54, %v5255_v57  ;;  %v5264_v32 = vld [vmem:[#allocation79_spill] sm:$0xff]  ;;  %v5265_v27 = vld [vmem:[#allocation78_spill] sm:$0xff] }
 0x2e7   :  { %2768 = vst [vmem:[#allocation7 + $0x120] sm:$0xff] %v2618_v15  ;;  %2769 = vst [vmem:[#allocation7 + $0x128] sm:$0xff] %v2619_v17  ;;  %v2378_v31 = vmul.f32 %v4575_v54, %v5256_v4  ;;  %v2379_v44 = vmul.f32 %v4575_v54, %v5257_v37  ;;  %v2380_v24 = vmul.f32 %v4575_v54, %v5258_v61  ;;  %v5266_v28 = vld [vmem:[#allocation80_spill] sm:$0xff]  ;;  %v2202_v34 = vld [vmem:[#allocation5 + $0x410] sm:$0xff] }
 0x2e8   :  { %2770 = vst [vmem:[#allocation7 + $0x130] sm:$0xff] %v2620_v33  ;;  %2771 = vst [vmem:[#allocation7 + $0x138] sm:$0xff] %v2621_v30  ;;  %v2381_v26 = vmul.f32 %v4575_v54, %v5259_v5  ;;  %v2382_v56 = vmul.f32 %v4575_v54, %v5260_v42  ;;  %v2383_v48 = vmul.f32 %v4575_v54, %v5261_v22  ;;  %v2203_v59 = vld [vmem:[#allocation5 + $0x418] sm:$0xff]  ;;  %v2204_v63 = vld [vmem:[#allocation5 + $0x420] sm:$0xff] }
 0x2e9   :  { %2772 = vst [vmem:[#allocation7 + $0x140] sm:$0xff] %v2622_v9  ;;  %2773 = vst [vmem:[#allocation7 + $0x148] sm:$0xff] %v2623_v49  ;;  %v2384_v29 = vmul.f32 %v4575_v54, %v5262_v40  ;;  %v2385_v45 = vmul.f32 %v4575_v54, %v5263_v10  ;;  %v2386_v3 = vmul.f32 %v4575_v54, %v5264_v32  ;;  %v5267_v58 = vld [vmem:[#allocation64_spill] sm:$0xff]  ;;  %v5269_v16 = vld [vmem:[#allocation95_spill] sm:$0xff] }
 0x2ea   :  { %2774 = vst [vmem:[#allocation7 + $0x150] sm:$0xff] %v2624_v11  ;;  %2775 = vst [vmem:[#allocation7 + $0x158] sm:$0xff] %v2625_v13  ;;  %v2387_v1 = vmul.f32 %v4575_v54, %v5265_v27  ;;  %v2388_v7 = vmul.f32 %v4575_v54, %v5266_v28  ;;  %v2389_v21 = vmul.f32 %v4575_v54, %v5267_v58  ;;  %v5268_v60 = vld [vmem:[#allocation96_spill] sm:$0xff]  ;;  %v5270_v53 = vld [vmem:[#allocation97_spill] sm:$0xff] }
 0x2eb   :  { %2776 = vst [vmem:[#allocation7 + $0x160] sm:$0xff] %v2626_v25  ;;  %2777 = vst [vmem:[#allocation7 + $0x168] sm:$0xff] %v2627_v55  ;;  %v2390_v43 = vmul.f32 %v4575_v54, %v5268_v60  ;;  %v2391_v52 = vmul.f32 %v4575_v54, %v5269_v16  ;;  %v2392_v2 = vmul.f32 %v4575_v54, %v5270_v53  ;;  %v2205_v47 = vld [vmem:[#allocation5 + $0x428] sm:$0xff]  ;;  %v2206_v23 = vld [vmem:[#allocation5 + $0x430] sm:$0xff] }
 0x2ec   :  { %2778 = vst [vmem:[#allocation7 + $0x170] sm:$0xff] %v2628_v35  ;;  %2779 = vst [vmem:[#allocation7 + $0x178] sm:$0xff] %v2629_v14  ;;  %v2207_v39 = vld [vmem:[#allocation5 + $0x438] sm:$0xff]  ;;  %v5271_v12 = vld [vmem:[#allocation113_spill] sm:$0xff]  ;;  %v2527_v5 = vadd.f32 %v2377_v46, %v2197_v6  ;;  %v2528_v42 = vadd.f32 %v2378_v31, %v2198_v41  ;;  %v2529_v22 = vadd.f32 %v2379_v44, %v2199_v51  ;;  %v4664_v6 = vpop.permute.xlu0 %2579 }
 0x2ed   :  { %2780 = vst [vmem:[#allocation7 + $0x180] sm:$0xff] %v2630_v0  ;;  %2781 = vst.msk [vmem:[#allocation7 + $0x188] sm:$0xff] %vm1554_vm1, %v2631_v8  ;;  %v2393_v62 = vmul.f32 %v4575_v54, %v5271_v12  ;;  %v5272_v19 = vld [vmem:[#allocation115_spill] sm:$0xff]  ;;  %v5273_v20 = vld [vmem:[#allocation114_spill] sm:$0xff]  ;;  %v2530_v27 = vadd.f32 %v2380_v24, %v2200_v18  ;;  %v2531_v28 = vadd.f32 %v2381_v26, %v2201_v38 }
 0x2ee   :  { %v2394_v50 = vmul.f32 %v4575_v54, %v5272_v19  ;;  %v2395_v36 = vmul.f32 %v4575_v54, %v5273_v20  ;;  %v5274_v15 = vld [vmem:[#allocation116_spill] sm:$0xff]  ;;  %v2208_v33 = vld [vmem:[#allocation5 + $0x440] sm:$0xff]  ;;  %v2210_v9 = vld [vmem:[#allocation5 + $0x450] sm:$0xff]  ;;  %v2532_v58 = vadd.f32 %v2382_v56, %v2202_v34  ;;  %v2533_v60 = vadd.f32 %v2383_v48, %v2203_v59 }
 0x2ef   :  { %v2396_v17 = vmul.f32 %v4575_v54, %v5274_v15  ;;  %v2209_v30 = vld [vmem:[#allocation5 + $0x448] sm:$0xff]  ;;  %v5276_v13 = vld [vmem:[#allocation130_spill] sm:$0xff]  ;;  %v5277_v55 = vld [vmem:[#allocation129_spill] sm:$0xff]  ;;  %v2534_v19 = vadd.f32 %v2384_v29, %v2204_v63  ;;  %v2535_v20 = vadd.f32 %v2385_v45, %v2205_v47  ;;  %v2536_v15 = vadd.f32 %v2386_v3, %v2206_v23 }
 0x2f0   :  { %v5275_v49 = vld [vmem:[#allocation128_spill] sm:$0xff]  ;;  %v2398_v25 = vmul.f32 %v4575_v54, %v5276_v13  ;;  %v2399_v35 = vmul.f32 %v4575_v54, %v5277_v55  ;;  %v5278_v14 = vld [vmem:[#allocation131_spill] sm:$0xff]  ;;  %v2211_v8 = vld [vmem:[#allocation5 + $0x458] sm:$0xff]  ;;  %v2539_v46 = vadd.f32 %v2389_v21, %v2209_v30  ;;  %v2540_v31 = vadd.f32 %v2390_v43, %v2210_v9 }
 0x2f1   :  { %v2397_v11 = vmul.f32 %v4575_v54, %v5275_v49  ;;  %v2400_v0 = vmul.f32 %v4575_v54, %v5278_v14  ;;  %v2212_v57 = vld [vmem:[#allocation5 + $0x460] sm:$0xff]  ;;  %v2213_v4 = vld [vmem:[#allocation5 + $0x468] sm:$0xff]  ;;  %v2214_v40 = vld [vmem:[#allocation5 + $0x470] sm:$0xff]  ;;  %v2537_v49 = vadd.f32 %v2387_v1, %v2207_v39  ;;  %v2541_v44 = vadd.f32 %v2391_v52, %v2211_v8  ;;  %v4684_v8 = vpop.permute.xlu1 %2244 }
 0x2f2   :  { %v5279_v37 = vld [vmem:[#allocation132_spill] sm:$0xff]  ;;  %v2215_v10 = vld [vmem:[#allocation5 + $0x478] sm:$0xff]  ;;  %v2216_v32 = vld [vmem:[#allocation5 + $0x480] sm:$0xff]  ;;  %v2542_v41 = vadd.f32 %v2392_v2, %v2212_v57  ;;  %v2543_v24 = vadd.f32 %v2393_v62, %v2213_v4  ;;  %v2544_v26 = vadd.f32 %v2394_v50, %v2214_v40  ;;  %v2707_v3 = vadd.f32 %v4664_v6, %v2527_v5 }
 0x2f3   :  { %v2401_v61 = vmul.f32 %v5279_v37, %v4575_v54  ;;  %v2217_v16 = vld [vmem:[#allocation5 + $0x488] sm:$0xff]  ;;  %v2218_v53 = vld [vmem:[#allocation5 + $0x490] sm:$0xff]  ;;  %v2219_v12 = vld [vmem:[#allocation5 + $0x498] sm:$0xff]  ;;  %v2538_v54 = vadd.f32 %v2388_v7, %v2208_v33  ;;  %v2545_v56 = vadd.f32 %v2395_v36, %v2215_v10  ;;  %v2546_v48 = vadd.f32 %v2396_v17, %v2216_v32 }
 0x2f4   :  { %v2220_v13 = vld [vmem:[#allocation5 + $0x4a0] sm:$0xff]  ;;  %v2221_v55 = vld [vmem:[#allocation5 + $0x4a8] sm:$0xff]  ;;  %v2547_v51 = vadd.f32 %v2397_v11, %v2217_v16  ;;  %v2548_v18 = vadd.f32 %v2398_v25, %v2218_v53  ;;  %v2549_v38 = vadd.f32 %v2399_v35, %v2219_v12  ;;  %v2708_v1 = vadd.f32 %v4664_v6, %v2528_v42  ;;  %2857 = vst [vmem:[#allocation7 + $0x3e8] sm:$0xff] %v2707_v3  ;;  %v2074_v39 = vld [vmem:[#allocation5 + $0x10] sm:$0xff] }
 0x2f5   :  { %v2550_v29 = vadd.f32 %v2400_v0, %v2220_v13  ;;  %v2551_v45 = vadd.f32 %v2401_v61, %v2221_v55  ;;  %v2709_v7 = vadd.f32 %v4664_v6, %v2529_v22  ;;  %v2710_v34 = vadd.f32 %v4664_v6, %v2530_v27  ;;  %v2072_v21 = vld [vmem:[#allocation5] sm:$0xff]  ;;  %v2073_v23 = vld [vmem:[#allocation5 + $0x8] sm:$0xff]  ;;  %v2075_v62 = vld [vmem:[#allocation5 + $0x18] sm:$0xff] }
 0x2f6   :  { %v2711_v59 = vadd.f32 %v4664_v6, %v2531_v28  ;;  %v2712_v63 = vadd.f32 %v4664_v6, %v2532_v58  ;;  %v2713_v43 = vadd.f32 %v4664_v6, %v2533_v60  ;;  %v2714_v52 = vadd.f32 %v4664_v6, %v2534_v19  ;;  %2858 = vst [vmem:[#allocation7 + $0x3f0] sm:$0xff] %v2708_v1  ;;  %v2076_v30 = vld [vmem:[#allocation5 + $0x20] sm:$0xff]  ;;  %v2077_v9 = vld [vmem:[#allocation5 + $0x28] sm:$0xff]  ;;  %v2078_v11 = vld [vmem:[#allocation5 + $0x30] sm:$0xff] }
 0x2f7   :  { %v2715_v2 = vadd.f32 %v4664_v6, %v2535_v20  ;;  %v2716_v47 = vadd.f32 %v4664_v6, %v2536_v15  ;;  %v2717_v50 = vadd.f32 %v4664_v6, %v2537_v49  ;;  %v2718_v36 = vadd.f32 %v4664_v6, %v2538_v54  ;;  %2859 = vst [vmem:[#allocation7 + $0x3f8] sm:$0xff] %v2709_v7  ;;  %v2079_v57 = vld [vmem:[#allocation5 + $0x38] sm:$0xff]  ;;  %v2080_v4 = vld [vmem:[#allocation5 + $0x40] sm:$0xff]  ;;  %v2081_v37 = vld [vmem:[#allocation5 + $0x48] sm:$0xff] }
 0x2f8   :  { %v2719_v17 = vadd.f32 %v4664_v6, %v2539_v46  ;;  %v2720_v33 = vadd.f32 %v4664_v6, %v2540_v31  ;;  %2860 = vst [vmem:[#allocation7 + $0x400] sm:$0xff] %v2710_v34  ;;  %2861 = vst [vmem:[#allocation7 + $0x408] sm:$0xff] %v2711_v59  ;;  %v2721_v25 = vadd.f32 %v4664_v6, %v2541_v44  ;;  %v2082_v40 = vld [vmem:[#allocation5 + $0x50] sm:$0xff]  ;;  %v2083_v10 = vld [vmem:[#allocation5 + $0x58] sm:$0xff] }
 0x2f9   :  { %2862 = vst [vmem:[#allocation7 + $0x410] sm:$0xff] %v2712_v63  ;;  %v2722_v35 = vadd.f32 %v4664_v6, %v2542_v41  ;;  %v2723_v14 = vadd.f32 %v4664_v6, %v2543_v24  ;;  %v2724_v0 = vadd.f32 %v4664_v6, %v2544_v26  ;;  %2863 = vst [vmem:[#allocation7 + $0x418] sm:$0xff] %v2713_v43  ;;  %v2084_v32 = vld [vmem:[#allocation5 + $0x60] sm:$0xff]  ;;  %v2085_v60 = vld [vmem:[#allocation5 + $0x68] sm:$0xff] }
 0x2fa   :  { %2864 = vst [vmem:[#allocation7 + $0x420] sm:$0xff] %v2714_v52  ;;  %2865 = vst [vmem:[#allocation7 + $0x428] sm:$0xff] %v2715_v2  ;;  %v2725_v61 = vadd.f32 %v4664_v6, %v2545_v56  ;;  %v2726_v5 = vadd.f32 %v4664_v6, %v2546_v48  ;;  %v2727_v42 = vadd.f32 %v4664_v6, %v2547_v51  ;;  %v2086_v16 = vld [vmem:[#allocation5 + $0x70] sm:$0xff]  ;;  %v2087_v53 = vld [vmem:[#allocation5 + $0x78] sm:$0xff] }
 0x2fb   :  { %2866 = vst [vmem:[#allocation7 + $0x430] sm:$0xff] %v2716_v47  ;;  %v2728_v22 = vadd.f32 %v4664_v6, %v2548_v18  ;;  %2867 = vst [vmem:[#allocation7 + $0x438] sm:$0xff] %v2717_v50  ;;  %v2729_v27 = vadd.f32 %v4664_v6, %v2549_v38  ;;  %v2730_v28 = vadd.f32 %v4664_v6, %v2550_v29  ;;  %v5280_v12 = vld [vmem:[#allocation11_spill] sm:$0xff]  ;;  %v2089_v15 = vld [vmem:[#allocation5 + $0x88] sm:$0xff] }
 0x2fc   :  { %2868 = vst [vmem:[#allocation7 + $0x440] sm:$0xff] %v2718_v36  ;;  %2869 = vst [vmem:[#allocation7 + $0x448] sm:$0xff] %v2719_v17  ;;  %v2731_v58 = vadd.f32 %v4664_v6, %v2551_v45  ;;  %v2402_v19 = vadd.f32 %v5280_v12, %v2072_v21  ;;  %v2088_v20 = vld [vmem:[#allocation5 + $0x80] sm:$0xff]  ;;  %v2090_v49 = vld [vmem:[#allocation5 + $0x90] sm:$0xff] }
 0x2fd   :  { %2870 = vst [vmem:[#allocation7 + $0x450] sm:$0xff] %v2720_v33  ;;  %2871 = vst [vmem:[#allocation7 + $0x458] sm:$0xff] %v2721_v25  ;;  %v5281_v13 = vld [vmem:[#allocation13_spill] sm:$0xff]  ;;  %v5282_v54 = vld [vmem:[#allocation12_spill] sm:$0xff] }
 0x2fe   :  { %2872 = vst [vmem:[#allocation7 + $0x460] sm:$0xff] %v2722_v35  ;;  %2873 = vst [vmem:[#allocation7 + $0x468] sm:$0xff] %v2723_v14  ;;  %v2403_v55 = vadd.f32 %v5281_v13, %v2073_v23  ;;  %v2404_v46 = vadd.f32 %v5282_v54, %v2074_v39  ;;  %v5283_v31 = vld [vmem:[#allocation14_spill] sm:$0xff]  ;;  %v5284_v6 = vld [vmem:[#allocation35_spill] sm:$0xff] }
 0x2ff   :  { %2874 = vst [vmem:[#allocation7 + $0x470] sm:$0xff] %v2724_v0  ;;  %2875 = vst [vmem:[#allocation7 + $0x478] sm:$0xff] %v2725_v61  ;;  %v2405_v44 = vadd.f32 %v5283_v31, %v2075_v62  ;;  %v2406_v41 = vadd.f32 %v5284_v6, %v2076_v30  ;;  %v2091_v24 = vld [vmem:[#allocation5 + $0x98] sm:$0xff]  ;;  %v2092_v26 = vld [vmem:[#allocation5 + $0xa0] sm:$0xff]  ;;  %v4707_v62 = vpop.permute.xlu1 %2554 }
 0x300   :  { %2876 = vst [vmem:[#allocation7 + $0x480] sm:$0xff] %v2726_v5  ;;  %2877 = vst [vmem:[#allocation7 + $0x488] sm:$0xff] %v2727_v42  ;;  %v2093_v56 = vld [vmem:[#allocation5 + $0xa8] sm:$0xff]  ;;  %v5285_v48 = vld [vmem:[#allocation37_spill] sm:$0xff] }
 0x301   :  { %2878 = vst [vmem:[#allocation7 + $0x490] sm:$0xff] %v2728_v22  ;;  %2879 = vst [vmem:[#allocation7 + $0x498] sm:$0xff] %v2729_v27  ;;  %v2407_v51 = vadd.f32 %v5285_v48, %v2077_v9  ;;  %v5286_v18 = vld [vmem:[#allocation36_spill] sm:$0xff]  ;;  %v5287_v29 = vld [vmem:[#allocation38_spill] sm:$0xff]  ;;  %v2585_v12 = vadd.f32 %v4707_v62, %v2405_v44 }
 0x302   :  { %2880 = vst [vmem:[#allocation7 + $0x4a0] sm:$0xff] %v2730_v28  ;;  %2881 = vst.msk [vmem:[#allocation7 + $0x4a8] sm:$0xff] %vm1554_vm1, %v2731_v58  ;;  %v2408_v38 = vadd.f32 %v5286_v18, %v2078_v11  ;;  %v2409_v45 = vadd.f32 %v5287_v29, %v2079_v57  ;;  %v5288_v3 = vld [vmem:[#allocation57_spill] sm:$0xff]  ;;  %v2095_v34 = vld [vmem:[#allocation5 + $0xb8] sm:$0xff] }
 0x303   :  { %v2410_v1 = vadd.f32 %v5288_v3, %v2080_v4  ;;  %v2094_v7 = vld [vmem:[#allocation5 + $0xb0] sm:$0xff]  ;;  %v2096_v59 = vld [vmem:[#allocation5 + $0xc0] sm:$0xff]  ;;  %v5290_v43 = vld [vmem:[#allocation58_spill] sm:$0xff]  ;;  %2735 = vst [vmem:[#allocation7 + $0x18] sm:$0xff] %v2585_v12 }
 0x304   :  { %v5289_v63 = vld [vmem:[#allocation59_spill] sm:$0xff]  ;;  %v2412_v52 = vadd.f32 %v5290_v43, %v2082_v40  ;;  %v5291_v2 = vld [vmem:[#allocation60_spill] sm:$0xff]  ;;  %v5292_v23 = vld [vmem:[#allocation81_spill] sm:$0xff]  ;;  %v2589_v13 = vadd.f32 %v4707_v62, %v2409_v45 }
 0x305   :  { %v2411_v21 = vadd.f32 %v5289_v63, %v2081_v37  ;;  %v2413_v47 = vadd.f32 %v5291_v2, %v2083_v10  ;;  %v2414_v39 = vadd.f32 %v5292_v23, %v2084_v32  ;;  %v5293_v50 = vld [vmem:[#allocation82_spill] sm:$0xff]  ;;  %v5295_v30 = vld [vmem:[#allocation143_spill] sm:$0xff]  ;;  %v5296_v11 = vld [vmem:[#allocation144_spill] sm:$0xff]  ;;  %v2590_v6 = vadd.f32 %v4707_v62, %v2410_v1 }
 0x306   :  { %v2415_v36 = vadd.f32 %v5293_v50, %v2085_v60  ;;  %v5294_v17 = vld [vmem:[#allocation142_spill] sm:$0xff]  ;;  %v2417_v9 = vadd.f32 %v5295_v30, %v2087_v53  ;;  %v2418_v25 = vadd.f32 %v5296_v11, %v2088_v20  ;;  %v5297_v35 = vld [vmem:[#allocation99_spill] sm:$0xff]  ;;  %v5299_v4 = vld [vmem:[#allocation100_spill] sm:$0xff]  ;;  %v2582_v60 = vadd.f32 %v4707_v62, %v2402_v19  ;;  %2739 = vst [vmem:[#allocation7 + $0x38] sm:$0xff] %v2589_v13 }
 0x307   :  { %v2416_v33 = vadd.f32 %v5294_v17, %v2086_v16  ;;  %v2419_v14 = vadd.f32 %v5297_v35, %v2089_v15  ;;  %v5298_v0 = vld [vmem:[#allocation98_spill] sm:$0xff]  ;;  %v2421_v37 = vadd.f32 %v5299_v4, %v2091_v24  ;;  %v5300_v61 = vld [vmem:[#allocation145_spill] sm:$0xff]  ;;  %v5304_v28 = vld [vmem:[#allocation147_spill] sm:$0xff]  ;;  %v2583_v16 = vadd.f32 %v4707_v62, %v2403_v55  ;;  %2740 = vst [vmem:[#allocation7 + $0x40] sm:$0xff] %v2590_v6 }
 0x308   :  { %v2420_v57 = vadd.f32 %v5298_v0, %v2090_v49  ;;  %v2422_v5 = vadd.f32 %v5300_v61, %v2092_v26  ;;  %v5301_v42 = vld [vmem:[#allocation118_spill] sm:$0xff]  ;;  %v5302_v40 = vld [vmem:[#allocation117_spill] sm:$0xff]  ;;  %v2426_v58 = vadd.f32 %v5304_v28, %v2096_v59  ;;  %v2584_v53 = vadd.f32 %v4707_v62, %v2404_v46  ;;  %2732 = vst [vmem:[#allocation7] sm:$0xff] %v2582_v60  ;;  %v2124_v44 = vld [vmem:[#allocation5 + $0x1a0] sm:$0xff] }
 0x309   :  { %v2423_v22 = vadd.f32 %v5301_v42, %v2093_v56  ;;  %v2424_v10 = vadd.f32 %v5302_v40, %v2094_v7  ;;  %v5303_v32 = vld [vmem:[#allocation146_spill] sm:$0xff]  ;;  %v2586_v20 = vadd.f32 %v4707_v62, %v2406_v41  ;;  %v2587_v15 = vadd.f32 %v4707_v62, %v2407_v51  ;;  %v2122_v54 = vld [vmem:[#allocation5 + $0x190] sm:$0xff]  ;;  %2733 = vst [vmem:[#allocation7 + $0x8] sm:$0xff] %v2583_v16  ;;  %v2125_v41 = vld [vmem:[#allocation5 + $0x1a8] sm:$0xff] }
 0x30a   :  { %v2425_v27 = vadd.f32 %v5303_v32, %v2095_v34  ;;  %v2588_v49 = vadd.f32 %v4707_v62, %v2408_v38  ;;  %v2123_v31 = vld [vmem:[#allocation5 + $0x198] sm:$0xff]  ;;  %v2591_v19 = vadd.f32 %v4707_v62, %v2411_v21  ;;  %v2592_v55 = vadd.f32 %v4707_v62, %v2412_v52  ;;  %2734 = vst [vmem:[#allocation7 + $0x10] sm:$0xff] %v2584_v53  ;;  %v2126_v24 = vld [vmem:[#allocation5 + $0x1b0] sm:$0xff]  ;;  %v2128_v38 = vld [vmem:[#allocation5 + $0x1c0] sm:$0xff] }
 0x30b   :  { %v2593_v46 = vadd.f32 %v4707_v62, %v2413_v47  ;;  %v2594_v26 = vadd.f32 %v4707_v62, %v2414_v39  ;;  %v2595_v56 = vadd.f32 %v4707_v62, %v2415_v36  ;;  %v2596_v48 = vadd.f32 %v4707_v62, %v2416_v33  ;;  %2736 = vst [vmem:[#allocation7 + $0x20] sm:$0xff] %v2586_v20  ;;  %v2127_v18 = vld [vmem:[#allocation5 + $0x1b8] sm:$0xff]  ;;  %v2129_v29 = vld [vmem:[#allocation5 + $0x1c8] sm:$0xff]  ;;  %v2130_v34 = vld [vmem:[#allocation5 + $0x1d0] sm:$0xff] }
 0x30c   :  { %v2597_v51 = vadd.f32 %v4707_v62, %v2417_v9  ;;  %2737 = vst [vmem:[#allocation7 + $0x28] sm:$0xff] %v2587_v15  ;;  %2738 = vst [vmem:[#allocation7 + $0x30] sm:$0xff] %v2588_v49  ;;  %v2598_v45 = vadd.f32 %v4707_v62, %v2418_v25  ;;  %v2599_v3 = vadd.f32 %v4707_v62, %v2419_v14  ;;  %v2131_v59 = vld [vmem:[#allocation5 + $0x1d8] sm:$0xff]  ;;  %v2132_v63 = vld [vmem:[#allocation5 + $0x1e0] sm:$0xff] }
 0x30d   :  { %v2600_v1 = vadd.f32 %v4707_v62, %v2420_v57  ;;  %v2601_v7 = vadd.f32 %v4707_v62, %v2421_v37  ;;  %2741 = vst [vmem:[#allocation7 + $0x48] sm:$0xff] %v2591_v19  ;;  %2742 = vst [vmem:[#allocation7 + $0x50] sm:$0xff] %v2592_v55  ;;  %v2602_v21 = vadd.f32 %v4707_v62, %v2422_v5  ;;  %v2133_v47 = vld [vmem:[#allocation5 + $0x1e8] sm:$0xff]  ;;  %v2134_v23 = vld [vmem:[#allocation5 + $0x1f0] sm:$0xff] }
 0x30e   :  { %2743 = vst [vmem:[#allocation7 + $0x58] sm:$0xff] %v2593_v46  ;;  %v2603_v43 = vadd.f32 %v4707_v62, %v2423_v22  ;;  %v2604_v52 = vadd.f32 %v4707_v62, %v2424_v10  ;;  %v2605_v2 = vadd.f32 %v4707_v62, %v2425_v27  ;;  %2744 = vst [vmem:[#allocation7 + $0x60] sm:$0xff] %v2594_v26  ;;  %v2135_v39 = vld [vmem:[#allocation5 + $0x1f8] sm:$0xff]  ;;  %v2136_v36 = vld [vmem:[#allocation5 + $0x200] sm:$0xff]  ;;  %v2565_v26 = vpop.permute.xlu1 %2564 }
 0x30f   :  { %2745 = vst [vmem:[#allocation7 + $0x68] sm:$0xff] %v2595_v56  ;;  %2746 = vst [vmem:[#allocation7 + $0x70] sm:$0xff] %v2596_v48  ;;  %v2606_v50 = vadd.f32 %v4707_v62, %v2426_v58  ;;  %v2137_v17 = vld [vmem:[#allocation5 + $0x208] sm:$0xff]  ;;  %v2138_v33 = vld [vmem:[#allocation5 + $0x210] sm:$0xff] }
 0x310   :  { %2747 = vst [vmem:[#allocation7 + $0x78] sm:$0xff] %v2597_v51  ;;  %2748 = vst [vmem:[#allocation7 + $0x80] sm:$0xff] %v2598_v45  ;;  %v5305_v30 = vld [vmem:[#allocation23_spill] sm:$0xff]  ;;  %v5306_v11 = vld [vmem:[#allocation25_spill] sm:$0xff] }
 0x311   :  { %2749 = vst [vmem:[#allocation7 + $0x88] sm:$0xff] %v2599_v3  ;;  %2750 = vst [vmem:[#allocation7 + $0x90] sm:$0xff] %v2600_v1  ;;  %v2452_v9 = vadd.f32 %v5305_v30, %v2122_v54  ;;  %v2453_v25 = vadd.f32 %v5306_v11, %v2123_v31  ;;  %v5307_v35 = vld [vmem:[#allocation24_spill] sm:$0xff]  ;;  %v2139_v0 = vld [vmem:[#allocation5 + $0x218] sm:$0xff] }
 0x312   :  { %2751 = vst [vmem:[#allocation7 + $0x98] sm:$0xff] %v2601_v7  ;;  %v2454_v14 = vadd.f32 %v5307_v35, %v2124_v44  ;;  %2752 = vst [vmem:[#allocation7 + $0xa0] sm:$0xff] %v2602_v21  ;;  %v2140_v57 = vld [vmem:[#allocation5 + $0x220] sm:$0xff]  ;;  %v2141_v62 = vld [vmem:[#allocation5 + $0x228] sm:$0xff] }
 0x313   :  { %2753 = vst [vmem:[#allocation7 + $0xa8] sm:$0xff] %v2603_v43  ;;  %2754 = vst [vmem:[#allocation7 + $0xb0] sm:$0xff] %v2604_v52  ;;  %v5308_v4 = vld [vmem:[#allocation26_spill] sm:$0xff]  ;;  %v5309_v61 = vld [vmem:[#allocation45_spill] sm:$0xff] }
 0x314   :  { %2755 = vst [vmem:[#allocation7 + $0xb8] sm:$0xff] %v2605_v2  ;;  %v2455_v37 = vadd.f32 %v5308_v4, %v2125_v41  ;;  %v2456_v5 = vadd.f32 %v5309_v61, %v2126_v24  ;;  %v5310_v42 = vld [vmem:[#allocation47_spill] sm:$0xff]  ;;  %v5311_v40 = vld [vmem:[#allocation46_spill] sm:$0xff]  ;;  %2756 = vst.msk [vmem:[#allocation7 + $0xc0] sm:$0xff] %vm1554_vm1, %v2606_v50  ;;  %v2632_v50 = vadd.f32 %v2565_v26, %v2452_v9 }
 0x315   :  { %v2457_v22 = vadd.f32 %v5310_v42, %v2127_v18  ;;  %v2458_v10 = vadd.f32 %v5311_v40, %v2128_v38  ;;  %v2142_v32 = vld [vmem:[#allocation5 + $0x230] sm:$0xff]  ;;  %v2143_v27 = vld [vmem:[#allocation5 + $0x238] sm:$0xff]  ;;  %v2144_v28 = vld [vmem:[#allocation5 + $0x240] sm:$0xff] }
 0x316   :  { %v5312_v58 = vld [vmem:[#allocation48_spill] sm:$0xff]  ;;  %v5313_v16 = vld [vmem:[#allocation69_spill] sm:$0xff]  ;;  %v5314_v12 = vld [vmem:[#allocation71_spill] sm:$0xff]  ;;  %v2636_v30 = vadd.f32 %v2565_v26, %v2456_v5  ;;  %2782 = vst [vmem:[#allocation7 + $0x190] sm:$0xff] %v2632_v50 }
 0x317   :  { %v2459_v60 = vadd.f32 %v5312_v58, %v2129_v29  ;;  %v2460_v53 = vadd.f32 %v5313_v16, %v2130_v34  ;;  %v2461_v20 = vadd.f32 %v5314_v12, %v2131_v59  ;;  %v5315_v15 = vld [vmem:[#allocation70_spill] sm:$0xff]  ;;  %v2145_v13 = vld [vmem:[#allocation5 + $0x248] sm:$0xff]  ;;  %v2146_v54 = vld [vmem:[#allocation5 + $0x250] sm:$0xff]  ;;  %v2637_v11 = vadd.f32 %v2565_v26, %v2457_v22 }
 0x318   :  { %v2462_v49 = vadd.f32 %v5315_v15, %v2132_v63  ;;  %v5316_v31 = vld [vmem:[#allocation72_spill] sm:$0xff]  ;;  %v5318_v46 = vld [vmem:[#allocation90_spill] sm:$0xff]  ;;  %v5319_v41 = vld [vmem:[#allocation89_spill] sm:$0xff]  ;;  %v2638_v35 = vadd.f32 %v2565_v26, %v2458_v10  ;;  %2786 = vst [vmem:[#allocation7 + $0x1b0] sm:$0xff] %v2636_v30 }
 0x319   :  { %v2463_v6 = vadd.f32 %v5316_v31, %v2133_v47  ;;  %v5317_v19 = vld [vmem:[#allocation88_spill] sm:$0xff]  ;;  %v2465_v44 = vadd.f32 %v5318_v46, %v2135_v39  ;;  %v2466_v24 = vadd.f32 %v5319_v41, %v2136_v36  ;;  %v5320_v56 = vld [vmem:[#allocation91_spill] sm:$0xff]  ;;  %v5321_v51 = vld [vmem:[#allocation105_spill] sm:$0xff]  ;;  %v2633_v36 = vadd.f32 %v2565_v26, %v2453_v25  ;;  %2787 = vst [vmem:[#allocation7 + $0x1b8] sm:$0xff] %v2637_v11 }
 0x31a   :  { %v2464_v55 = vadd.f32 %v5317_v19, %v2134_v23  ;;  %v2467_v48 = vadd.f32 %v5320_v56, %v2137_v17  ;;  %v2468_v18 = vadd.f32 %v5321_v51, %v2138_v33  ;;  %v5322_v38 = vld [vmem:[#allocation107_spill] sm:$0xff]  ;;  %v5323_v45 = vld [vmem:[#allocation106_spill] sm:$0xff]  ;;  %v5324_v1 = vld [vmem:[#allocation108_spill] sm:$0xff]  ;;  %v2634_v17 = vadd.f32 %v2565_v26, %v2454_v14  ;;  %2788 = vst [vmem:[#allocation7 + $0x1c0] sm:$0xff] %v2638_v35 }
 0x31b   :  { %v2469_v29 = vadd.f32 %v5322_v38, %v2139_v0  ;;  %v2470_v3 = vadd.f32 %v5323_v45, %v2140_v57  ;;  %v2471_v7 = vadd.f32 %v5324_v1, %v2141_v62  ;;  %v5325_v34 = vld [vmem:[#allocation122_spill] sm:$0xff]  ;;  %v5326_v63 = vld [vmem:[#allocation123_spill] sm:$0xff]  ;;  %v5328_v2 = vld [vmem:[#allocation21_spill] sm:$0xff]  ;;  %v2635_v33 = vadd.f32 %v2565_v26, %v2455_v37  ;;  %2783 = vst [vmem:[#allocation7 + $0x198] sm:$0xff] %v2633_v36 }
 0x31c   :  { %v2472_v59 = vadd.f32 %v5325_v34, %v2142_v32  ;;  %v2473_v21 = vadd.f32 %v5326_v63, %v2143_v27  ;;  %v5327_v43 = vld [vmem:[#allocation19_spill] sm:$0xff]  ;;  %v2475_v47 = vadd.f32 %v5328_v2, %v2145_v13  ;;  %v5329_v23 = vld [vmem:[#allocation20_spill] sm:$0xff]  ;;  %v2639_v0 = vadd.f32 %v2565_v26, %v2459_v60  ;;  %2784 = vst [vmem:[#allocation7 + $0x1a0] sm:$0xff] %v2634_v17  ;;  %v5336_v41 = vld [vmem:[#allocation50_spill] sm:$0xff] }
 0x31d   :  { %v2474_v52 = vadd.f32 %v5327_v43, %v2144_v28  ;;  %v2476_v39 = vadd.f32 %v5329_v23, %v2146_v54  ;;  %v2640_v57 = vadd.f32 %v2565_v26, %v2460_v53  ;;  %v2641_v62 = vadd.f32 %v2565_v26, %v2461_v20  ;;  %2785 = vst [vmem:[#allocation7 + $0x1a8] sm:$0xff] %v2635_v33  ;;  %v5330_v60 = vld [vmem:[#allocation27_spill] sm:$0xff]  ;;  %v5331_v53 = vld [vmem:[#allocation29_spill] sm:$0xff]  ;;  %v5332_v20 = vld [vmem:[#allocation28_spill] sm:$0xff] }
 0x31e   :  { %v2642_v4 = vadd.f32 %v2565_v26, %v2462_v49  ;;  %v2643_v61 = vadd.f32 %v2565_v26, %v2463_v6  ;;  %v2644_v42 = vadd.f32 %v2565_v26, %v2464_v55  ;;  %v2645_v40 = vadd.f32 %v2565_v26, %v2465_v44  ;;  %2789 = vst [vmem:[#allocation7 + $0x1c8] sm:$0xff] %v2639_v0  ;;  %v5333_v49 = vld [vmem:[#allocation30_spill] sm:$0xff]  ;;  %v5334_v54 = vld [vmem:[#allocation49_spill] sm:$0xff]  ;;  %v2172_v6 = vld [vmem:[#allocation5 + $0x320] sm:$0xff] }
 0x31f   :  { %v2646_v9 = vadd.f32 %v2565_v26, %v2466_v24  ;;  %v2647_v25 = vadd.f32 %v2565_v26, %v2467_v48  ;;  %v2648_v14 = vadd.f32 %v2565_v26, %v2468_v18  ;;  %v2649_v37 = vadd.f32 %v2565_v26, %v2469_v29  ;;  %2790 = vst [vmem:[#allocation7 + $0x1d0] sm:$0xff] %v2640_v57  ;;  %v2173_v19 = vld [vmem:[#allocation5 + $0x328] sm:$0xff]  ;;  %v2174_v55 = vld [vmem:[#allocation5 + $0x330] sm:$0xff]  ;;  %v5335_v46 = vld [vmem:[#allocation51_spill] sm:$0xff] }
 0x320   :  { %2791 = vst [vmem:[#allocation7 + $0x1d8] sm:$0xff] %v2641_v62  ;;  %v2650_v5 = vadd.f32 %v2565_v26, %v2470_v3  ;;  %v2651_v22 = vadd.f32 %v2565_v26, %v2471_v7  ;;  %v2652_v10 = vadd.f32 %v2565_v26, %v2472_v59  ;;  %v2653_v32 = vadd.f32 %v2565_v26, %v2473_v21  ;;  %v5338_v48 = vld [vmem:[#allocation73_spill] sm:$0xff]  ;;  %v2175_v18 = vld [vmem:[#allocation5 + $0x338] sm:$0xff]  ;;  %v2176_v38 = vld [vmem:[#allocation5 + $0x340] sm:$0xff] }
 0x321   :  { %2792 = vst [vmem:[#allocation7 + $0x1e0] sm:$0xff] %v2642_v4  ;;  %2793 = vst [vmem:[#allocation7 + $0x1e8] sm:$0xff] %v2643_v61  ;;  %v2654_v27 = vadd.f32 %v2565_v26, %v2474_v52  ;;  %v2655_v28 = vadd.f32 %v2565_v26, %v2475_v47  ;;  %v2656_v58 = vadd.f32 %v2565_v26, %v2476_v39  ;;  %v5337_v26 = vld [vmem:[#allocation52_spill] sm:$0xff]  ;;  %v5339_v45 = vld [vmem:[#allocation75_spill] sm:$0xff] }
 0x322   :  { %2794 = vst [vmem:[#allocation7 + $0x1f0] sm:$0xff] %v2644_v42  ;;  %2795 = vst [vmem:[#allocation7 + $0x1f8] sm:$0xff] %v2645_v40  ;;  %v2352_v16 = vmul.f32 %v4684_v8, %v5330_v60  ;;  %v2353_v12 = vmul.f32 %v4684_v8, %v5331_v53  ;;  %v2354_v15 = vmul.f32 %v4684_v8, %v5332_v20  ;;  %v2177_v29 = vld [vmem:[#allocation5 + $0x348] sm:$0xff]  ;;  %v5340_v1 = vld [vmem:[#allocation74_spill] sm:$0xff] }
 0x323   :  { %2796 = vst [vmem:[#allocation7 + $0x200] sm:$0xff] %v2646_v9  ;;  %2797 = vst [vmem:[#allocation7 + $0x208] sm:$0xff] %v2647_v25  ;;  %v2355_v13 = vmul.f32 %v4684_v8, %v5333_v49  ;;  %v2356_v31 = vmul.f32 %v4684_v8, %v5334_v54  ;;  %v2357_v44 = vmul.f32 %v4684_v8, %v5335_v46  ;;  %v5341_v34 = vld [vmem:[#allocation76_spill] sm:$0xff]  ;;  %v2178_v43 = vld [vmem:[#allocation5 + $0x350] sm:$0xff] }
 0x324   :  { %2798 = vst [vmem:[#allocation7 + $0x210] sm:$0xff] %v2648_v14  ;;  %2799 = vst [vmem:[#allocation7 + $0x218] sm:$0xff] %v2649_v37  ;;  %v2358_v24 = vmul.f32 %v4684_v8, %v5336_v41  ;;  %v2359_v56 = vmul.f32 %v4684_v8, %v5337_v26  ;;  %v2360_v51 = vmul.f32 %v4684_v8, %v5338_v48  ;;  %v5342_v63 = vld [vmem:[#allocation92_spill] sm:$0xff]  ;;  %v2179_v52 = vld [vmem:[#allocation5 + $0x358] sm:$0xff] }
 0x325   :  { %2800 = vst [vmem:[#allocation7 + $0x220] sm:$0xff] %v2650_v5  ;;  %2801 = vst [vmem:[#allocation7 + $0x228] sm:$0xff] %v2651_v22  ;;  %v2361_v3 = vmul.f32 %v4684_v8, %v5339_v45  ;;  %v2362_v7 = vmul.f32 %v4684_v8, %v5340_v1  ;;  %v2363_v59 = vmul.f32 %v4684_v8, %v5341_v34  ;;  %v2180_v2 = vld [vmem:[#allocation5 + $0x360] sm:$0xff]  ;;  %v5343_v47 = vld [vmem:[#allocation62_spill] sm:$0xff] }
 0x326   :  { %2802 = vst [vmem:[#allocation7 + $0x230] sm:$0xff] %v2652_v10  ;;  %2803 = vst [vmem:[#allocation7 + $0x238] sm:$0xff] %v2653_v32  ;;  %v2364_v21 = vmul.f32 %v4684_v8, %v5342_v63  ;;  %v2365_v23 = vmul.f32 %v4684_v8, %v5343_v47  ;;  %v5344_v39 = vld [vmem:[#allocation93_spill] sm:$0xff]  ;;  %v5345_v36 = vld [vmem:[#allocation94_spill] sm:$0xff]  ;;  %v2502_v46 = vadd.f32 %v2352_v16, %v2172_v6 }
 0x327   :  { %2804 = vst [vmem:[#allocation7 + $0x240] sm:$0xff] %v2654_v27  ;;  %2805 = vst [vmem:[#allocation7 + $0x248] sm:$0xff] %v2655_v28  ;;  %v2366_v50 = vmul.f32 %v4684_v8, %v5344_v39  ;;  %v2367_v17 = vmul.f32 %v4684_v8, %v5345_v36  ;;  %v5346_v33 = vld [vmem:[#allocation109_spill] sm:$0xff]  ;;  %v2181_v11 = vld [vmem:[#allocation5 + $0x368] sm:$0xff]  ;;  %v2503_v41 = vadd.f32 %v2353_v12, %v2173_v19 }
 0x328   :  { %2806 = vst.msk [vmem:[#allocation7 + $0x250] sm:$0xff] %vm1554_vm1, %v2656_v58  ;;  %v2368_v30 = vmul.f32 %v4684_v8, %v5346_v33  ;;  %v2182_v35 = vld [vmem:[#allocation5 + $0x370] sm:$0xff]  ;;  %v2183_v0 = vld [vmem:[#allocation5 + $0x378] sm:$0xff]  ;;  %v5347_v57 = vld [vmem:[#allocation111_spill] sm:$0xff]  ;;  %v2504_v26 = vadd.f32 %v2354_v15, %v2174_v55  ;;  %v2505_v48 = vadd.f32 %v2355_v13, %v2175_v18  ;;  %v2506_v63 = vadd.f32 %v2356_v31, %v2176_v38  ;;  %v2575_v13 = vpop.permute.xlu1 %2574 }
 0x329   :  { %v2369_v62 = vmul.f32 %v4684_v8, %v5347_v57  ;;  %v5348_v4 = vld [vmem:[#allocation110_spill] sm:$0xff]  ;;  %v5349_v42 = vld [vmem:[#allocation112_spill] sm:$0xff]  ;;  %v2184_v14 = vld [vmem:[#allocation5 + $0x380] sm:$0xff]  ;;  %v2507_v47 = vadd.f32 %v2357_v44, %v2177_v29  ;;  %v2508_v39 = vadd.f32 %v2358_v24, %v2178_v43  ;;  %v2509_v36 = vadd.f32 %v2359_v56, %v2179_v52 }
 0x32a   :  { %v2370_v61 = vmul.f32 %v4684_v8, %v5348_v4  ;;  %v2371_v40 = vmul.f32 %v4684_v8, %v5349_v42  ;;  %v5350_v9 = vld [vmem:[#allocation124_spill] sm:$0xff]  ;;  %v2186_v5 = vld [vmem:[#allocation5 + $0x390] sm:$0xff]  ;;  %v5351_v22 = vld [vmem:[#allocation126_spill] sm:$0xff]  ;;  %v2510_v42 = vadd.f32 %v2360_v51, %v2180_v2  ;;  %v2682_v29 = vadd.f32 %v2575_v13, %v2502_v46 }
 0x32b   :  { %v2372_v25 = vmul.f32 %v4684_v8, %v5350_v9  ;;  %v2185_v37 = vld [vmem:[#allocation5 + $0x388] sm:$0xff]  ;;  %v2373_v10 = vmul.f32 %v4684_v8, %v5351_v22  ;;  %v5352_v32 = vld [vmem:[#allocation125_spill] sm:$0xff]  ;;  %v5353_v28 = vld [vmem:[#allocation127_spill] sm:$0xff]  ;;  %v2511_v9 = vadd.f32 %v2361_v3, %v2181_v11  ;;  %v2513_v22 = vadd.f32 %v2363_v59, %v2183_v0 }
 0x32c   :  { %v2374_v27 = vmul.f32 %v4684_v8, %v5352_v32  ;;  %v2375_v58 = vmul.f32 %v4684_v8, %v5353_v28  ;;  %v5354_v60 = vld [vmem:[#allocation133_spill] sm:$0xff]  ;;  %v2187_v20 = vld [vmem:[#allocation5 + $0x398] sm:$0xff]  ;;  %v2188_v49 = vld [vmem:[#allocation5 + $0x3a0] sm:$0xff]  ;;  %v2514_v28 = vadd.f32 %v2364_v21, %v2184_v14  ;;  %v2515_v16 = vadd.f32 %v2365_v23, %v2185_v37  ;;  %2832 = vst [vmem:[#allocation7 + $0x320] sm:$0xff] %v2682_v29 }
 0x32d   :  { %v2376_v53 = vmul.f32 %v4684_v8, %v5354_v60  ;;  %v2189_v54 = vld [vmem:[#allocation5 + $0x3a8] sm:$0xff]  ;;  %v2190_v45 = vld [vmem:[#allocation5 + $0x3b0] sm:$0xff]  ;;  %v2191_v1 = vld [vmem:[#allocation5 + $0x3b8] sm:$0xff]  ;;  %v2512_v8 = vadd.f32 %v2362_v7, %v2182_v35  ;;  %v2516_v12 = vadd.f32 %v2366_v50, %v2186_v5  ;;  %v2517_v15 = vadd.f32 %v2367_v17, %v2187_v20 }
 0x32e   :  { %v2192_v34 = vld [vmem:[#allocation5 + $0x3c0] sm:$0xff]  ;;  %v2193_v33 = vld [vmem:[#allocation5 + $0x3c8] sm:$0xff]  ;;  %v2194_v57 = vld [vmem:[#allocation5 + $0x3d0] sm:$0xff]  ;;  %v2518_v6 = vadd.f32 %v2368_v30, %v2188_v49  ;;  %v2519_v19 = vadd.f32 %v2369_v62, %v2189_v54  ;;  %v2520_v55 = vadd.f32 %v2370_v61, %v2190_v45  ;;  %v2521_v31 = vadd.f32 %v2371_v40, %v2191_v1 }
 0x32f   :  { %v2195_v4 = vld [vmem:[#allocation5 + $0x3d8] sm:$0xff]  ;;  %v2196_v32 = vld [vmem:[#allocation5 + $0x3e0] sm:$0xff]  ;;  %v2522_v44 = vadd.f32 %v2372_v25, %v2192_v34  ;;  %v2523_v24 = vadd.f32 %v2373_v10, %v2193_v33  ;;  %v2524_v56 = vadd.f32 %v2374_v27, %v2194_v57  ;;  %v2683_v51 = vadd.f32 %v2575_v13, %v2503_v41 }
 0x330   :  { %v2525_v18 = vadd.f32 %v2375_v58, %v2195_v4  ;;  %v2526_v38 = vadd.f32 %v2376_v53, %v2196_v32  ;;  %v2684_v3 = vadd.f32 %v2575_v13, %v2504_v26  ;;  %v2685_v7 = vadd.f32 %v2575_v13, %v2505_v48 }
 0x331   :  { %v2686_v59 = vadd.f32 %v2575_v13, %v2506_v63  ;;  %v2687_v43 = vadd.f32 %v2575_v13, %v2507_v47  ;;  %v2688_v21 = vadd.f32 %v2575_v13, %v2508_v39  ;;  %v2689_v52 = vadd.f32 %v2575_v13, %v2509_v36  ;;  %2833 = vst [vmem:[#allocation7 + $0x328] sm:$0xff] %v2683_v51 }
 0x332   :  { %v2690_v2 = vadd.f32 %v2575_v13, %v2510_v42  ;;  %v2691_v23 = vadd.f32 %v2575_v13, %v2511_v9  ;;  %v2692_v50 = vadd.f32 %v2575_v13, %v2512_v8  ;;  %2834 = vst [vmem:[#allocation7 + $0x330] sm:$0xff] %v2684_v3  ;;  %v2693_v17 = vadd.f32 %v2575_v13, %v2513_v22 }
 0x333   :  { %v2694_v30 = vadd.f32 %v2575_v13, %v2514_v28  ;;  %v2695_v11 = vadd.f32 %v2575_v13, %v2515_v16  ;;  %v2696_v35 = vadd.f32 %v2575_v13, %v2516_v12  ;;  %2835 = vst [vmem:[#allocation7 + $0x338] sm:$0xff] %v2685_v7  ;;  %2836 = vst [vmem:[#allocation7 + $0x340] sm:$0xff] %v2686_v59 }
 0x334   :  { %2837 = vst [vmem:[#allocation7 + $0x348] sm:$0xff] %v2687_v43  ;;  %2838 = vst [vmem:[#allocation7 + $0x350] sm:$0xff] %v2688_v21  ;;  %v2697_v0 = vadd.f32 %v2575_v13, %v2517_v15  ;;  %v2698_v62 = vadd.f32 %v2575_v13, %v2518_v6  ;;  %v2699_v61 = vadd.f32 %v2575_v13, %v2519_v19 }
 0x335   :  { %v2700_v40 = vadd.f32 %v2575_v13, %v2520_v55  ;;  %2839 = vst [vmem:[#allocation7 + $0x358] sm:$0xff] %v2689_v52  ;;  %2840 = vst [vmem:[#allocation7 + $0x360] sm:$0xff] %v2690_v2  ;;  %v2701_v25 = vadd.f32 %v2575_v13, %v2521_v31  ;;  %v2702_v14 = vadd.f32 %v2575_v13, %v2522_v44 }
 0x336   :  { %2841 = vst [vmem:[#allocation7 + $0x368] sm:$0xff] %v2691_v23  ;;  %2842 = vst [vmem:[#allocation7 + $0x370] sm:$0xff] %v2692_v50  ;;  %v2703_v37 = vadd.f32 %v2575_v13, %v2523_v24  ;;  %v2704_v5 = vadd.f32 %v2575_v13, %v2524_v56  ;;  %v2705_v10 = vadd.f32 %v2575_v13, %v2525_v18 }
 0x337   :  { %2843 = vst [vmem:[#allocation7 + $0x378] sm:$0xff] %v2693_v17  ;;  %2844 = vst [vmem:[#allocation7 + $0x380] sm:$0xff] %v2694_v30  ;;  %v2706_v27 = vadd.f32 %v2575_v13, %v2526_v38 }
 0x338   :  { %2845 = vst [vmem:[#allocation7 + $0x388] sm:$0xff] %v2695_v11  ;;  %2846 = vst [vmem:[#allocation7 + $0x390] sm:$0xff] %v2696_v35 }
 0x339   :  { %2847 = vst [vmem:[#allocation7 + $0x398] sm:$0xff] %v2697_v0  ;;  %2848 = vst [vmem:[#allocation7 + $0x3a0] sm:$0xff] %v2698_v62 }
 0x33a   :  { %2849 = vst [vmem:[#allocation7 + $0x3a8] sm:$0xff] %v2699_v61  ;;  %2850 = vst [vmem:[#allocation7 + $0x3b0] sm:$0xff] %v2700_v40 }
 0x33b   :  { %2851 = vst [vmem:[#allocation7 + $0x3b8] sm:$0xff] %v2701_v25  ;;  %2852 = vst [vmem:[#allocation7 + $0x3c0] sm:$0xff] %v2702_v14 }
 0x33c   :  { %2853 = vst [vmem:[#allocation7 + $0x3c8] sm:$0xff] %v2703_v37  ;;  %2854 = vst [vmem:[#allocation7 + $0x3d0] sm:$0xff] %v2704_v5 }
 0x33d   :  { %2855 = vst [vmem:[#allocation7 + $0x3d8] sm:$0xff] %v2705_v10  ;;  %2856 = vst.msk [vmem:[#allocation7 + $0x3e0] sm:$0xff] %vm1554_vm1, %v2706_v27 }
 0x33e   :  { %3095 = shalt.err (!%p3092_p0)
}
 0x33f   :  { %2893 = dma.vmem_to_hbm [thread:$0]  %s2888_s12, 19200, %s4835_s5, [#allocation4], %s3111_s21, %s3111_s21, %s3112_s22  }
 0x340   :  { %3108 = dma.done.wait [#allocation4], 19200  }
 0x341   :  { %3109 = vsyncadd [#allocation4], 4294948096 }
 0x342   :  { %2897 = vsyncpa [#allocation3], 1 }
 0x343   :  { %2898 = vsyncpa [#allocation6], 1 }
 0x344   :  { %2899 = vsyncpa [#allocation4], 1 }

</bundles_post_ra>
